<compile_context>
chip_gen: v5e
topology: v5e:2x2
jax: 0.10.0
libtpu: 0.0.40
codegen_flags: <defaults>
</compile_context>

<pallas_src>
import math

import jax
import jax.numpy as jnp
from jax.experimental import pallas as pl
from jax.experimental.pallas import tpu as pltpu

# logical sizes (torch module) and padded (lane-dense) sizes
D_IN, H, LAT = 784, 400, 20
PD_IN, PH, PLAT = 896, 512, 128          # 7*128, 4*128, 1*128


def _round_up(x, m):
    return (x + m - 1) // m * m


def _pick_tb(batch):
    """Batch-tile rows: >=2 tiles when possible (v7x megacore), capped for v5e VMEM."""
    b8 = _round_up(max(batch, 1), 8)
    if b8 <= 128:
        return b8          # single tile; too small to split profitably
    if b8 <= 512:
        return 128         # 2-4 balanced tiles -> both v7x TensorCores busy
    return 256             # MXU-filling, still safe in v5e's 16 MiB scoped VMEM


def vae_fwd_kernel(x_ref, eps_ref,
                   w1_ref, b1_ref,
                   wh_ref, bh_ref,
                   w3_ref, b3_ref,
                   w4_ref, b4_ref,
                   recon_ref, ml_ref, z_ref):
    # ---- encode: fc1 + relu (bf16 operands, f32 accumulate) ----
    h1 = jnp.dot(x_ref[...], w1_ref[...],
                 preferred_element_type=jnp.float32) + b1_ref[...]      # (TB, 512)
    h1 = jnp.maximum(h1, 0.0).astype(jnp.bfloat16)

    # ---- fused fc21|fc22 head: one (512, 256) matmul ----
    # lanes: [0:20]=mu  [20:40]=logvar  [40:128]=0  [128:148]=logvar  [148:256]=0
    head = jnp.dot(h1, wh_ref[...],
                   preferred_element_type=jnp.float32) + bh_ref[...]    # (TB, 256)
    head_a = head[:, :PLAT]       # [mu | logvar | 0]        (128-lane aligned slice)
    head_b = head[:, PLAT:]       # [logvar | 0]  aligned with eps lanes 0:20

    # ---- reparametrize: z = eps * exp(0.5*logvar) + mu ----
    # head_b lanes >= 20 are exactly 0 -> exp(0)=1, and eps is 0 there, so no junk/NaN.
    std = jnp.exp(0.5 * head_b)
    z_full = eps_ref[...] * std + head_a          # lanes 0:20=z, 20:40=logvar, rest 0

    # ---- decode: fc3 + relu ; fc4 + sigmoid ----
    # w3 rows >= 20 are zero, so the non-z lanes of z_full contribute nothing.
    h3 = jnp.dot(z_full.astype(jnp.bfloat16), w3_ref[...],
                 preferred_element_type=jnp.float32) + b3_ref[...]      # (TB, 512)
    h3 = jnp.maximum(h3, 0.0).astype(jnp.bfloat16)
    logits = jnp.dot(h3, w4_ref[...],
                     preferred_element_type=jnp.float32) + b4_ref[...]  # (TB, 896)
    # bf16 sigmoid + bf16 store: native EUP rate on v6e/v7x, half the writeback bytes.
    recon_ref[...] = jax.nn.sigmoid(logits.astype(jnp.bfloat16))

    # lane-dense latent outputs (no masked stores); sliced in the wrapper
    ml_ref[...] = head_a                                               # mu | logvar
    z_ref[...] = z_full                                                # z  | junk


def init_linear(key, fan_in, fan_out):
    # Mimic torch.nn.Linear default init: U(-1/sqrt(fan_in), 1/sqrt(fan_in)).
    # Weight stored transposed as (in, out), bias as (1, out).
    kw, kb = jax.random.split(key)
    bound = 1.0 / math.sqrt(fan_in)
    w = jax.random.uniform(kw, (fan_in, fan_out), jnp.float32, -bound, bound)
    b = jax.random.uniform(kb, (1, fan_out), jnp.float32, -bound, bound)
    return w, b


def init_params(key):
    keys = jax.random.split(key, 5)
    p = {}
    p["w1"], p["b1"] = init_linear(keys[0], D_IN, H)
    p["w21"], p["b21"] = init_linear(keys[1], H, LAT)
    p["w22"], p["b22"] = init_linear(keys[2], H, LAT)
    p["w3"], p["b3"] = init_linear(keys[3], LAT, H)
    p["w4"], p["b4"] = init_linear(keys[4], H, D_IN)
    return p


def pack_params(p):
    """Zero-pad to lane-dense shapes, fuse fc21|fc22, cast weights to bf16."""
    bf = lambda a: a.astype(jnp.bfloat16)

    w1p = jnp.zeros((PD_IN, PH), jnp.bfloat16).at[:D_IN, :H].set(bf(p["w1"]))
    b1p = jnp.zeros((1, PH), jnp.float32).at[:, :H].set(p["b1"])

    # fused head (512, 256): cols 0:20=mu, 20:40=logvar, 128:148=logvar (aligned copy)
    whp = jnp.zeros((PH, 2 * PLAT), jnp.bfloat16)
    whp = whp.at[:H, 0:LAT].set(bf(p["w21"]))
    whp = whp.at[:H, LAT:2 * LAT].set(bf(p["w22"]))
    whp = whp.at[:H, PLAT:PLAT + LAT].set(bf(p["w22"]))
    bhp = jnp.zeros((1, 2 * PLAT), jnp.float32)
    bhp = bhp.at[:, 0:LAT].set(p["b21"])
    bhp = bhp.at[:, LAT:2 * LAT].set(p["b22"])
    bhp = bhp.at[:, PLAT:PLAT + LAT].set(p["b22"])

    w3p = jnp.zeros((PLAT, PH), jnp.bfloat16).at[:LAT, :H].set(bf(p["w3"]))
    b3p = jnp.zeros((1, PH), jnp.float32).at[:, :H].set(p["b3"])

    w4p = jnp.zeros((PH, PD_IN), jnp.bfloat16).at[:H, :D_IN].set(bf(p["w4"]))
    b4p = jnp.zeros((1, PD_IN), jnp.float32).at[:, :D_IN].set(p["b4"])

    return (w1p, b1p, whp, bhp, w3p, b3p, w4p, b4p)


def vae_forward(x, eps, packed):
    B = x.shape[0]
    TB = _pick_tb(B)
    Bp = _round_up(B, TB)

    # pad + cast fused into one wrapper op each; x travels in bf16
    xp = jnp.zeros((Bp, PD_IN), jnp.bfloat16).at[:B, :D_IN].set(x.astype(jnp.bfloat16))
    ep = jnp.zeros((Bp, PLAT), jnp.float32).at[:B, :LAT].set(eps)

    w1p, b1p, whp, bhp, w3p, b3p, w4p, b4p = packed

    row_map = lambda i: (i, 0)     # batch-tiled activations / outputs
    const_map = lambda i: (0, 0)   # weights: DMA'd once, stay resident in VMEM

    flops = 2 * Bp * (PD_IN * PH + PH * (2 * PLAT) + PLAT * PH + PH * PD_IN)
    transcendentals = Bp * (PLAT + PD_IN)                    # exp(std) + sigmoid
    weight_bytes = sum(int(a.size) * a.dtype.itemsize
                       for a in (w1p, b1p, whp, bhp, w3p, b3p, w4p, b4p))
    act_bytes = (xp.size * 2 + ep.size * 4          # inputs
                 + Bp * PD_IN * 2                   # recon (bf16)
                 + 2 * Bp * PLAT * 4)               # mu|logvar + z slabs (f32)

    recon_full, ml, zf = pl.pallas_call(
        vae_fwd_kernel,
        out_shape=(jax.ShapeDtypeStruct((Bp, PD_IN), jnp.bfloat16),
                   jax.ShapeDtypeStruct((Bp, PLAT), jnp.float32),
                   jax.ShapeDtypeStruct((Bp, PLAT), jnp.float32)),
        grid=(Bp // TB,),
        in_specs=[
            pl.BlockSpec((TB, PD_IN), row_map),     # x (bf16)
            pl.BlockSpec((TB, PLAT), row_map),      # eps (f32)
            pl.BlockSpec(w1p.shape, const_map),
            pl.BlockSpec(b1p.shape, const_map),
            pl.BlockSpec(whp.shape, const_map),
            pl.BlockSpec(bhp.shape, const_map),
            pl.BlockSpec(w3p.shape, const_map),
            pl.BlockSpec(b3p.shape, const_map),
            pl.BlockSpec(w4p.shape, const_map),
            pl.BlockSpec(b4p.shape, const_map),
        ],
        out_specs=(pl.BlockSpec((TB, PD_IN), row_map),
                   pl.BlockSpec((TB, PLAT), row_map),
                   pl.BlockSpec((TB, PLAT), row_map)),
        compiler_params=pltpu.CompilerParams(
            dimension_semantics=("parallel",)),     # batch tiles shard across v7x's 2 TCs
        cost_estimate=pl.CostEstimate(flops=int(flops),
                                      transcendentals=int(transcendentals),
                                      bytes_accessed=int(weight_bytes + act_bytes)),
    )(xp, ep, w1p, b1p, whp, bhp, w3p, b3p, w4p, b4p)

    # slice the lane-dense outputs back to logical shapes (cast fused into the slice)
    recon = recon_full[:B, :D_IN].astype(jnp.float32)
    mu = ml[:B, 0:LAT]
    logvar = ml[:B, LAT:2 * LAT]
    z = zf[:B, 0:LAT]
    return recon, z, mu, logvar


def reference_forward(x, eps, p):
    # Pure f32 JAX reference matching the PyTorch module semantics.
    h1 = jnp.maximum(x @ p["w1"] + p["b1"], 0.0)
    mu = h1 @ p["w21"] + p["b21"]
    logvar = h1 @ p["w22"] + p["b22"]
    z = eps * jnp.exp(0.5 * logvar) + mu
    h3 = jnp.maximum(z @ p["w3"] + p["b3"], 0.0)
    recon = jax.nn.sigmoid(h3 @ p["w4"] + p["b4"])
    return recon, z, mu, logvar


if __name__ == "__main__":
    key = jax.random.PRNGKey(0)
    k_params, k_x, k_eps = jax.random.split(key, 3)

    B = 8
    params = init_params(k_params)
    packed = pack_params(params)
    x = jax.random.uniform(k_x, (B, D_IN), jnp.float32)     # MNIST-like pixels in [0,1)
    # The torch module samples eps internally (torch RNG); here eps is an explicit
    # input so the forward is deterministic and checkable.
    eps = jax.random.normal(k_eps, (B, LAT), jnp.float32)

    fwd = jax.jit(vae_forward)
    recon, z, mu, logvar = jax.block_until_ready(fwd(x, eps, packed))

    # correctness check vs f32 reference (bf16 weights/activations -> loose tolerance)
    ref = reference_forward(x, eps, params)
    for name, got, want in zip(("recon", "z", "mu", "logvar"),
                               (recon, z, mu, logvar), ref):
        assert got.shape == want.shape, (name, got.shape, want.shape)
        err = float(jnp.max(jnp.abs(got.astype(jnp.float32) - want)))
        scale = 1.0 + float(jnp.max(jnp.abs(want)))
        assert err / scale < 2e-2, (name, err, scale)

    print("KERNEL_OK")
</pallas_src>

<mosaic_0001>
module attributes {stable_mosaic.version = 11 : i64} {
  func.func @vae_fwd_kernel(%arg0: i32, %arg1: memref<8x896xbf16, #tpu.memory_space<vmem>>, %arg2: memref<8x128xf32, #tpu.memory_space<vmem>>, %arg3: memref<896x512xbf16, #tpu.memory_space<vmem>>, %arg4: memref<1x512xf32, #tpu.memory_space<vmem>>, %arg5: memref<512x256xbf16, #tpu.memory_space<vmem>>, %arg6: memref<1x256xf32, #tpu.memory_space<vmem>>, %arg7: memref<128x512xbf16, #tpu.memory_space<vmem>>, %arg8: memref<1x512xf32, #tpu.memory_space<vmem>>, %arg9: memref<512x896xbf16, #tpu.memory_space<vmem>>, %arg10: memref<1x896xf32, #tpu.memory_space<vmem>>, %arg11: memref<8x896xbf16, #tpu.memory_space<vmem>>, %arg12: memref<8x128xf32, #tpu.memory_space<vmem>>, %arg13: memref<8x128xf32, #tpu.memory_space<vmem>>) attributes {dimension_semantics = [#tpu.dimension_semantics<parallel>], iteration_bounds = array<i64: 1>, scalar_prefetch = 0 : i64, scratch_operands = 0 : i64, tpu.core_type = #tpu.core_type<tc>, window_params = [{transform_indices = @transform_0, window_bounds = array<i64: 8, 896>}, {transform_indices = @transform_1, window_bounds = array<i64: 8, 128>}, {pipeline_mode = #tpu.pipeline_mode<synchronous>, transform_indices = @transform_2, window_bounds = array<i64: 896, 512>}, {pipeline_mode = #tpu.pipeline_mode<synchronous>, transform_indices = @transform_3, window_bounds = array<i64: 1, 512>}, {pipeline_mode = #tpu.pipeline_mode<synchronous>, transform_indices = @transform_4, window_bounds = array<i64: 512, 256>}, {pipeline_mode = #tpu.pipeline_mode<synchronous>, transform_indices = @transform_5, window_bounds = array<i64: 1, 256>}, {pipeline_mode = #tpu.pipeline_mode<synchronous>, transform_indices = @transform_6, window_bounds = array<i64: 128, 512>}, {pipeline_mode = #tpu.pipeline_mode<synchronous>, transform_indices = @transform_7, window_bounds = array<i64: 1, 512>}, {pipeline_mode = #tpu.pipeline_mode<synchronous>, transform_indices = @transform_8, window_bounds = array<i64: 512, 896>}, {pipeline_mode = #tpu.pipeline_mode<synchronous>, transform_indices = @transform_9, window_bounds = array<i64: 1, 896>}, {transform_indices = @transform_10, window_bounds = array<i64: 8, 896>}, {transform_indices = @transform_11, window_bounds = array<i64: 8, 128>}, {transform_indices = @transform_12, window_bounds = array<i64: 8, 128>}]} {
    %c0 = arith.constant 0 : index
    %c0_0 = arith.constant 0 : index
    %0 = vector.load %arg1[%c0, %c0_0] : memref<8x896xbf16, #tpu.memory_space<vmem>>, vector<8x896xbf16>
    %c0_1 = arith.constant 0 : index
    %c0_2 = arith.constant 0 : index
    %1 = vector.load %arg3[%c0_1, %c0_2] : memref<896x512xbf16, #tpu.memory_space<vmem>>, vector<896x512xbf16>
    %cst = arith.constant dense<0.000000e+00> : vector<8x512xf32>
    %2 = tpu.matmul %0, %1, %cst {dimension_numbers = #tpu.dot_dimension_numbers<[1], [0], [0], [1], [0, 0, 1, 1], [], []>} : vector<8x896xbf16>, vector<896x512xbf16>, vector<8x512xf32> -> vector<8x512xf32>
    %c0_3 = arith.constant 0 : index
    %c0_4 = arith.constant 0 : index
    %3 = vector.load %arg4[%c0_3, %c0_4] : memref<1x512xf32, #tpu.memory_space<vmem>>, vector<1x512xf32>
    %4 = vector.broadcast %3 : vector<1x512xf32> to vector<8x512xf32>
    %5 = arith.addf %2, %4 : vector<8x512xf32>
    %cst_5 = arith.constant 0.000000e+00 : f32
    %6 = vector.broadcast %cst_5 : f32 to vector<8x512xf32>
    %7 = arith.maximumf %5, %6 : vector<8x512xf32>
    %8 = arith.truncf %7 : vector<8x512xf32> to vector<8x512xbf16>
    %c0_6 = arith.constant 0 : index
    %c0_7 = arith.constant 0 : index
    %9 = vector.load %arg5[%c0_6, %c0_7] : memref<512x256xbf16, #tpu.memory_space<vmem>>, vector<512x256xbf16>
    %cst_8 = arith.constant dense<0.000000e+00> : vector<8x256xf32>
    %10 = tpu.matmul %8, %9, %cst_8 {dimension_numbers = #tpu.dot_dimension_numbers<[1], [0], [0], [1], [0, 0, 1, 1], [], []>} : vector<8x512xbf16>, vector<512x256xbf16>, vector<8x256xf32> -> vector<8x256xf32>
    %c0_9 = arith.constant 0 : index
    %c0_10 = arith.constant 0 : index
    %11 = vector.load %arg6[%c0_9, %c0_10] : memref<1x256xf32, #tpu.memory_space<vmem>>, vector<1x256xf32>
    %12 = vector.broadcast %11 : vector<1x256xf32> to vector<8x256xf32>
    %13 = arith.addf %10, %12 : vector<8x256xf32>
    %14 = vector.extract_strided_slice %13 {offsets = [0, 0], sizes = [8, 128], strides = [1, 1]} : vector<8x256xf32> to vector<8x128xf32>
    %15 = vector.extract_strided_slice %13 {offsets = [0, 128], sizes = [8, 128], strides = [1, 1]} : vector<8x256xf32> to vector<8x128xf32>
    %cst_11 = arith.constant 5.000000e-01 : f32
    %16 = vector.broadcast %cst_11 : f32 to vector<8x128xf32>
    %17 = arith.mulf %16, %15 : vector<8x128xf32>
    %18 = math.exp %17 : vector<8x128xf32>
    %c0_12 = arith.constant 0 : index
    %c0_13 = arith.constant 0 : index
    %19 = vector.load %arg2[%c0_12, %c0_13] : memref<8x128xf32, #tpu.memory_space<vmem>>, vector<8x128xf32>
    %20 = arith.mulf %19, %18 : vector<8x128xf32>
    %21 = arith.addf %20, %14 : vector<8x128xf32>
    %22 = arith.truncf %21 : vector<8x128xf32> to vector<8x128xbf16>
    %c0_14 = arith.constant 0 : index
    %c0_15 = arith.constant 0 : index
    %23 = vector.load %arg7[%c0_14, %c0_15] : memref<128x512xbf16, #tpu.memory_space<vmem>>, vector<128x512xbf16>
    %cst_16 = arith.constant dense<0.000000e+00> : vector<8x512xf32>
    %24 = tpu.matmul %22, %23, %cst_16 {dimension_numbers = #tpu.dot_dimension_numbers<[1], [0], [0], [1], [0, 0, 1, 1], [], []>} : vector<8x128xbf16>, vector<128x512xbf16>, vector<8x512xf32> -> vector<8x512xf32>
    %c0_17 = arith.constant 0 : index
    %c0_18 = arith.constant 0 : index
    %25 = vector.load %arg8[%c0_17, %c0_18] : memref<1x512xf32, #tpu.memory_space<vmem>>, vector<1x512xf32>
    %26 = vector.broadcast %25 : vector<1x512xf32> to vector<8x512xf32>
    %27 = arith.addf %24, %26 : vector<8x512xf32>
    %cst_19 = arith.constant 0.000000e+00 : f32
    %28 = vector.broadcast %cst_19 : f32 to vector<8x512xf32>
    %29 = arith.maximumf %27, %28 : vector<8x512xf32>
    %30 = arith.truncf %29 : vector<8x512xf32> to vector<8x512xbf16>
    %c0_20 = arith.constant 0 : index
    %c0_21 = arith.constant 0 : index
    %31 = vector.load %arg9[%c0_20, %c0_21] : memref<512x896xbf16, #tpu.memory_space<vmem>>, vector<512x896xbf16>
    %cst_22 = arith.constant dense<0.000000e+00> : vector<8x896xf32>
    %32 = tpu.matmul %30, %31, %cst_22 {dimension_numbers = #tpu.dot_dimension_numbers<[1], [0], [0], [1], [0, 0, 1, 1], [], []>} : vector<8x512xbf16>, vector<512x896xbf16>, vector<8x896xf32> -> vector<8x896xf32>
    %c0_23 = arith.constant 0 : index
    %c0_24 = arith.constant 0 : index
    %33 = vector.load %arg10[%c0_23, %c0_24] : memref<1x896xf32, #tpu.memory_space<vmem>>, vector<1x896xf32>
    %34 = vector.broadcast %33 : vector<1x896xf32> to vector<8x896xf32>
    %35 = arith.addf %32, %34 : vector<8x896xf32>
    %36 = arith.truncf %35 : vector<8x896xf32> to vector<8x896xbf16>
    %37 = arith.negf %36 : vector<8x896xbf16>
    %38 = math.exp %37 : vector<8x896xbf16>
    %cst_25 = arith.constant 1.000000e+00 : bf16
    %39 = vector.broadcast %cst_25 : bf16 to vector<8x896xbf16>
    %40 = arith.addf %39, %38 : vector<8x896xbf16>
    %41 = arith.divf %39, %40 : vector<8x896xbf16>
    %c0_26 = arith.constant 0 : index
    %c0_27 = arith.constant 0 : index
    %42 = vector.load %arg11[%c0_26, %c0_27] : memref<8x896xbf16, #tpu.memory_space<vmem>>, vector<8x896xbf16>
    tpu.vector_store %arg11[%c0_26, %c0_27], %41 {strides = array<i32>} : memref<8x896xbf16, #tpu.memory_space<vmem>>, vector<8x896xbf16>,
    %c0_28 = arith.constant 0 : index
    %c0_29 = arith.constant 0 : index
    %43 = vector.load %arg12[%c0_28, %c0_29] : memref<8x128xf32, #tpu.memory_space<vmem>>, vector<8x128xf32>
    tpu.vector_store %arg12[%c0_28, %c0_29], %14 {strides = array<i32>} : memref<8x128xf32, #tpu.memory_space<vmem>>, vector<8x128xf32>,
    %c0_30 = arith.constant 0 : index
    %c0_31 = arith.constant 0 : index
    %44 = vector.load %arg13[%c0_30, %c0_31] : memref<8x128xf32, #tpu.memory_space<vmem>>, vector<8x128xf32>
    tpu.vector_store %arg13[%c0_30, %c0_31], %21 {strides = array<i32>} : memref<8x128xf32, #tpu.memory_space<vmem>>, vector<8x128xf32>,
    return
  }
  func.func @transform_0(%arg0: i32) -> (i32, i32) {
    %c0_i32 = arith.constant 0 : i32
    %c0_i32_0 = arith.constant 0 : i32
    return %arg0, %c0_i32 : i32, i32
  }
  func.func @transform_1(%arg0: i32) -> (i32, i32) {
    %c0_i32 = arith.constant 0 : i32
    %c0_i32_0 = arith.constant 0 : i32
    return %arg0, %c0_i32 : i32, i32
  }
  func.func @transform_2(%arg0: i32) -> (i32, i32) {
    %c0_i32 = arith.constant 0 : i32
    %c0_i32_0 = arith.constant 0 : i32
    %c0_i32_1 = arith.constant 0 : i32
    return %c0_i32, %c0_i32_0 : i32, i32
  }
  func.func @transform_3(%arg0: i32) -> (i32, i32) {
    %c0_i32 = arith.constant 0 : i32
    %c0_i32_0 = arith.constant 0 : i32
    %c0_i32_1 = arith.constant 0 : i32
    return %c0_i32, %c0_i32_0 : i32, i32
  }
  func.func @transform_4(%arg0: i32) -> (i32, i32) {
    %c0_i32 = arith.constant 0 : i32
    %c0_i32_0 = arith.constant 0 : i32
    %c0_i32_1 = arith.constant 0 : i32
    return %c0_i32, %c0_i32_0 : i32, i32
  }
  func.func @transform_5(%arg0: i32) -> (i32, i32) {
    %c0_i32 = arith.constant 0 : i32
    %c0_i32_0 = arith.constant 0 : i32
    %c0_i32_1 = arith.constant 0 : i32
    return %c0_i32, %c0_i32_0 : i32, i32
  }
  func.func @transform_6(%arg0: i32) -> (i32, i32) {
    %c0_i32 = arith.constant 0 : i32
    %c0_i32_0 = arith.constant 0 : i32
    %c0_i32_1 = arith.constant 0 : i32
    return %c0_i32, %c0_i32_0 : i32, i32
  }
  func.func @transform_7(%arg0: i32) -> (i32, i32) {
    %c0_i32 = arith.constant 0 : i32
    %c0_i32_0 = arith.constant 0 : i32
    %c0_i32_1 = arith.constant 0 : i32
    return %c0_i32, %c0_i32_0 : i32, i32
  }
  func.func @transform_8(%arg0: i32) -> (i32, i32) {
    %c0_i32 = arith.constant 0 : i32
    %c0_i32_0 = arith.constant 0 : i32
    %c0_i32_1 = arith.constant 0 : i32
    return %c0_i32, %c0_i32_0 : i32, i32
  }
  func.func @transform_9(%arg0: i32) -> (i32, i32) {
    %c0_i32 = arith.constant 0 : i32
    %c0_i32_0 = arith.constant 0 : i32
    %c0_i32_1 = arith.constant 0 : i32
    return %c0_i32, %c0_i32_0 : i32, i32
  }
  func.func @transform_10(%arg0: i32) -> (i32, i32) {
    %c0_i32 = arith.constant 0 : i32
    %c0_i32_0 = arith.constant 0 : i32
    return %arg0, %c0_i32 : i32, i32
  }
  func.func @transform_11(%arg0: i32) -> (i32, i32) {
    %c0_i32 = arith.constant 0 : i32
    %c0_i32_0 = arith.constant 0 : i32
    return %arg0, %c0_i32 : i32, i32
  }
  func.func @transform_12(%arg0: i32) -> (i32, i32) {
    %c0_i32 = arith.constant 0 : i32
    %c0_i32_0 = arith.constant 0 : i32
    return %arg0, %c0_i32 : i32, i32
  }
}

</mosaic_0001>

<bundles_post_ra>
// kernel: vae_forward.1
= control target key start
LH: loop header
LB: loop body
LE: loop exit
PB: predicated region body
PF: predicated region fallthrough
CT: control target
= control target key end

     0   :  { %18 = vsyncpa [#allocation3], 0  ;;  %s7719_s0 = inlined_call_operand.vmem [shape: bf16[8,896], index: 0, kind: input, shape index: {}]   ;;  %s7720_s1 = inlined_call_operand.vmem [shape: f32[8,128], index: 1, kind: input, shape index: {}]   ;;  %s7721_s2 = inlined_call_operand.hbm [shape: bf16[896,512], index: 2, kind: input, shape index: {}]   ;;  %s7722_s3 = inlined_call_operand.vmem [shape: f32[1,512], index: 3, kind: input, shape index: {}]   ;;  %s7723_s4 = inlined_call_operand.hbm [shape: bf16[512,256], index: 4, kind: input, shape index: {}]   ;;  %s7724_s5 = inlined_call_operand.vmem [shape: f32[1,256], index: 5, kind: input, shape index: {}]   ;;  %s7725_s6 = inlined_call_operand.hbm [shape: bf16[128,512], index: 6, kind: input, shape index: {}]   ;;  %s7726_s7 = inlined_call_operand.vmem [shape: f32[1,512], index: 7, kind: input, shape index: {}]   ;;  %s7727_s8 = inlined_call_operand.hbm [shape: bf16[512,896], index: 8, kind: input, shape index: {}]   ;;  %s7728_s9 = inlined_call_operand.vmem [shape: f32[1,896], index: 9, kind: input, shape index: {}]   ;;  %s7729_s10 = inlined_call_operand.vmem [shape: bf16[8,896], index: 10, kind: output, shape index: {0}]   ;;  %s7730_s11 = inlined_call_operand.vmem [shape: f32[8,128], index: 11, kind: output, shape index: {1}]   ;;  %s7731_s12 = inlined_call_operand.hbm [shape: f32[8,128], index: 12, kind: output, shape index: {2}]  }
   0x1   :  { %19 = vsyncpa [#allocation6], 0 }
   0x2   :  { %20 = vsyncpa [#allocation9], 0  ;;  %s45_s23 = sshll.u32 %s7723_s4, 4  ;;  %s46_s23 = int_to_ptr.hbm [resolvable:$true] %s45_s23 }
   0x3   :  { %21 = vsyncpa [#allocation4], 0  ;;  %s7415_s24 = smov [#allocation5]   ;;  %s30_s28 = sshll.u32 %s7721_s2, 4  ;;  %s31_s28 = int_to_ptr.hbm [resolvable:$true] %s30_s28 }
   0x4   :  { %s47_s25 = sshll.u32 %s7415_s24, 4  ;;  %s7416_s29 = smov 128   ;;  %s48_s25 = int_to_ptr.vmem [resolvable:$true] %s47_s25 }
   0x5   :  { %s7417_s30 = smov 8   ;;  %s7418_s13 = smov [#allocation2]  }
   0x6   :  { %53 = dma.hbm_to_vmem [thread:$0]  %s46_s23, 8192, %s48_s25, [#allocation6], %s7416_s29, %s7416_s29, %s7417_s30  }
   0x7   :  { %s32_s14 = sshll.u32 %s7418_s13, 4  ;;  %s7419_s15 = smov 256   ;;  %s33_s14 = int_to_ptr.vmem [resolvable:$true] %s32_s14 }
   0x8   :  { %s7420_s16 = smov 16   ;;  %s60_s18 = sshll.u32 %s7725_s6, 4  ;;  %s61_s18 = int_to_ptr.hbm [resolvable:$true] %s60_s18 }
   0x9   :  { %38 = dma.hbm_to_vmem [thread:$0]  %s31_s28, 28672, %s33_s14, [#allocation3], %s7419_s15, %s7419_s15, %s7420_s16  }
   0xa   :  { %s7421_s19 = smov [#allocation7]   ;;  %s75_s22 = sshll.u32 %s7727_s8, 4  ;;  %s76_s22 = int_to_ptr.hbm [resolvable:$true] %s75_s22 }
   0xb   :  { %s62_s20 = sshll.u32 %s7421_s19, 4  ;;  %s7422_s23 = smov [#allocation8]   ;;  %s63_s20 = int_to_ptr.vmem [resolvable:$true] %s62_s20 }
   0xc   :  { %68 = dma.hbm_to_vmem [thread:$0]  %s61_s18, 4096, %s63_s20, [#allocation6], %s7419_s15, %s7419_s15, %s7420_s16  }
   0xd   :  { %s77_s24 = sshll.u32 %s7422_s23, 4  ;;  %s7423_s25 = smov 448   ;;  %s78_s24 = int_to_ptr.vmem [resolvable:$true] %s77_s24 }
   0xe   :  { %s7424_s26 = smov 28  }
   0xf   :  { %83 = dma.hbm_to_vmem [thread:$0]  %s76_s22, 28672, %s78_s24, [#allocation9], %s7423_s25, %s7423_s25, %s7424_s26  }
  0x10   :  { %7407 = dma.done.wait [#allocation3], 28672  }
  0x11   :  { %7408 = vsyncadd [#allocation3], 4294938624 }
  0x12   :  { %7409 = dma.done.wait [#allocation6], 12288  }
  0x13   :  { %7410 = vsyncadd [#allocation6], 4294955008 }
  0x14   :  { %7411 = dma.done.wait [#allocation9], 28672  }
  0x15   :  { %7412 = vsyncadd [#allocation9], 4294938624  ;;  %v4637_v0 = vld [vmem:[#allocation2 + $0xe0] sm:$0xf]  ;;  %v6729_v1 = vld [vmem:[#allocation2 + $0xec] sm:$0xf0] }
  0x16   :  { %v4765_v2 = vld [vmem:[#allocation2 + $0x1e0] sm:$0xf]  ;;  %v4638_v3 = vor.u32 %v6729_v1, %v4637_v0  ;;  %v6761_v4 = vld [vmem:[#allocation2 + $0x1ec] sm:$0xf0]  ;;  %s7426_s21 = smov [#allocation10]   ;;  %s4507_s24 = sshll.u32 %s7731_s12, 4  ;;  %s4508_s24 = int_to_ptr.hbm [resolvable:$true] %s4507_s24 }
  0x17   :  { %v4893_v5 = vld [vmem:[#allocation2 + $0x2e0] sm:$0xf]  ;;  %v6793_v6 = vld [vmem:[#allocation2 + $0x2ec] sm:$0xf0]  ;;  %v4766_v7 = vor.u32 %v6761_v4, %v4765_v2  ;;  %s4505_s2 = sshll.u32 %s7426_s21, 4  ;;  %s4506_s2 = int_to_ptr.vmem [resolvable:$true] %s4505_s2 }
  0x18   :  { %v4894_v8 = vor.u32 %v6793_v6, %v4893_v5  ;;  %v5021_v9 = vld [vmem:[#allocation2 + $0x3e0] sm:$0xf]  ;;  %v6825_v10 = vld [vmem:[#allocation2 + $0x3ec] sm:$0xf0]  ;;  %1486 = vmatpush.bf16.msra.mxu0 %v4638_v3 }
  0x19   :  { %v4621_v11 = vld [vmem:[#allocation2 + $0xc0] sm:$0xf]  ;;  %v5022_v12 = vor.u32 %v6825_v10, %v5021_v9  ;;  %v6725_v13 = vld [vmem:[#allocation2 + $0xcc] sm:$0xf0]  ;;  %1499 = vmatpush.bf16.msra.mxu1 %v4766_v7 }
  0x1a   :  { %v4749_v14 = vld [vmem:[#allocation2 + $0x1c0] sm:$0xf]  ;;  %v6757_v15 = vld [vmem:[#allocation2 + $0x1cc] sm:$0xf0]  ;;  %1512 = vmatpush.bf16.msra.mxu2 %v4894_v8  ;;  %v4622_v16 = vor.u32 %v6725_v13, %v4621_v11 }
  0x1b   :  { %v4750_v17 = vor.u32 %v6757_v15, %v4749_v14  ;;  %v4877_v18 = vld [vmem:[#allocation2 + $0x2c0] sm:$0xf]  ;;  %v6789_v19 = vld [vmem:[#allocation2 + $0x2cc] sm:$0xf0]  ;;  %1525 = vmatpush.bf16.msra.mxu3 %v5022_v12 }
  0x1c   :  { %v5005_v20 = vld [vmem:[#allocation2 + $0x3c0] sm:$0xf]  ;;  %v4878_v21 = vor.u32 %v6789_v19, %v4877_v18  ;;  %v6821_v22 = vld [vmem:[#allocation2 + $0x3cc] sm:$0xf0]  ;;  %1487 = vmatpush.bf16.msra.mxu0 %v4622_v16 }
  0x1d   :  { %v4605_v23 = vld [vmem:[#allocation2 + $0xa0] sm:$0xf]  ;;  %v6721_v24 = vld [vmem:[#allocation2 + $0xac] sm:$0xf0]  ;;  %v5006_v25 = vor.u32 %v6821_v22, %v5005_v20  ;;  %1500 = vmatpush.bf16.msra.mxu1 %v4750_v17 }
  0x1e   :  { %v4733_v26 = vld [vmem:[#allocation2 + $0x1a0] sm:$0xf]  ;;  %v6753_v27 = vld [vmem:[#allocation2 + $0x1ac] sm:$0xf0]  ;;  %v4606_v29 = vor.u32 %v6721_v24, %v4605_v23  ;;  %1513 = vmatpush.bf16.msra.mxu2 %v4878_v21 }
  0x1f   :  { %v4861_v28 = vld [vmem:[#allocation2 + $0x2a0] sm:$0xf]  ;;  %v6785_v30 = vld [vmem:[#allocation2 + $0x2ac] sm:$0xf0]  ;;  %v4734_v33 = vor.u32 %v6753_v27, %v4733_v26  ;;  %1526 = vmatpush.bf16.msra.mxu3 %v5006_v25 }
  0x20   :  { %v4989_v31 = vld [vmem:[#allocation2 + $0x3a0] sm:$0xf]  ;;  %v6817_v32 = vld [vmem:[#allocation2 + $0x3ac] sm:$0xf0]  ;;  %v4862_v34 = vor.u32 %v6785_v30, %v4861_v28  ;;  %1488 = vmatpush.bf16.msra.mxu0 %v4606_v29 }
  0x21   :  { %v4589_v35 = vld [vmem:[#allocation2 + $0x80] sm:$0xf]  ;;  %v6717_v36 = vld [vmem:[#allocation2 + $0x8c] sm:$0xf0]  ;;  %v4990_v38 = vor.u32 %v6817_v32, %v4989_v31  ;;  %1501 = vmatpush.bf16.msra.mxu1 %v4734_v33 }
  0x22   :  { %v4717_v37 = vld [vmem:[#allocation2 + $0x180] sm:$0xf]  ;;  %v6749_v39 = vld [vmem:[#allocation2 + $0x18c] sm:$0xf0]  ;;  %v4590_v44 = vor.u32 %v6717_v36, %v4589_v35  ;;  %1514 = vmatpush.bf16.msra.mxu2 %v4862_v34 }
  0x23   :  { %v4845_v40 = vld [vmem:[#allocation2 + $0x280] sm:$0xf]  ;;  %v6781_v41 = vld [vmem:[#allocation2 + $0x28c] sm:$0xf0]  ;;  %v4718_v45 = vor.u32 %v6749_v39, %v4717_v37  ;;  %1527 = vmatpush.bf16.msra.mxu3 %v4990_v38  ;;  %v6727_v37 = vld [vmem:[#allocation2 + $0xe4] sm:$0xf] }
  0x24   :  { %v4973_v42 = vld [vmem:[#allocation2 + $0x380] sm:$0xf]  ;;  %v6813_v43 = vld [vmem:[#allocation2 + $0x38c] sm:$0xf0]  ;;  %v4846_v46 = vor.u32 %v6781_v41, %v4845_v40  ;;  %1489 = vmatpush.bf16.msra.mxu0 %v4590_v44  ;;  %v4639_v38 = vld [vmem:[#allocation2 + $0xf0] sm:$0xf0] }
  0x25   :  { %v4573_v47 = vld [vmem:[#allocation2 + $0x60] sm:$0xf]  ;;  %v6713_v48 = vld [vmem:[#allocation2 + $0x6c] sm:$0xf0]  ;;  %v4974_v50 = vor.u32 %v6813_v43, %v4973_v42  ;;  %1502 = vmatpush.bf16.msra.mxu1 %v4718_v45 }
  0x26   :  { %v4701_v49 = vld [vmem:[#allocation2 + $0x160] sm:$0xf]  ;;  %v6745_v51 = vld [vmem:[#allocation2 + $0x16c] sm:$0xf0]  ;;  %v4574_v56 = vor.u32 %v6713_v48, %v4573_v47  ;;  %1515 = vmatpush.bf16.msra.mxu2 %v4846_v46  ;;  %v4642_v46 = vor.u32 %v6727_v37, %v4639_v38 }
  0x27   :  { %v4829_v52 = vld [vmem:[#allocation2 + $0x260] sm:$0xf]  ;;  %v6777_v53 = vld [vmem:[#allocation2 + $0x26c] sm:$0xf0]  ;;  %v4702_v57 = vor.u32 %v6745_v51, %v4701_v49  ;;  %1528 = vmatpush.bf16.msra.mxu3 %v4974_v50  ;;  %v6723_v50 = vld [vmem:[#allocation2 + $0xc4] sm:$0xf] }
  0x28   :  { %v4957_v54 = vld [vmem:[#allocation2 + $0x360] sm:$0xf]  ;;  %v6809_v55 = vld [vmem:[#allocation2 + $0x36c] sm:$0xf0]  ;;  %v4830_v58 = vor.u32 %v6777_v53, %v4829_v52  ;;  %1490 = vmatpush.bf16.msra.mxu0 %v4574_v56  ;;  %v4623_v51 = vld [vmem:[#allocation2 + $0xd0] sm:$0xf0] }
  0x29   :  { %v4557_v59 = vld [vmem:[#allocation2 + $0x40] sm:$0xf]  ;;  %v6709_v60 = vld [vmem:[#allocation2 + $0x4c] sm:$0xf0]  ;;  %v4958_v62 = vor.u32 %v6809_v55, %v4957_v54  ;;  %1503 = vmatpush.bf16.msra.mxu1 %v4702_v57 }
  0x2a   :  { %v4685_v61 = vld [vmem:[#allocation2 + $0x140] sm:$0xf]  ;;  %v6741_v63 = vld [vmem:[#allocation2 + $0x14c] sm:$0xf0]  ;;  %v4558_v4 = vor.u32 %v6709_v60, %v4557_v59  ;;  %1516 = vmatpush.bf16.msra.mxu2 %v4830_v58  ;;  %v4626_v59 = vor.u32 %v6723_v50, %v4623_v51 }
  0x2b   :  { %v4813_v0 = vld [vmem:[#allocation2 + $0x240] sm:$0xf]  ;;  %v6773_v1 = vld [vmem:[#allocation2 + $0x24c] sm:$0xf0]  ;;  %v4686_v5 = vor.u32 %v6741_v63, %v4685_v61  ;;  %1529 = vmatpush.bf16.msra.mxu3 %v4958_v62  ;;  %v6719_v62 = vld [vmem:[#allocation2 + $0xa4] sm:$0xf] }
  0x2c   :  { %v4941_v2 = vld [vmem:[#allocation2 + $0x340] sm:$0xf]  ;;  %v6805_v3 = vld [vmem:[#allocation2 + $0x34c] sm:$0xf0]  ;;  %v4814_v6 = vor.u32 %v6773_v1, %v4813_v0  ;;  %1491 = vmatpush.bf16.msra.mxu0 %v4558_v4  ;;  %v4607_v63 = vld [vmem:[#allocation2 + $0xb0] sm:$0xf0] }
  0x2d   :  { %v4541_v7 = vld [vmem:[#allocation2 + $0x20] sm:$0xf]  ;;  %v6705_v8 = vld [vmem:[#allocation2 + $0x2c] sm:$0xf0]  ;;  %v4942_v10 = vor.u32 %v6805_v3, %v4941_v2  ;;  %1504 = vmatpush.bf16.msra.mxu1 %v4686_v5  ;;  %v104_v2 = vld [vmem:[%s7719_s0 + $0x8] sm:$0xff] }
  0x2e   :  { %v4669_v9 = vld [vmem:[#allocation2 + $0x120] sm:$0xf]  ;;  %v6737_v11 = vld [vmem:[#allocation2 + $0x12c] sm:$0xf0]  ;;  %v4542_v16 = vor.u32 %v6705_v8, %v4541_v7  ;;  %1517 = vmatpush.bf16.msra.mxu2 %v4814_v6  ;;  %v347_v8 = vunpack.c.l.b16 %v104_v2 }
  0x2f   :  { %v4797_v12 = vld [vmem:[#allocation2 + $0x220] sm:$0xf]  ;;  %v6769_v13 = vld [vmem:[#allocation2 + $0x22c] sm:$0xf0]  ;;  %v4670_v19 = vor.u32 %v6737_v11, %v4669_v9  ;;  %1530 = vmatpush.bf16.msra.mxu3 %v4942_v10  ;;  %v348_v10 = vunpack.c.h.b16 %v104_v2  ;;  %v4610_v11 = vor.u32 %v6719_v62, %v4607_v63 }
  0x30   :  { %v4925_v14 = vld [vmem:[#allocation2 + $0x320] sm:$0xf]  ;;  %v6801_v15 = vld [vmem:[#allocation2 + $0x32c] sm:$0xf0]  ;;  %v4798_v20 = vor.u32 %v6769_v13, %v4797_v12  ;;  %1492 = vmatpush.bf16.msra.mxu0 %v4542_v16  ;;  %v6715_v16 = vld [vmem:[#allocation2 + $0x84] sm:$0xf] }
  0x31   :  { %v4525_v17 = vld [vmem:[#allocation2] sm:$0xf]  ;;  %v6701_v18 = vld [vmem:[#allocation2 + $0xc] sm:$0xf0]  ;;  %v4926_v24 = vor.u32 %v6801_v15, %v4925_v14  ;;  %1505 = vmatpush.bf16.msra.mxu1 %v4670_v19 }
  0x32   :  { %v4653_v21 = vld [vmem:[#allocation2 + $0x100] sm:$0xf]  ;;  %v6733_v22 = vld [vmem:[#allocation2 + $0x10c] sm:$0xf0]  ;;  %v4526_v31 = vor.u32 %v6701_v18, %v4525_v17  ;;  %1518 = vmatpush.bf16.msra.mxu2 %v4798_v20  ;;  %v4591_v17 = vld [vmem:[#allocation2 + $0x90] sm:$0xf0]  ;;  %v7510_v18 = vpack.c.b16 %v347_v8, %v347_v8  ;;  %v7514_v20 = vpack.c.b16 %v348_v10, %v348_v10 }
  0x33   :  { %v4781_v23 = vld [vmem:[#allocation2 + $0x200] sm:$0xf]  ;;  %v6765_v25 = vld [vmem:[#allocation2 + $0x20c] sm:$0xf0]  ;;  %v4654_v35 = vor.u32 %v6733_v22, %v4653_v21  ;;  %1531 = vmatpush.bf16.msra.mxu3 %v4926_v24  ;;  %v6759_v8 = vld [vmem:[#allocation2 + $0x1e4] sm:$0xf] }
  0x34   :  { %v4909_v26 = vld [vmem:[#allocation2 + $0x300] sm:$0xf]  ;;  %v6797_v27 = vld [vmem:[#allocation2 + $0x30c] sm:$0xf0]  ;;  %v4782_v36 = vor.u32 %v6765_v25, %v4781_v23  ;;  %1493 = vmatpush.bf16.msra.mxu0 %v4526_v31  ;;  %v6791_v10 = vld [vmem:[#allocation2 + $0x2e4] sm:$0xf] }
  0x35   :  { %v5149_v28 = vld [vmem:[#allocation2 + $0x4e0] sm:$0xf]  ;;  %v6857_v29 = vld [vmem:[#allocation2 + $0x4ec] sm:$0xf0]  ;;  %v4910_v39 = vor.u32 %v6797_v27, %v4909_v26  ;;  %1506 = vmatpush.bf16.msra.mxu1 %v4654_v35 }
  0x36   :  { %v5277_v30 = vld [vmem:[#allocation2 + $0x5e0] sm:$0xf]  ;;  %v6889_v32 = vld [vmem:[#allocation2 + $0x5ec] sm:$0xf0]  ;;  %v5150_v40 = vor.u32 %v6857_v29, %v5149_v28  ;;  %1519 = vmatpush.bf16.msra.mxu2 %v4782_v36  ;;  %v4594_v28 = vor.u32 %v6715_v16, %v4591_v17 }
  0x37   :  { %v5405_v33 = vld [vmem:[#allocation2 + $0x6e0] sm:$0xf]  ;;  %v6921_v34 = vld [vmem:[#allocation2 + $0x6ec] sm:$0xf0]  ;;  %v5278_v41 = vor.u32 %v6889_v32, %v5277_v30  ;;  %1532 = vmatpush.bf16.msra.mxu3 %v4910_v39  ;;  %v6711_v32 = vld [vmem:[#allocation2 + $0x64] sm:$0xf] }
  0x38   :  { %v5406_v42 = vor.u32 %v6921_v34, %v5405_v33  ;;  %v5133_v43 = vld [vmem:[#allocation2 + $0x4c0] sm:$0xf]  ;;  %v6853_v44 = vld [vmem:[#allocation2 + $0x4cc] sm:$0xf0]  ;;  %1538 = vmatpush.bf16.msrb.mxu0 %v5150_v40  ;;  %v4575_v33 = vld [vmem:[#allocation2 + $0x70] sm:$0xf0] }
  0x39   :  { %v5261_v45 = vld [vmem:[#allocation2 + $0x5c0] sm:$0xf]  ;;  %v6885_v47 = vld [vmem:[#allocation2 + $0x5cc] sm:$0xf0]  ;;  %v5134_v52 = vor.u32 %v6853_v44, %v5133_v43  ;;  %1551 = vmatpush.bf16.msrb.mxu1 %v5278_v41  ;;  %1520 = vmatmul.bf16.vlgmr.msra.gmra.mxu2 %v7510_v18  ;;  %v4578_v40 = vor.u32 %v6711_v32, %v4575_v33  ;;  %v6707_v44 = vld [vmem:[#allocation2 + $0x44] sm:$0xf] }
  0x3a   :  { %v5389_v48 = vld [vmem:[#allocation2 + $0x6c0] sm:$0xf]  ;;  %v6917_v49 = vld [vmem:[#allocation2 + $0x6cc] sm:$0xf0]  ;;  %1564 = vmatpush.bf16.msrb.mxu2 %v5406_v42  ;;  %v5262_v54 = vor.u32 %v6885_v47, %v5261_v45  ;;  %1533 = vmatmul.bf16.vlgmr.msra.gmra.mxu3 %v7514_v20  ;;  %v4559_v45 = vld [vmem:[#allocation2 + $0x50] sm:$0xf0] }
  0x3b   :  { %v5117_v53 = vld [vmem:[#allocation2 + $0x4a0] sm:$0xf]  ;;  %v5390_v55 = vor.u32 %v6917_v49, %v5389_v48  ;;  %v6849_v56 = vld [vmem:[#allocation2 + $0x4ac] sm:$0xf0]  ;;  %1577 = vmatpush.bf16.msrb.mxu3 %v4642_v46  ;;  %v6787_v32 = vld [vmem:[#allocation2 + $0x2c4] sm:$0xf] }
  0x3c   :  { %v5245_v57 = vld [vmem:[#allocation2 + $0x5a0] sm:$0xf]  ;;  %v6881_v58 = vld [vmem:[#allocation2 + $0x5ac] sm:$0xf0]  ;;  %1539 = vmatpush.bf16.msrb.mxu0 %v5134_v52  ;;  %v5118_v0 = vor.u32 %v6849_v56, %v5117_v53  ;;  %v4562_v52 = vor.u32 %v6707_v44, %v4559_v45  ;;  %v6703_v56 = vld [vmem:[#allocation2 + $0x24] sm:$0xf] }
  0x3d   :  { %v5373_v60 = vld [vmem:[#allocation2 + $0x6a0] sm:$0xf]  ;;  %v6913_v61 = vld [vmem:[#allocation2 + $0x6ac] sm:$0xf0]  ;;  %v5246_v1 = vor.u32 %v6881_v58, %v5245_v57  ;;  %1552 = vmatpush.bf16.msrb.mxu1 %v5262_v54  ;;  %v4543_v57 = vld [vmem:[#allocation2 + $0x30] sm:$0xf0] }
  0x3e   :  { %v103_v3 = vld [vmem:[%s7719_s0] sm:$0xff]  ;;  %1565 = vmatpush.bf16.msrb.mxu2 %v5390_v55  ;;  %v5374_v4 = vor.u32 %v6913_v61, %v5373_v60  ;;  %v6845_v6 = vld [vmem:[#allocation2 + $0x48c] sm:$0xf0] }
  0x3f   :  { %v5101_v5 = vld [vmem:[#allocation2 + $0x480] sm:$0xf]  ;;  %v345_v9 = vunpack.c.l.b16 %v103_v3  ;;  %1578 = vmatpush.bf16.msrb.mxu3 %v4626_v59  ;;  %v6877_v12 = vld [vmem:[#allocation2 + $0x58c] sm:$0xf0]  ;;  %v346_v15 = vunpack.c.h.b16 %v103_v3  ;;  %v106_v3 = vld [vmem:[%s7719_s0 + $0x18] sm:$0xf] }
  0x40   :  { %v5229_v7 = vld [vmem:[#allocation2 + $0x580] sm:$0xf]  ;;  %v6909_v14 = vld [vmem:[#allocation2 + $0x68c] sm:$0xf0]  ;;  %1540 = vmatpush.bf16.msrb.mxu0 %v5118_v0  ;;  %v5102_v21 = vor.u32 %v6845_v6, %v5101_v5  ;;  %v6699_v5 = vld [vmem:[#allocation2 + $0x4] sm:$0xf] }
  0x41   :  { %v5357_v13 = vld [vmem:[#allocation2 + $0x680] sm:$0xf]  ;;  %v7512_v19 = vpack.c.b16 %v345_v9, %v345_v9  ;;  %v7516_v22 = vpack.c.b16 %v346_v15, %v346_v15  ;;  %1553 = vmatpush.bf16.msrb.mxu1 %v5246_v1  ;;  %v5230_v23 = vor.u32 %v6877_v12, %v5229_v7  ;;  %v6841_v26 = vld [vmem:[#allocation2 + $0x46c] sm:$0xf0]  ;;  %v4527_v6 = vld [vmem:[#allocation2 + $0x10] sm:$0xf0]  ;;  %v351_v15 = vunpack.c.l.b16 %v106_v3 }
  0x42   :  { %1566 = vmatpush.bf16.msrb.mxu2 %v5374_v4  ;;  %v5358_v24 = vor.u32 %v6909_v14, %v5357_v13  ;;  %v5085_v25 = vld [vmem:[#allocation2 + $0x460] sm:$0xf]  ;;  %v6873_v29 = vld [vmem:[#allocation2 + $0x56c] sm:$0xf0]  ;;  %v4546_v4 = vor.u32 %v6703_v56, %v4543_v57  ;;  %v4767_v9 = vld [vmem:[#allocation2 + $0x1f0] sm:$0xf0] }
  0x43   :  { %v5213_v27 = vld [vmem:[#allocation2 + $0x560] sm:$0xf]  ;;  %1579 = vmatpush.bf16.msrb.mxu3 %v4610_v11  ;;  %v6905_v31 = vld [vmem:[#allocation2 + $0x66c] sm:$0xf0]  ;;  %1494 = vmatmul.bf16.vlgmr.msra.gmra.mxu0 %v7512_v19  ;;  %v5086_v34 = vor.u32 %v6841_v26, %v5085_v25  ;;  %v4895_v12 = vld [vmem:[#allocation2 + $0x2f0] sm:$0xf0]  ;;  %v4530_v26 = vor.u32 %v6699_v5, %v4527_v6 }
  0x44   :  { %v5341_v30 = vld [vmem:[#allocation2 + $0x660] sm:$0xf]  ;;  %1541 = vmatpush.bf16.msrb.mxu0 %v5102_v21  ;;  %1507 = vmatmul.bf16.vlgmr.msra.gmra.mxu1 %v7516_v22  ;;  %v5214_v35 = vor.u32 %v6873_v29, %v5213_v27  ;;  %v6837_v38 = vld [vmem:[#allocation2 + $0x44c] sm:$0xf0]  ;;  %v6823_v13 = vld [vmem:[#allocation2 + $0x3e4] sm:$0xf]  ;;  %v4770_v27 = vor.u32 %v6759_v8, %v4767_v9 }
  0x45   :  { %1554 = vmatpush.bf16.msrb.mxu1 %v5230_v23  ;;  %v5342_v36 = vor.u32 %v6905_v31, %v5341_v30  ;;  %v5069_v37 = vld [vmem:[#allocation2 + $0x440] sm:$0xf]  ;;  %v6869_v41 = vld [vmem:[#allocation2 + $0x54c] sm:$0xf0]  ;;  %v5023_v14 = vld [vmem:[#allocation2 + $0x3f0] sm:$0xf0] }
  0x46   :  { %1567 = vmatpush.bf16.msrb.mxu2 %v5358_v24  ;;  %v5197_v39 = vld [vmem:[#allocation2 + $0x540] sm:$0xf]  ;;  %v6901_v43 = vld [vmem:[#allocation2 + $0x64c] sm:$0xf0]  ;;  %v5070_v46 = vor.u32 %v6837_v38, %v5069_v37  ;;  %v6855_v21 = vld [vmem:[#allocation2 + $0x4e4] sm:$0xf]  ;;  %v5026_v29 = vor.u32 %v6823_v13, %v5023_v14  ;;  %v7528_v37 = vpack.c.b16 %v351_v15, %v351_v15 }
  0x47   :  { %1580 = vmatpush.bf16.msrb.mxu3 %v4594_v28  ;;  %v5325_v42 = vld [vmem:[#allocation2 + $0x640] sm:$0xf]  ;;  %v5198_v47 = vor.u32 %v6869_v41, %v5197_v39  ;;  %v6833_v50 = vld [vmem:[#allocation2 + $0x42c] sm:$0xf0]  ;;  %v5151_v23 = vld [vmem:[#allocation2 + $0x4f0] sm:$0xf0]  ;;  %v4898_v28 = vor.u32 %v6791_v10, %v4895_v12 }
  0x48   :  { %1542 = vmatpush.bf16.msrb.mxu0 %v5086_v34  ;;  %v5326_v48 = vor.u32 %v6901_v43, %v5325_v42  ;;  %v5053_v49 = vld [vmem:[#allocation2 + $0x420] sm:$0xf]  ;;  %v6865_v53 = vld [vmem:[#allocation2 + $0x52c] sm:$0xf0]  ;;  %v6755_v30 = vld [vmem:[#allocation2 + $0x1c4] sm:$0xf]  ;;  %v5154_v33 = vor.u32 %v6855_v21, %v5151_v23 }
  0x49   :  { %1555 = vmatpush.bf16.msrb.mxu1 %v5214_v35  ;;  %v5181_v51 = vld [vmem:[#allocation2 + $0x520] sm:$0xf]  ;;  %v6897_v55 = vld [vmem:[#allocation2 + $0x62c] sm:$0xf0]  ;;  %v5054_v59 = vor.u32 %v6833_v50, %v5053_v49  ;;  %v4751_v31 = vld [vmem:[#allocation2 + $0x1d0] sm:$0xf0] }
  0x4a   :  { %1568 = vmatpush.bf16.msrb.mxu2 %v5342_v36  ;;  %v5309_v54 = vld [vmem:[#allocation2 + $0x620] sm:$0xf]  ;;  %v6829_v60 = vld [vmem:[#allocation2 + $0x40c] sm:$0xf0]  ;;  %v5182_v63 = vor.u32 %v6865_v53, %v5181_v51  ;;  %v4879_v34 = vld [vmem:[#allocation2 + $0x2d0] sm:$0xf0]  ;;  %v4754_v42 = vor.u32 %v6755_v30, %v4751_v31 }
  0x4b   :  { %1581 = vmatpush.bf16.msrb.mxu3 %v4578_v40  ;;  %v5037_v58 = vld [vmem:[#allocation2 + $0x400] sm:$0xf]  ;;  %v6861_v62 = vld [vmem:[#allocation2 + $0x50c] sm:$0xf0]  ;;  %v5310_v0 = vor.u32 %v6897_v55, %v5309_v54  ;;  %v6819_v35 = vld [vmem:[#allocation2 + $0x3c4] sm:$0xf]  ;;  %v4882_v43 = vor.u32 %v6787_v32, %v4879_v34 }
  0x4c   :  { %1543 = vmatpush.bf16.msrb.mxu0 %v5070_v46  ;;  %v5165_v61 = vld [vmem:[#allocation2 + $0x500] sm:$0xf]  ;;  %v6893_v2 = vld [vmem:[#allocation2 + $0x60c] sm:$0xf0]  ;;  %v5038_v11 = vor.u32 %v6829_v60, %v5037_v58  ;;  %v5007_v36 = vld [vmem:[#allocation2 + $0x3d0] sm:$0xf0] }
  0x4d   :  { %1556 = vmatpush.bf16.msrb.mxu1 %v5198_v47  ;;  %v5293_v1 = vld [vmem:[#allocation2 + $0x600] sm:$0xf]  ;;  %v105_v7 = vld [vmem:[%s7719_s0 + $0x10] sm:$0xff]  ;;  %v5166_v16 = vor.u32 %v6861_v62, %v5165_v61  ;;  %v6851_v38 = vld [vmem:[#allocation2 + $0x4c4] sm:$0xf]  ;;  %v5010_v44 = vor.u32 %v6819_v35, %v5007_v36 }
  0x4e   :  { %1569 = vmatpush.bf16.msrb.mxu2 %v5326_v48  ;;  %v5294_v17 = vor.u32 %v6893_v2, %v5293_v1  ;;  %v349_v24 = vunpack.c.l.b16 %v105_v7  ;;  %v350_v25 = vunpack.c.h.b16 %v105_v7  ;;  %v5135_v39 = vld [vmem:[#allocation2 + $0x4d0] sm:$0xf0]  ;;  %v6751_v45 = vld [vmem:[#allocation2 + $0x1a4] sm:$0xf] }
  0x4f   :  { %1582 = vmatpush.bf16.msrb.mxu3 %v4562_v52  ;;  %v4735_v46 = vld [vmem:[#allocation2 + $0x1b0] sm:$0xf0]  ;;  %v6783_v47 = vld [vmem:[#allocation2 + $0x2a4] sm:$0xf]  ;;  %v5138_v48 = vor.u32 %v6851_v38, %v5135_v39 }
  0x50   :  { %1544 = vmatpush.bf16.msrb.mxu0 %v5054_v59  ;;  %v7530_v40 = vpack.c.b16 %v349_v24, %v349_v24  ;;  %v7532_v41 = vpack.c.b16 %v350_v25, %v350_v25  ;;  %v4863_v49 = vld [vmem:[#allocation2 + $0x2b0] sm:$0xf0]  ;;  %v6815_v50 = vld [vmem:[#allocation2 + $0x3a4] sm:$0xf]  ;;  %v4738_v54 = vor.u32 %v6751_v45, %v4735_v46 }
  0x51   :  { %1557 = vmatpush.bf16.msrb.mxu1 %v5182_v63  ;;  %v4991_v51 = vld [vmem:[#allocation2 + $0x3b0] sm:$0xf0]  ;;  %v6847_v52 = vld [vmem:[#allocation2 + $0x4a4] sm:$0xf]  ;;  %v4866_v55 = vor.u32 %v6783_v47, %v4863_v49 }
  0x52   :  { %1570 = vmatpush.bf16.msrb.mxu2 %v5310_v0  ;;  %v5119_v53 = vld [vmem:[#allocation2 + $0x4b0] sm:$0xf0]  ;;  %v4994_v56 = vor.u32 %v6815_v50, %v4991_v51  ;;  %v6747_v57 = vld [vmem:[#allocation2 + $0x184] sm:$0xf] }
  0x53   :  { %1583 = vmatpush.bf16.msrb.mxu3 %v4546_v4  ;;  %v4719_v58 = vld [vmem:[#allocation2 + $0x190] sm:$0xf0]  ;;  %v6779_v59 = vld [vmem:[#allocation2 + $0x284] sm:$0xf]  ;;  %v5122_v60 = vor.u32 %v6847_v52, %v5119_v53 }
  0x54   :  { %1545 = vmatpush.bf16.msrb.mxu0 %v5038_v11  ;;  %v4847_v61 = vld [vmem:[#allocation2 + $0x290] sm:$0xf0]  ;;  %v6811_v62 = vld [vmem:[#allocation2 + $0x384] sm:$0xf]  ;;  %v4722_v2 = vor.u32 %v6747_v57, %v4719_v58 }
  0x55   :  { %1558 = vmatpush.bf16.msrb.mxu1 %v5166_v16  ;;  %v4975_v63 = vld [vmem:[#allocation2 + $0x390] sm:$0xf0]  ;;  %v6843_v0 = vld [vmem:[#allocation2 + $0x484] sm:$0xf]  ;;  %v4850_v3 = vor.u32 %v6779_v59, %v4847_v61 }
  0x56   :  { %1571 = vmatpush.bf16.msrb.mxu2 %v5294_v17  ;;  %v5103_v1 = vld [vmem:[#allocation2 + $0x490] sm:$0xf0]  ;;  %v4978_v4 = vor.u32 %v6811_v62, %v4975_v63  ;;  %v6743_v5 = vld [vmem:[#allocation2 + $0x164] sm:$0xf]  ;;  %v4645_v62 = vld [vmem:[#allocation2 + $0xe8] sm:$0xf] }
  0x57   :  { %1584 = vmatpush.bf16.msrb.mxu3 %v4530_v26  ;;  %1546 = vmatmul.bf16.vlgmr.msrb.gmra.mxu0 %v7530_v40  ;;  %v4703_v6 = vld [vmem:[#allocation2 + $0x170] sm:$0xf0]  ;;  %v6775_v7 = vld [vmem:[#allocation2 + $0x264] sm:$0xf]  ;;  %v5106_v8 = vor.u32 %v6843_v0, %v5103_v1  ;;  %v6730_v63 = vld [vmem:[#allocation2 + $0xf4] sm:$0xf0] }
  0x58   :  { %1590 = vmatpush.bf16.msra.mxu0 %v4770_v27  ;;  %1559 = vmatmul.bf16.vlgmr.msrb.gmra.mxu1 %v7532_v41  ;;  %v4831_v9 = vld [vmem:[#allocation2 + $0x270] sm:$0xf0]  ;;  %v6807_v10 = vld [vmem:[#allocation2 + $0x364] sm:$0xf]  ;;  %v4706_v14 = vor.u32 %v6743_v5, %v4703_v6 }
  0x59   :  { %1603 = vmatpush.bf16.msra.mxu1 %v4898_v28  ;;  %1572 = vmatmul.bf16.vlgmr.msrb.gmra.mxu2 %v7528_v37  ;;  %v4959_v11 = vld [vmem:[#allocation2 + $0x370] sm:$0xf0]  ;;  %v6839_v12 = vld [vmem:[#allocation2 + $0x464] sm:$0xf]  ;;  %v4834_v15 = vor.u32 %v6775_v7, %v4831_v9  ;;  %v4646_v7 = vor.u32 %v6730_v63, %v4645_v62 }
  0x5a   :  { %1616 = vmatpush.bf16.msra.mxu2 %v5026_v29  ;;  %1585 = vmatmul.bf16.vlgmr.msrb.gmra.mxu3 %v7512_v19  ;;  %v5087_v13 = vld [vmem:[#allocation2 + $0x470] sm:$0xf0]  ;;  %v4962_v16 = vor.u32 %v6807_v10, %v4959_v11  ;;  %v6739_v17 = vld [vmem:[#allocation2 + $0x144] sm:$0xf] }
  0x5b   :  { %1629 = vmatpush.bf16.msra.mxu3 %v5154_v33  ;;  %v4687_v21 = vld [vmem:[#allocation2 + $0x150] sm:$0xf0]  ;;  %v6771_v23 = vld [vmem:[#allocation2 + $0x244] sm:$0xf]  ;;  %v5090_v24 = vor.u32 %v6839_v12, %v5087_v13  ;;  %v4629_v13 = vld [vmem:[#allocation2 + $0xc8] sm:$0xf] }
  0x5c   :  { %1591 = vmatpush.bf16.msra.mxu0 %v4754_v42  ;;  %v4815_v25 = vld [vmem:[#allocation2 + $0x250] sm:$0xf0]  ;;  %v6803_v26 = vld [vmem:[#allocation2 + $0x344] sm:$0xf]  ;;  %v4690_v30 = vor.u32 %v6739_v17, %v4687_v21 }
  0x5d   :  { %1604 = vmatpush.bf16.msra.mxu1 %v4882_v43  ;;  %v4943_v27 = vld [vmem:[#allocation2 + $0x350] sm:$0xf0]  ;;  %v6835_v28 = vld [vmem:[#allocation2 + $0x444] sm:$0xf]  ;;  %v4818_v31 = vor.u32 %v6771_v23, %v4815_v25 }
  0x5e   :  { %1617 = vmatpush.bf16.msra.mxu2 %v5010_v44  ;;  %v5071_v29 = vld [vmem:[#allocation2 + $0x450] sm:$0xf0]  ;;  %v4946_v32 = vor.u32 %v6803_v26, %v4943_v27  ;;  %v6735_v33 = vld [vmem:[#allocation2 + $0x124] sm:$0xf] }
  0x5f   :  { %1630 = vmatpush.bf16.msra.mxu3 %v5138_v48  ;;  %v4671_v34 = vld [vmem:[#allocation2 + $0x130] sm:$0xf0]  ;;  %v6767_v35 = vld [vmem:[#allocation2 + $0x224] sm:$0xf]  ;;  %v5074_v36 = vor.u32 %v6835_v28, %v5071_v29  ;;  %v4613_v29 = vld [vmem:[#allocation2 + $0xa8] sm:$0xf] }
  0x60   :  { %1592 = vmatpush.bf16.msra.mxu0 %v4738_v54  ;;  %v4799_v38 = vld [vmem:[#allocation2 + $0x230] sm:$0xf0]  ;;  %v6799_v39 = vld [vmem:[#allocation2 + $0x324] sm:$0xf]  ;;  %v4674_v45 = vor.u32 %v6735_v33, %v4671_v34 }
  0x61   :  { %1605 = vmatpush.bf16.msra.mxu1 %v4866_v55  ;;  %v4927_v42 = vld [vmem:[#allocation2 + $0x330] sm:$0xf0]  ;;  %v6831_v43 = vld [vmem:[#allocation2 + $0x424] sm:$0xf]  ;;  %v4802_v48 = vor.u32 %v6767_v35, %v4799_v38 }
  0x62   :  { %1618 = vmatpush.bf16.msra.mxu2 %v4994_v56  ;;  %v5055_v44 = vld [vmem:[#allocation2 + $0x430] sm:$0xf0]  ;;  %v6731_v46 = vld [vmem:[#allocation2 + $0x104] sm:$0xf]  ;;  %v4930_v49 = vor.u32 %v6799_v39, %v4927_v42 }
  0x63   :  { %1631 = vmatpush.bf16.msra.mxu3 %v5122_v60  ;;  %v4655_v47 = vld [vmem:[#allocation2 + $0x110] sm:$0xf0]  ;;  %v6763_v50 = vld [vmem:[#allocation2 + $0x204] sm:$0xf]  ;;  %v5058_v53 = vor.u32 %v6831_v43, %v5055_v44  ;;  %v4597_v44 = vld [vmem:[#allocation2 + $0x88] sm:$0xf] }
  0x64   :  { %1593 = vmatpush.bf16.msra.mxu0 %v4722_v2  ;;  %v4783_v51 = vld [vmem:[#allocation2 + $0x210] sm:$0xf0]  ;;  %v6795_v52 = vld [vmem:[#allocation2 + $0x304] sm:$0xf]  ;;  %v4658_v60 = vor.u32 %v6731_v46, %v4655_v47  ;;  %v4773_v2 = vld [vmem:[#allocation2 + $0x1e8] sm:$0xf] }
  0x65   :  { %1606 = vmatpush.bf16.msra.mxu1 %v4850_v3  ;;  %v4911_v54 = vld [vmem:[#allocation2 + $0x310] sm:$0xf0]  ;;  %v6827_v55 = vld [vmem:[#allocation2 + $0x404] sm:$0xf]  ;;  %v4786_v0 = vor.u32 %v6763_v50, %v4783_v51  ;;  %v6762_v3 = vld [vmem:[#allocation2 + $0x1f4] sm:$0xf0] }
  0x66   :  { %1619 = vmatpush.bf16.msra.mxu2 %v4978_v4  ;;  %v5039_v56 = vld [vmem:[#allocation2 + $0x410] sm:$0xf0]  ;;  %v6887_v57 = vld [vmem:[#allocation2 + $0x5e4] sm:$0xf]  ;;  %v4914_v1 = vor.u32 %v6795_v52, %v4911_v54  ;;  %v4774_v11 = vor.u32 %v6762_v3, %v4773_v2  ;;  %v4725_v46 = vld [vmem:[#allocation2 + $0x188] sm:$0xf] }
  0x67   :  { %1632 = vmatpush.bf16.msra.mxu3 %v5106_v8  ;;  %v5279_v58 = vld [vmem:[#allocation2 + $0x5f0] sm:$0xf0]  ;;  %v6919_v59 = vld [vmem:[#allocation2 + $0x6e4] sm:$0xf]  ;;  %v5042_v4 = vor.u32 %v6827_v55, %v5039_v56  ;;  %v6750_v47 = vld [vmem:[#allocation2 + $0x194] sm:$0xf0] }
  0x68   :  { %1594 = vmatpush.bf16.msra.mxu0 %v4706_v14  ;;  %v5407_v61 = vld [vmem:[#allocation2 + $0x6f0] sm:$0xf0]  ;;  %v5282_v5 = vor.u32 %v6887_v57, %v5279_v58  ;;  %v6883_v8 = vld [vmem:[#allocation2 + $0x5c4] sm:$0xf]  ;;  %v6726_v14 = vld [vmem:[#allocation2 + $0xd4] sm:$0xf0]  ;;  %v4726_v54 = vor.u32 %v6750_v47, %v4725_v46 }
  0x69   :  { %1607 = vmatpush.bf16.msra.mxu1 %v4834_v15  ;;  %v5410_v6 = vor.u32 %v6919_v59, %v5407_v61  ;;  %v5263_v9 = vld [vmem:[#allocation2 + $0x5d0] sm:$0xf0]  ;;  %v6915_v10 = vld [vmem:[#allocation2 + $0x6c4] sm:$0xf]  ;;  %v4757_v15 = vld [vmem:[#allocation2 + $0x1c8] sm:$0xf]  ;;  %v4630_v23 = vor.u32 %v6726_v14, %v4629_v13 }
  0x6a   :  { %1620 = vmatpush.bf16.msra.mxu2 %v4962_v16  ;;  %v5391_v12 = vld [vmem:[#allocation2 + $0x6d0] sm:$0xf0]  ;;  %v6758_v16 = vld [vmem:[#allocation2 + $0x1d4] sm:$0xf0]  ;;  %v5266_v17 = vor.u32 %v6883_v8, %v5263_v9  ;;  %v6911_v26 = vld [vmem:[#allocation2 + $0x6a4] sm:$0xf] }
  0x6b   :  { %1633 = vmatpush.bf16.msra.mxu3 %v5090_v24  ;;  %v5394_v21 = vor.u32 %v6915_v10, %v5391_v12  ;;  %v6879_v24 = vld [vmem:[#allocation2 + $0x5a4] sm:$0xf]  ;;  %v5247_v25 = vld [vmem:[#allocation2 + $0x5b0] sm:$0xf0]  ;;  %v4758_v27 = vor.u32 %v6758_v16, %v4757_v15  ;;  %v4581_v56 = vld [vmem:[#allocation2 + $0x68] sm:$0xf] }
  0x6c   :  { %1595 = vmatpush.bf16.msra.mxu0 %v4690_v30  ;;  %v5375_v28 = vld [vmem:[#allocation2 + $0x6b0] sm:$0xf0]  ;;  %v6722_v30 = vld [vmem:[#allocation2 + $0xb4] sm:$0xf0]  ;;  %v5250_v33 = vor.u32 %v6879_v24, %v5247_v25  ;;  %v6907_v39 = vld [vmem:[#allocation2 + $0x684] sm:$0xf] }
  0x6d   :  { %1608 = vmatpush.bf16.msra.mxu1 %v4818_v31  ;;  %v4741_v31 = vld [vmem:[#allocation2 + $0x1a8] sm:$0xf]  ;;  %v5378_v34 = vor.u32 %v6911_v26, %v5375_v28  ;;  %v4614_v35 = vor.u32 %v6722_v30, %v4613_v29  ;;  %v5231_v38 = vld [vmem:[#allocation2 + $0x590] sm:$0xf0]  ;;  %v6871_v51 = vld [vmem:[#allocation2 + $0x564] sm:$0xf] }
  0x6e   :  { %1621 = vmatpush.bf16.msra.mxu2 %v4946_v32  ;;  %v6754_v32 = vld [vmem:[#allocation2 + $0x1b4] sm:$0xf0]  ;;  %v5359_v43 = vld [vmem:[#allocation2 + $0x690] sm:$0xf0]  ;;  %v4709_v58 = vld [vmem:[#allocation2 + $0x168] sm:$0xf] }
  0x6f   :  { %1634 = vmatpush.bf16.msra.mxu3 %v5074_v36  ;;  %v6875_v36 = vld [vmem:[#allocation2 + $0x584] sm:$0xf]  ;;  %v4742_v42 = vor.u32 %v6754_v32, %v4741_v31  ;;  %v5215_v52 = vld [vmem:[#allocation2 + $0x570] sm:$0xf0]  ;;  %v6714_v57 = vld [vmem:[#allocation2 + $0x74] sm:$0xf0] }
  0x70   :  { %1596 = vmatpush.bf16.msra.mxu0 %v4674_v45  ;;  %v6718_v45 = vld [vmem:[#allocation2 + $0x94] sm:$0xf0]  ;;  %v5343_v55 = vld [vmem:[#allocation2 + $0x670] sm:$0xf0]  ;;  %v4582_v62 = vor.u32 %v6714_v57, %v4581_v56  ;;  %v6867_v63 = vld [vmem:[#allocation2 + $0x544] sm:$0xf] }
  0x71   :  { %1609 = vmatpush.bf16.msra.mxu1 %v4802_v48  ;;  %v5234_v48 = vor.u32 %v6875_v36, %v5231_v38  ;;  %v4598_v50 = vor.u32 %v6718_v45, %v4597_v44  ;;  %v6746_v59 = vld [vmem:[#allocation2 + $0x174] sm:$0xf0]  ;;  %v5327_v3 = vld [vmem:[#allocation2 + $0x650] sm:$0xf0]  ;;  %v6895_v13 = vld [vmem:[#allocation2 + $0x624] sm:$0xf] }
  0x72   :  { %1622 = vmatpush.bf16.msra.mxu2 %v4930_v49  ;;  %v5362_v49 = vor.u32 %v6907_v39, %v5359_v43  ;;  %v4710_v2 = vor.u32 %v6746_v59, %v4709_v58  ;;  %v5183_v12 = vld [vmem:[#allocation2 + $0x530] sm:$0xf0]  ;;  %v4549_v16 = vld [vmem:[#allocation2 + $0x28] sm:$0xf]  ;;  %v6859_v25 = vld [vmem:[#allocation2 + $0x504] sm:$0xf] }
  0x73   :  { %1635 = vmatpush.bf16.msra.mxu3 %v5058_v53  ;;  %v6903_v53 = vld [vmem:[#allocation2 + $0x664] sm:$0xf]  ;;  %v5311_v15 = vld [vmem:[#allocation2 + $0x630] sm:$0xf0]  ;;  %v4533_v31 = vld [vmem:[#allocation2 + $0x8] sm:$0xf] }
  0x74   :  { %1597 = vmatpush.bf16.msra.mxu0 %v4658_v60  ;;  %v5218_v60 = vor.u32 %v6871_v51, %v5215_v52  ;;  %v5346_v61 = vor.u32 %v6903_v53, %v5343_v55  ;;  %v5167_v26 = vld [vmem:[#allocation2 + $0x510] sm:$0xf0]  ;;  %v6891_v29 = vld [vmem:[#allocation2 + $0x604] sm:$0xf]  ;;  %v4901_v36 = vld [vmem:[#allocation2 + $0x2e8] sm:$0xf] }
  0x75   :  { %1610 = vmatpush.bf16.msra.mxu1 %v4786_v0  ;;  %v5199_v0 = vld [vmem:[#allocation2 + $0x550] sm:$0xf0]  ;;  %v6794_v38 = vld [vmem:[#allocation2 + $0x2f4] sm:$0xf0]  ;;  %v5029_v39 = vld [vmem:[#allocation2 + $0x3e8] sm:$0xf] }
  0x76   :  { %1623 = vmatpush.bf16.msra.mxu2 %v4914_v1  ;;  %v6899_v1 = vld [vmem:[#allocation2 + $0x644] sm:$0xf]  ;;  %v5202_v8 = vor.u32 %v6867_v63, %v5199_v0  ;;  %v5295_v30 = vld [vmem:[#allocation2 + $0x610] sm:$0xf0]  ;;  %v6826_v43 = vld [vmem:[#allocation2 + $0x3f4] sm:$0xf0]  ;;  %v4902_v51 = vor.u32 %v6794_v38, %v4901_v36 }
  0x77   :  { %1636 = vmatpush.bf16.msra.mxu3 %v5042_v4  ;;  %1598 = vmatmul.bf16.vlgmr.msra.gmra.mxu0 %v7516_v22  ;;  %v4565_v4 = vld [vmem:[#allocation2 + $0x48] sm:$0xf]  ;;  %v5330_v9 = vor.u32 %v6899_v1, %v5327_v3  ;;  %v6858_v45 = vld [vmem:[#allocation2 + $0x4f4] sm:$0xf0]  ;;  %v5298_v46 = vor.u32 %v6891_v29, %v5295_v30  ;;  %v5030_v52 = vor.u32 %v6826_v43, %v5029_v39 }
  0x78   :  { %1642 = vmatpush.bf16.msrb.mxu0 %v5282_v5  ;;  %1611 = vmatmul.bf16.vlgmr.msra.gmra.mxu1 %v7510_v18  ;;  %v6710_v5 = vld [vmem:[#allocation2 + $0x54] sm:$0xf0]  ;;  %v5157_v44 = vld [vmem:[#allocation2 + $0x4e8] sm:$0xf] }
  0x79   :  { %1655 = vmatpush.bf16.msrb.mxu1 %v5410_v6  ;;  %1624 = vmatmul.bf16.vlgmr.msra.gmra.mxu2 %v7514_v20  ;;  %v4693_v6 = vld [vmem:[#allocation2 + $0x148] sm:$0xf]  ;;  %v4566_v10 = vor.u32 %v6710_v5, %v4565_v4  ;;  %v5158_v53 = vor.u32 %v6858_v45, %v5157_v44  ;;  %v6790_v55 = vld [vmem:[#allocation2 + $0x2d4] sm:$0xf0] }
  0x7a   :  { %1668 = vmatpush.bf16.msrb.mxu2 %v4646_v7  ;;  %1637 = vmatmul.bf16.vlgmr.msra.gmra.mxu3 %v7530_v40  ;;  %v6742_v7 = vld [vmem:[#allocation2 + $0x154] sm:$0xf0]  ;;  %v5013_v56 = vld [vmem:[#allocation2 + $0x3c8] sm:$0xf] }
  0x7b   :  { %1681 = vmatpush.bf16.msrb.mxu3 %v4774_v11  ;;  %v6863_v11 = vld [vmem:[#allocation2 + $0x524] sm:$0xf]  ;;  %v4694_v14 = vor.u32 %v6742_v7, %v4693_v6  ;;  %v6822_v58 = vld [vmem:[#allocation2 + $0x3d4] sm:$0xf0]  ;;  %v5141_v59 = vld [vmem:[#allocation2 + $0x4c8] sm:$0xf] }
  0x7c   :  { %1643 = vmatpush.bf16.msrb.mxu0 %v5266_v17  ;;  %v6706_v17 = vld [vmem:[#allocation2 + $0x34] sm:$0xf0]  ;;  %v5186_v24 = vor.u32 %v6863_v11, %v5183_v12  ;;  %v5014_v0 = vor.u32 %v6822_v58, %v5013_v56  ;;  %v4997_v4 = vld [vmem:[#allocation2 + $0x3a8] sm:$0xf] }
  0x7d   :  { %1656 = vmatpush.bf16.msrb.mxu1 %v5394_v21  ;;  %v4677_v21 = vld [vmem:[#allocation2 + $0x128] sm:$0xf]  ;;  %v4550_v28 = vor.u32 %v6706_v17, %v4549_v16  ;;  %v6786_v3 = vld [vmem:[#allocation2 + $0x2b4] sm:$0xf0] }
  0x7e   :  { %1669 = vmatpush.bf16.msrb.mxu2 %v4630_v23  ;;  %v6738_v23 = vld [vmem:[#allocation2 + $0x134] sm:$0xf0]  ;;  %v5125_v7 = vld [vmem:[#allocation2 + $0x4a8] sm:$0xf] }
  0x7f   :  { %1682 = vmatpush.bf16.msrb.mxu3 %v4758_v27  ;;  %v5314_v27 = vor.u32 %v6895_v13, %v5311_v15  ;;  %v4678_v32 = vor.u32 %v6738_v23, %v4677_v21  ;;  %v6818_v6 = vld [vmem:[#allocation2 + $0x3b4] sm:$0xf0]  ;;  %v4981_v16 = vld [vmem:[#allocation2 + $0x388] sm:$0xf] }
  0x80   :  { %1644 = vmatpush.bf16.msrb.mxu0 %v5250_v33  ;;  %v6702_v33 = vld [vmem:[#allocation2 + $0x14] sm:$0xf0]  ;;  %v4998_v12 = vor.u32 %v6818_v6, %v4997_v4  ;;  %v5109_v23 = vld [vmem:[#allocation2 + $0x488] sm:$0xf] }
  0x81   :  { %1657 = vmatpush.bf16.msrb.mxu1 %v5378_v34  ;;  %v4661_v34 = vld [vmem:[#allocation2 + $0x108] sm:$0xf]  ;;  %v4534_v47 = vor.u32 %v6702_v33, %v4533_v31  ;;  %v6782_v15 = vld [vmem:[#allocation2 + $0x294] sm:$0xf0] }
  0x82   :  { %1670 = vmatpush.bf16.msrb.mxu2 %v4614_v35  ;;  %v6734_v35 = vld [vmem:[#allocation2 + $0x114] sm:$0xf0]  ;;  %v4837_v30 = vld [vmem:[#allocation2 + $0x268] sm:$0xf] }
  0x83   :  { %1683 = vmatpush.bf16.msrb.mxu3 %v4742_v42  ;;  %v5170_v42 = vor.u32 %v6859_v25, %v5167_v26  ;;  %v6814_v21 = vld [vmem:[#allocation2 + $0x394] sm:$0xf0]  ;;  %v5237_v25 = vld [vmem:[#allocation2 + $0x588] sm:$0xf] }
  0x84   :  { %1645 = vmatpush.bf16.msrb.mxu0 %v5234_v48  ;;  %v5285_v48 = vld [vmem:[#allocation2 + $0x5e8] sm:$0xf]  ;;  %v6878_v26 = vld [vmem:[#allocation2 + $0x594] sm:$0xf0] }
  0x85   :  { %1658 = vmatpush.bf16.msrb.mxu1 %v5362_v49  ;;  %v6890_v49 = vld [vmem:[#allocation2 + $0x5f4] sm:$0xf0]  ;;  %v5238_v33 = vor.u32 %v6878_v26, %v5237_v25  ;;  %v5221_v38 = vld [vmem:[#allocation2 + $0x568] sm:$0xf] }
  0x86   :  { %1671 = vmatpush.bf16.msrb.mxu2 %v4598_v50  ;;  %v4662_v50 = vor.u32 %v6734_v35, %v4661_v34  ;;  %v5286_v57 = vor.u32 %v6890_v49, %v5285_v48  ;;  %v6778_v31 = vld [vmem:[#allocation2 + $0x274] sm:$0xf0]  ;;  %v5093_v35 = vld [vmem:[#allocation2 + $0x468] sm:$0xf] }
  0x87   :  { %1684 = vmatpush.bf16.msrb.mxu3 %v4726_v54  ;;  %v4885_v54 = vld [vmem:[#allocation2 + $0x2c8] sm:$0xf]  ;;  %v6810_v34 = vld [vmem:[#allocation2 + $0x374] sm:$0xf0] }
  0x88   :  { %1646 = vmatpush.bf16.msrb.mxu0 %v5218_v60  ;;  %v6854_v60 = vld [vmem:[#allocation2 + $0x4d4] sm:$0xf0]  ;;  %v4886_v63 = vor.u32 %v6790_v55, %v4885_v54  ;;  %v4821_v45 = vld [vmem:[#allocation2 + $0x248] sm:$0xf] }
  0x89   :  { %1659 = vmatpush.bf16.msrb.mxu1 %v5346_v61  ;;  %v5269_v61 = vld [vmem:[#allocation2 + $0x5c8] sm:$0xf]  ;;  %v5142_v1 = vor.u32 %v6854_v60, %v5141_v59  ;;  %v6842_v36 = vld [vmem:[#allocation2 + $0x474] sm:$0xf0] }
  0x8a   :  { %1672 = vmatpush.bf16.msrb.mxu2 %v4582_v62  ;;  %v6886_v62 = vld [vmem:[#allocation2 + $0x5d4] sm:$0xf0]  ;;  %v5094_v44 = vor.u32 %v6842_v36, %v5093_v35  ;;  %v4933_v59 = vld [vmem:[#allocation2 + $0x328] sm:$0xf]  ;;  %v6724_v35 = vld [vmem:[#allocation2 + $0xcc] sm:$0xf] }
  0x8b   :  { %1685 = vmatpush.bf16.msrb.mxu3 %v4710_v2  ;;  %v4869_v2 = vld [vmem:[#allocation2 + $0x2a8] sm:$0xf]  ;;  %v5270_v5 = vor.u32 %v6886_v62, %v5269_v61  ;;  %v6874_v39 = vld [vmem:[#allocation2 + $0x574] sm:$0xf0] }
  0x8c   :  { %1647 = vmatpush.bf16.msrb.mxu0 %v5202_v8  ;;  %v6850_v8 = vld [vmem:[#allocation2 + $0x4b4] sm:$0xf0]  ;;  %v4870_v11 = vor.u32 %v6786_v3, %v4869_v2  ;;  %v5222_v48 = vor.u32 %v6874_v39, %v5221_v38  ;;  %v5061_v62 = vld [vmem:[#allocation2 + $0x428] sm:$0xf]  ;;  %v4631_v38 = vld [vmem:[#allocation2 + $0xd8] sm:$0xf0] }
  0x8d   :  { %1660 = vmatpush.bf16.msrb.mxu1 %v5330_v9  ;;  %v5253_v9 = vld [vmem:[#allocation2 + $0x5a8] sm:$0xf]  ;;  %v5126_v13 = vor.u32 %v6850_v8, %v5125_v7  ;;  %v6806_v49 = vld [vmem:[#allocation2 + $0x354] sm:$0xf0]  ;;  %v6756_v39 = vld [vmem:[#allocation2 + $0x1cc] sm:$0xf] }
  0x8e   :  { %1673 = vmatpush.bf16.msrb.mxu2 %v4566_v10  ;;  %v6882_v10 = vld [vmem:[#allocation2 + $0x5b4] sm:$0xf0]  ;;  %v4789_v3 = vld [vmem:[#allocation2 + $0x208] sm:$0xf] }
  0x8f   :  { %1686 = vmatpush.bf16.msrb.mxu3 %v4694_v14  ;;  %v4853_v14 = vld [vmem:[#allocation2 + $0x288] sm:$0xf]  ;;  %v5254_v17 = vor.u32 %v6882_v10, %v5253_v9  ;;  %v6770_v58 = vld [vmem:[#allocation2 + $0x234] sm:$0xf0] }
  0x90   :  { %1648 = vmatpush.bf16.msrb.mxu0 %v5186_v24  ;;  %v6846_v24 = vld [vmem:[#allocation2 + $0x494] sm:$0xf0]  ;;  %v4917_v7 = vld [vmem:[#allocation2 + $0x308] sm:$0xf] }
  0x91   :  { %1661 = vmatpush.bf16.msrb.mxu1 %v5314_v27  ;;  %v4854_v27 = vor.u32 %v6782_v15, %v4853_v14  ;;  %v5110_v29 = vor.u32 %v6846_v24, %v5109_v23  ;;  %v6802_v61 = vld [vmem:[#allocation2 + $0x334] sm:$0xf0]  ;;  %v5045_v9 = vld [vmem:[#allocation2 + $0x408] sm:$0xf]  ;;  %v6760_v23 = vld [vmem:[#allocation2 + $0x1ec] sm:$0xf] }
  0x92   :  { %1674 = vmatpush.bf16.msrb.mxu2 %v4550_v28  ;;  %v4982_v28 = vor.u32 %v6814_v21, %v4981_v16  ;;  %v6766_v4 = vld [vmem:[#allocation2 + $0x214] sm:$0xf0]  ;;  %v5413_v14 = vld [vmem:[#allocation2 + $0x6e8] sm:$0xf]  ;;  %v6728_v16 = vld [vmem:[#allocation2 + $0xec] sm:$0xf] }
  0x93   :  { %1687 = vmatpush.bf16.msrb.mxu3 %v4678_v32  ;;  %v4965_v32 = vld [vmem:[#allocation2 + $0x368] sm:$0xf]  ;;  %v6798_v8 = vld [vmem:[#allocation2 + $0x314] sm:$0xf0]  ;;  %v4647_v21 = vld [vmem:[#allocation2 + $0xf8] sm:$0xf0] }
  0x94   :  { %1649 = vmatpush.bf16.msrb.mxu0 %v5170_v42  ;;  %v4838_v42 = vor.u32 %v6778_v31, %v4837_v30  ;;  %v4966_v43 = vor.u32 %v6810_v34, %v4965_v32  ;;  %v6922_v15 = vld [vmem:[#allocation2 + $0x6f4] sm:$0xf0]  ;;  %v4775_v24 = vld [vmem:[#allocation2 + $0x1f8] sm:$0xf0]  ;;  %v4918_v25 = vor.u32 %v6798_v8, %v4917_v7  ;;  %v4650_v31 = vor.u32 %v6728_v16, %v4647_v21  ;;  %v5349_v8 = vld [vmem:[#allocation2 + $0x668] sm:$0xf] }
  0x95   :  { %1662 = vmatpush.bf16.msrb.mxu1 %v5298_v46  ;;  %v6774_v46 = vld [vmem:[#allocation2 + $0x254] sm:$0xf0]  ;;  %v5414_v30 = vor.u32 %v6922_v15, %v5413_v14  ;;  %v4778_v32 = vor.u32 %v6760_v23, %v4775_v24  ;;  %v4711_v14 = vld [vmem:[#allocation2 + $0x178] sm:$0xf0]  ;;  %v6776_v15 = vld [vmem:[#allocation2 + $0x26c] sm:$0xf] }
  0x96   :  { %1675 = vmatpush.bf16.msrb.mxu2 %v4534_v47  ;;  %v4949_v47 = vld [vmem:[#allocation2 + $0x348] sm:$0xf]  ;;  %v4822_v54 = vor.u32 %v6774_v46, %v4821_v45  ;;  %v6918_v34 = vld [vmem:[#allocation2 + $0x6d4] sm:$0xf0]  ;;  %v4634_v46 = vor.u32 %v6724_v35, %v4631_v38  ;;  %v4839_v16 = vld [vmem:[#allocation2 + $0x278] sm:$0xf0] }
  0x97   :  { %1688 = vmatpush.bf16.msrb.mxu3 %v4662_v50  ;;  %1650 = vmatmul.bf16.vlgmr.msrb.gmra.mxu0 %v7532_v41  ;;  %v5077_v50 = vld [vmem:[#allocation2 + $0x448] sm:$0xf]  ;;  %v4950_v55 = vor.u32 %v6806_v49, %v4949_v47  ;;  %v6914_v49 = vld [vmem:[#allocation2 + $0x6b4] sm:$0xf0] }
  0x98   :  { %1694 = vmatpush.bf16.msra.mxu0 %v4902_v51  ;;  %1663 = vmatmul.bf16.vlgmr.msrb.gmra.mxu1 %v7528_v37  ;;  %v6838_v51 = vld [vmem:[#allocation2 + $0x454] sm:$0xf0]  ;;  %v5333_v24 = vld [vmem:[#allocation2 + $0x648] sm:$0xf] }
  0x99   :  { %1707 = vmatpush.bf16.msra.mxu1 %v5030_v52  ;;  %1676 = vmatmul.bf16.vlgmr.msrb.gmra.mxu2 %v7512_v19  ;;  %v5205_v52 = vld [vmem:[#allocation2 + $0x548] sm:$0xf]  ;;  %v5078_v56 = vor.u32 %v6838_v51, %v5077_v50  ;;  %v6720_v50 = vld [vmem:[#allocation2 + $0xac] sm:$0xf] }
  0x9a   :  { %1720 = vmatpush.bf16.msra.mxu2 %v5158_v53  ;;  %1689 = vmatmul.bf16.vlgmr.msrb.gmra.mxu3 %v7516_v22  ;;  %v6870_v53 = vld [vmem:[#allocation2 + $0x554] sm:$0xf0]  ;;  %v5317_v38 = vld [vmem:[#allocation2 + $0x628] sm:$0xf] }
  0x9b   :  { %1733 = vmatpush.bf16.msra.mxu3 %v5286_v57  ;;  %v4805_v57 = vld [vmem:[#allocation2 + $0x228] sm:$0xf]  ;;  %v5206_v60 = vor.u32 %v6870_v53, %v5205_v52  ;;  %v4615_v52 = vld [vmem:[#allocation2 + $0xb8] sm:$0xf0]  ;;  %v6752_v53 = vld [vmem:[#allocation2 + $0x1ac] sm:$0xf] }
  0x9c   :  { %1695 = vmatpush.bf16.msra.mxu0 %v4886_v63  ;;  %v6834_v63 = vld [vmem:[#allocation2 + $0x434] sm:$0xf0]  ;;  %v4806_v2 = vor.u32 %v6770_v58, %v4805_v57  ;;  %v4618_v58 = vor.u32 %v6720_v50, %v4615_v52 }
  0x9d   :  { %1708 = vmatpush.bf16.msra.mxu1 %v5014_v0  ;;  %v5189_v0 = vld [vmem:[#allocation2 + $0x528] sm:$0xf]  ;;  %v5062_v6 = vor.u32 %v6834_v63, %v5061_v62  ;;  %v6716_v62 = vld [vmem:[#allocation2 + $0x8c] sm:$0xf]  ;;  %v6894_v52 = vld [vmem:[#allocation2 + $0x614] sm:$0xf0] }
  0x9e   :  { %1721 = vmatpush.bf16.msra.mxu2 %v5142_v1  ;;  %v6866_v1 = vld [vmem:[#allocation2 + $0x534] sm:$0xf0] }
  0x9f   :  { %1734 = vmatpush.bf16.msra.mxu3 %v5270_v5  ;;  %v4934_v5 = vor.u32 %v6802_v61, %v4933_v59  ;;  %v5190_v10 = vor.u32 %v6866_v1, %v5189_v0  ;;  %v6910_v61 = vld [vmem:[#allocation2 + $0x694] sm:$0xf0]  ;;  %v4599_v0 = vld [vmem:[#allocation2 + $0x98] sm:$0xf0]  ;;  %v6748_v1 = vld [vmem:[#allocation2 + $0x18c] sm:$0xf] }
  0xa0   :  { %1696 = vmatpush.bf16.msra.mxu0 %v4870_v11  ;;  %v6830_v11 = vld [vmem:[#allocation2 + $0x414] sm:$0xf0] }
  0xa1   :  { %1709 = vmatpush.bf16.msra.mxu1 %v4998_v12  ;;  %v5173_v12 = vld [vmem:[#allocation2 + $0x508] sm:$0xf]  ;;  %v5046_v26 = vor.u32 %v6830_v11, %v5045_v9  ;;  %v6906_v9 = vld [vmem:[#allocation2 + $0x674] sm:$0xf0] }
  0xa2   :  { %1722 = vmatpush.bf16.msra.mxu2 %v5126_v13  ;;  %v6862_v13 = vld [vmem:[#allocation2 + $0x514] sm:$0xf0] }
  0xa3   :  { %1735 = vmatpush.bf16.msra.mxu3 %v5254_v17  ;;  %v4790_v17 = vor.u32 %v6766_v4, %v4789_v3  ;;  %v6780_v3 = vld [vmem:[#allocation2 + $0x28c] sm:$0xf]  ;;  %v4855_v4 = vld [vmem:[#allocation2 + $0x298] sm:$0xf0] }
  0xa4   :  { %1697 = vmatpush.bf16.msra.mxu0 %v4854_v27  ;;  %v6792_v27 = vld [vmem:[#allocation2 + $0x2ec] sm:$0xf]  ;;  %v4858_v11 = vor.u32 %v6780_v3, %v4855_v4  ;;  %v5159_v4 = vld [vmem:[#allocation2 + $0x4f8] sm:$0xf0] }
  0xa5   :  { %1710 = vmatpush.bf16.msra.mxu1 %v4982_v28  ;;  %v4903_v28 = vld [vmem:[#allocation2 + $0x2f8] sm:$0xf0] }
  0xa6   :  { %1723 = vmatpush.bf16.msra.mxu2 %v5110_v29  ;;  %v5174_v29 = vor.u32 %v6862_v13, %v5173_v12  ;;  %v4906_v36 = vor.u32 %v6792_v27, %v4903_v28  ;;  %v4583_v12 = vld [vmem:[#allocation2 + $0x78] sm:$0xf0]  ;;  %v6744_v13 = vld [vmem:[#allocation2 + $0x16c] sm:$0xf]  ;;  %v4842_v27 = vor.u32 %v6776_v15, %v4839_v16 }
  0xa7   :  { %1736 = vmatpush.bf16.msra.mxu3 %v5238_v33  ;;  %v5397_v33 = vld [vmem:[#allocation2 + $0x6c8] sm:$0xf]  ;;  %v4714_v23 = vor.u32 %v6744_v13, %v4711_v14  ;;  %v4567_v28 = vld [vmem:[#allocation2 + $0x58] sm:$0xf0] }
  0xa8   :  { %1698 = vmatpush.bf16.msra.mxu0 %v4838_v42  ;;  %v4759_v42 = vld [vmem:[#allocation2 + $0x1d8] sm:$0xf0]  ;;  %v5398_v45 = vor.u32 %v6918_v34, %v5397_v33 }
  0xa9   :  { %1711 = vmatpush.bf16.msra.mxu1 %v4966_v43  ;;  %v6788_v43 = vld [vmem:[#allocation2 + $0x2cc] sm:$0xf]  ;;  %v4762_v47 = vor.u32 %v6756_v39, %v4759_v42  ;;  %v6898_v39 = vld [vmem:[#allocation2 + $0x634] sm:$0xf0] }
  0xaa   :  { %1724 = vmatpush.bf16.msra.mxu2 %v5094_v44  ;;  %v4887_v44 = vld [vmem:[#allocation2 + $0x2d8] sm:$0xf0]  ;;  %v6704_v42 = vld [vmem:[#allocation2 + $0x2c] sm:$0xf]  ;;  %v5318_v50 = vor.u32 %v6898_v39, %v5317_v38 }
  0xab   :  { %1737 = vmatpush.bf16.msra.mxu3 %v5222_v48  ;;  %v5381_v48 = vld [vmem:[#allocation2 + $0x6a8] sm:$0xf]  ;;  %v4890_v51 = vor.u32 %v6788_v43, %v4887_v44  ;;  %v4999_v38 = vld [vmem:[#allocation2 + $0x3b8] sm:$0xf0]  ;;  %v6848_v39 = vld [vmem:[#allocation2 + $0x4ac] sm:$0xf] }
  0xac   :  { %1699 = vmatpush.bf16.msra.mxu0 %v4822_v54  ;;  %v4743_v54 = vld [vmem:[#allocation2 + $0x1b8] sm:$0xf0]  ;;  %v5382_v57 = vor.u32 %v6914_v49, %v5381_v48  ;;  %v6768_v48 = vld [vmem:[#allocation2 + $0x22c] sm:$0xf] }
  0xad   :  { %1712 = vmatpush.bf16.msra.mxu1 %v4950_v55  ;;  %v6784_v55 = vld [vmem:[#allocation2 + $0x2ac] sm:$0xf]  ;;  %v4746_v59 = vor.u32 %v6752_v53, %v4743_v54  ;;  %v4807_v49 = vld [vmem:[#allocation2 + $0x238] sm:$0xf0] }
  0xae   :  { %1725 = vmatpush.bf16.msra.mxu2 %v5078_v56  ;;  %v4871_v56 = vld [vmem:[#allocation2 + $0x2b8] sm:$0xf0] }
  0xaf   :  { %1738 = vmatpush.bf16.msra.mxu3 %v5206_v60  ;;  %v5365_v60 = vld [vmem:[#allocation2 + $0x688] sm:$0xf]  ;;  %v4874_v63 = vor.u32 %v6784_v55, %v4871_v56  ;;  %v6700_v55 = vld [vmem:[#allocation2 + $0xc] sm:$0xf]  ;;  %v4535_v56 = vld [vmem:[#allocation2 + $0x18] sm:$0xf0] }
  0xb0   :  { %1700 = vmatpush.bf16.msra.mxu0 %v4806_v2  ;;  %v4727_v2 = vld [vmem:[#allocation2 + $0x198] sm:$0xf0] }
  0xb1   :  { %1713 = vmatpush.bf16.msra.mxu1 %v4934_v5  ;;  %v5366_v5 = vor.u32 %v6910_v61, %v5365_v60  ;;  %v4730_v7 = vor.u32 %v6748_v1, %v4727_v2  ;;  %v4663_v60 = vld [vmem:[#allocation2 + $0x118] sm:$0xf0]  ;;  %v6764_v61 = vld [vmem:[#allocation2 + $0x20c] sm:$0xf] }
  0xb2   :  { %1726 = vmatpush.bf16.msra.mxu2 %v5062_v6  ;;  %v4602_v6 = vor.u32 %v6716_v62, %v4599_v0  ;;  %v4791_v62 = vld [vmem:[#allocation2 + $0x218] sm:$0xf0]  ;;  %v6824_v0 = vld [vmem:[#allocation2 + $0x3ec] sm:$0xf] }
  0xb3   :  { %1739 = vmatpush.bf16.msra.mxu3 %v5190_v10  ;;  %v6712_v10 = vld [vmem:[#allocation2 + $0x6c] sm:$0xf]  ;;  %v5031_v1 = vld [vmem:[#allocation2 + $0x3f8] sm:$0xf0]  ;;  %v4794_v13 = vor.u32 %v6764_v61, %v4791_v62 }
  0xb4   :  { %1701 = vmatpush.bf16.msra.mxu0 %v4790_v17  ;;  %v5350_v17 = vor.u32 %v6906_v9, %v5349_v8  ;;  %v4586_v21 = vor.u32 %v6712_v10, %v4583_v12  ;;  %v6856_v2 = vld [vmem:[#allocation2 + $0x4ec] sm:$0xf]  ;;  %v4538_v8 = vor.u32 %v6700_v55, %v4535_v56  ;;  %v5034_v14 = vor.u32 %v6824_v0, %v5031_v1  ;;  %v5111_v56 = vld [vmem:[#allocation2 + $0x498] sm:$0xf0] }
  0xb5   :  { %1714 = vmatpush.bf16.msra.mxu1 %v4918_v25  ;;  %v6902_v25 = vld [vmem:[#allocation2 + $0x654] sm:$0xf0]  ;;  %v6920_v10 = vld [vmem:[#allocation2 + $0x6ec] sm:$0xf]  ;;  %v5162_v15 = vor.u32 %v6856_v2, %v5159_v4  ;;  %v4967_v2 = vld [vmem:[#allocation2 + $0x378] sm:$0xf0] }
  0xb6   :  { %1727 = vmatpush.bf16.msra.mxu2 %v5046_v26  ;;  %v6708_v26 = vld [vmem:[#allocation2 + $0x4c] sm:$0xf]  ;;  %v5334_v33 = vor.u32 %v6902_v25, %v5333_v24  ;;  %v5143_v25 = vld [vmem:[#allocation2 + $0x4d8] sm:$0xf0] }
  0xb7   :  { %1740 = vmatpush.bf16.msra.mxu3 %v5174_v29  ;;  %1702 = vmatmul.bf16.vlgmr.msra.gmra.mxu0 %v7510_v18  ;;  %v6740_v29 = vld [vmem:[#allocation2 + $0x14c] sm:$0xf]  ;;  %v4570_v35 = vor.u32 %v6708_v26, %v4567_v28 }
  0xb8   :  { %1746 = vmatpush.bf16.msrb.mxu0 %v5414_v30  ;;  %1715 = vmatmul.bf16.vlgmr.msra.gmra.mxu1 %v7514_v20  ;;  %v4695_v30 = vld [vmem:[#allocation2 + $0x158] sm:$0xf0]  ;;  %v6884_v26 = vld [vmem:[#allocation2 + $0x5cc] sm:$0xf] }
  0xb9   :  { %1759 = vmatpush.bf16.msrb.mxu1 %v4650_v31  ;;  %1728 = vmatmul.bf16.vlgmr.msra.gmra.mxu2 %v7530_v40  ;;  %v6772_v31 = vld [vmem:[#allocation2 + $0x24c] sm:$0xf] }
  0xba   :  { %1772 = vmatpush.bf16.msrb.mxu2 %v4778_v32  ;;  %1741 = vmatmul.bf16.vlgmr.msra.gmra.mxu3 %v7532_v41  ;;  %v4823_v32 = vld [vmem:[#allocation2 + $0x258] sm:$0xf0]  ;;  %v6916_v28 = vld [vmem:[#allocation2 + $0x6cc] sm:$0xf] }
  0xbb   :  { %1785 = vmatpush.bf16.msrb.mxu3 %v4906_v36  ;;  %v4698_v36 = vor.u32 %v6740_v29, %v4695_v30  ;;  %v4826_v44 = vor.u32 %v6772_v31, %v4823_v32  ;;  %v5399_v29 = vld [vmem:[#allocation2 + $0x6d8] sm:$0xf0]  ;;  %v6808_v1 = vld [vmem:[#allocation2 + $0x36c] sm:$0xf] }
  0xbc   :  { %1747 = vmatpush.bf16.msrb.mxu0 %v5398_v45  ;;  %v4551_v45 = vld [vmem:[#allocation2 + $0x38] sm:$0xf0] }
  0xbd   :  { %1760 = vmatpush.bf16.msrb.mxu1 %v4634_v46  ;;  %v6736_v46 = vld [vmem:[#allocation2 + $0x12c] sm:$0xf]  ;;  %v4554_v53 = vor.u32 %v6704_v42, %v4551_v45  ;;  %v5402_v42 = vor.u32 %v6916_v28, %v5399_v29  ;;  %v7573_v28 = vld [vmem:[%s7722_s3] sm:$0xf] }
  0xbe   :  { %1773 = vmatpush.bf16.msrb.mxu2 %v4762_v47  ;;  %v4679_v47 = vld [vmem:[#allocation2 + $0x138] sm:$0xf0]  ;;  %v6880_v45 = vld [vmem:[#allocation2 + $0x5ac] sm:$0xf] }
  0xbf   :  { %1786 = vmatpush.bf16.msrb.mxu3 %v4890_v51  ;;  %v5301_v51 = vld [vmem:[#allocation2 + $0x608] sm:$0xf]  ;;  %v4682_v54 = vor.u32 %v6736_v46, %v4679_v47  ;;  %v5255_v46 = vld [vmem:[#allocation2 + $0x5b8] sm:$0xf0]  ;;  %v6912_v47 = vld [vmem:[#allocation2 + $0x6ac] sm:$0xf] }
  0xc0   :  { %1748 = vmatpush.bf16.msrb.mxu0 %v5382_v57  ;;  %v7550_v34 = vpop.f32.mrf.mxu0  ;;  %v6732_v57 = vld [vmem:[#allocation2 + $0x10c] sm:$0xf]  ;;  %v5302_v3 = vor.u32 %v6894_v52, %v5301_v51  ;;  %v5258_v51 = vor.u32 %v6880_v45, %v5255_v46  ;;  %v5191_v45 = vld [vmem:[#allocation2 + $0x538] sm:$0xf0] }
  0xc1   :  { %1761 = vmatpush.bf16.msrb.mxu1 %v4618_v58  ;;  %v7552_v43 = vpop.f32.mrf.mxu1  ;;  %v7554_v58 = vpop.f32.mrf.mxu2  ;;  %v4666_v9 = vor.u32 %v6732_v57, %v4663_v60  ;;  %v6812_v52 = vld [vmem:[#allocation2 + $0x38c] sm:$0xf]  ;;  %v5367_v60 = vld [vmem:[#allocation2 + $0x698] sm:$0xf0] }
  0xc2   :  { %1774 = vmatpush.bf16.msrb.mxu2 %v4746_v59  ;;  %v4810_v59 = vor.u32 %v6768_v48, %v4807_v49  ;;  %v5383_v48 = vld [vmem:[#allocation2 + $0x6b8] sm:$0xf0]  ;;  %v6876_v57 = vld [vmem:[#allocation2 + $0x58c] sm:$0xf] }
  0xc3   :  { %1787 = vmatpush.bf16.msrb.mxu3 %v4874_v63  ;;  %v7556_v63 = vpop.f32.mrf.mxu3  ;;  %v5386_v55 = vor.u32 %v6912_v47, %v5383_v48  ;;  %v6896_v46 = vld [vmem:[#allocation2 + $0x62c] sm:$0xf]  ;;  %v5319_v47 = vld [vmem:[#allocation2 + $0x638] sm:$0xf0]  ;;  %v333_v48 = vperm.slane %v7573_v28, 0 }
  0xc4   :  { %1749 = vmatpush.bf16.msrb.mxu0 %v5366_v5  ;;  %v6888_v5 = vld [vmem:[#allocation2 + $0x5ec] sm:$0xf] }
  0xc5   :  { %1762 = vmatpush.bf16.msrb.mxu1 %v4602_v6  ;;  %v5287_v6 = vld [vmem:[#allocation2 + $0x5f8] sm:$0xf0] }
  0xc6   :  { %1775 = vmatpush.bf16.msrb.mxu2 %v4730_v7  ;;  %v5290_v16 = vor.u32 %v6888_v5, %v5287_v6  ;;  %v5095_v5 = vld [vmem:[#allocation2 + $0x478] sm:$0xf0]  ;;  %v6872_v6 = vld [vmem:[#allocation2 + $0x56c] sm:$0xf] }
  0xc7   :  { %1788 = vmatpush.bf16.msrb.mxu3 %v4858_v11  ;;  %v5415_v11 = vld [vmem:[#allocation2 + $0x6f8] sm:$0xf0] }
  0xc8   :  { %1750 = vmatpush.bf16.msrb.mxu0 %v5350_v17  ;;  %v1497_v7 = vpop.f32.mrf.mxu0  ;;  %v6820_v17 = vld [vmem:[#allocation2 + $0x3cc] sm:$0xf]  ;;  %v5418_v24 = vor.u32 %v6920_v10, %v5415_v11  ;;  %v4970_v10 = vor.u32 %v6808_v1, %v4967_v2 }
  0xc9   :  { %1763 = vmatpush.bf16.msrb.mxu1 %v4586_v21  ;;  %v1510_v12 = vpop.f32.mrf.mxu1  ;;  %v5015_v21 = vld [vmem:[#allocation2 + $0x3d8] sm:$0xf0]  ;;  %v1523_v30 = vpop.f32.mrf.mxu2 }
  0xca   :  { %1776 = vmatpush.bf16.msrb.mxu2 %v4714_v23  ;;  %v6852_v23 = vld [vmem:[#allocation2 + $0x4cc] sm:$0xf]  ;;  %v5018_v31 = vor.u32 %v6820_v17, %v5015_v21  ;;  %v5223_v7 = vld [vmem:[#allocation2 + $0x578] sm:$0xf0] }
  0xcb   :  { %1789 = vmatpush.bf16.msrb.mxu3 %v4842_v27  ;;  %v5271_v27 = vld [vmem:[#allocation2 + $0x5d8] sm:$0xf0]  ;;  %v1536_v32 = vpop.f32.mrf.mxu3  ;;  %v5226_v12 = vor.u32 %v6872_v6, %v5223_v7 }
  0xcc   :  { %1751 = vmatpush.bf16.msrb.mxu0 %v5334_v33  ;;  %v5146_v33 = vor.u32 %v6852_v23, %v5143_v25  ;;  %v5079_v21 = vld [vmem:[#allocation2 + $0x458] sm:$0xf0]  ;;  %v6868_v23 = vld [vmem:[#allocation2 + $0x54c] sm:$0xf] }
  0xcd   :  { %1764 = vmatpush.bf16.msrb.mxu1 %v4570_v35  ;;  %v5274_v35 = vor.u32 %v6884_v26, %v5271_v27  ;;  %v6900_v25 = vld [vmem:[#allocation2 + $0x64c] sm:$0xf]  ;;  %v5335_v26 = vld [vmem:[#allocation2 + $0x658] sm:$0xf0] }
  0xce   :  { %1777 = vmatpush.bf16.msrb.mxu2 %v4698_v36  ;;  %v6816_v36 = vld [vmem:[#allocation2 + $0x3ac] sm:$0xf] }
  0xcf   :  { %1790 = vmatpush.bf16.msrb.mxu3 %v4826_v44  ;;  %v5127_v44 = vld [vmem:[#allocation2 + $0x4b8] sm:$0xf0]  ;;  %v5002_v49 = vor.u32 %v6816_v36, %v4999_v38  ;;  %v6832_v38 = vld [vmem:[#allocation2 + $0x42c] sm:$0xf] }
  0xd0   :  { %1752 = vmatpush.bf16.msrb.mxu0 %v5318_v50  ;;  %v5130_v50 = vor.u32 %v6848_v39, %v5127_v44  ;;  %v4935_v36 = vld [vmem:[#allocation2 + $0x338] sm:$0xf0]  ;;  %v5338_v39 = vor.u32 %v6900_v25, %v5335_v26  ;;  %v6864_v44 = vld [vmem:[#allocation2 + $0x52c] sm:$0xf]  ;;  %v6950_v25 = vld [vmem:[#allocation5 + $0xd4] sm:$0xf0] }
  0xd1   :  { %1765 = vmatpush.bf16.msrb.mxu1 %v4554_v53  ;;  %v4983_v53 = vld [vmem:[#allocation2 + $0x398] sm:$0xf0] }
  0xd2   :  { %1778 = vmatpush.bf16.msrb.mxu2 %v4682_v54  ;;  %v6844_v54 = vld [vmem:[#allocation2 + $0x48c] sm:$0xf] }
  0xd3   :  { %1791 = vmatpush.bf16.msrb.mxu3 %v4810_v59  ;;  %v6908_v59 = vld [vmem:[#allocation2 + $0x68c] sm:$0xf] }
  0xd4   :  { %1753 = vmatpush.bf16.msrb.mxu0 %v5302_v3  ;;  %v7562_v61 = vpop.f32.mrf.mxu0  ;;  %v6840_v3 = vld [vmem:[#allocation2 + $0x46c] sm:$0xf]  ;;  %v5370_v4 = vor.u32 %v6908_v59, %v5367_v60  ;;  %v5175_v59 = vld [vmem:[#allocation2 + $0x518] sm:$0xf0] }
  0xd5   :  { %1766 = vmatpush.bf16.msrb.mxu1 %v4538_v8  ;;  %v7564_v62 = vpop.f32.mrf.mxu1  ;;  %v6904_v8 = vld [vmem:[#allocation2 + $0x66c] sm:$0xf]  ;;  %v5098_v11 = vor.u32 %v6840_v3, %v5095_v5  ;;  %v5541_v3 = vld [vmem:[#allocation5 + $0xf0] sm:$0xf] }
  0xd6   :  { %1779 = vmatpush.bf16.msrb.mxu2 %v4666_v9  ;;  %v5351_v9 = vld [vmem:[#allocation2 + $0x678] sm:$0xf0]  ;;  %v6892_v60 = vld [vmem:[#allocation2 + $0x60c] sm:$0xf] }
  0xd7   :  { %1792 = vmatpush.bf16.msrb.mxu3 %v4794_v13  ;;  %1754 = vmatmul.bf16.vlgmr.msrb.gmra.mxu0 %v7528_v37  ;;  %v6804_v13 = vld [vmem:[#allocation2 + $0x34c] sm:$0xf]  ;;  %v5354_v17 = vor.u32 %v6904_v8, %v5351_v9  ;;  %v1496_v9 = vadd.f32 %v7550_v34, %v333_v48  ;;  %v5525_v34 = vld [vmem:[#allocation5 + $0xd0] sm:$0xf] }
  0xd8   :  { %1798 = vmatpush.bf16.msra.mxu0 %v5034_v14  ;;  %1767 = vmatmul.bf16.vlgmr.msrb.gmra.mxu1 %v7512_v19  ;;  %v5114_v19 = vor.u32 %v6844_v54, %v5111_v56  ;;  %v4951_v14 = vld [vmem:[#allocation2 + $0x358] sm:$0xf0]  ;;  %v6828_v54 = vld [vmem:[#allocation2 + $0x40c] sm:$0xf] }
  0xd9   :  { %1811 = vmatpush.bf16.msra.mxu1 %v5162_v15  ;;  %1780 = vmatmul.bf16.vlgmr.msrb.gmra.mxu2 %v7516_v22  ;;  %v5239_v22 = vld [vmem:[#allocation2 + $0x598] sm:$0xf0]  ;;  %v6836_v15 = vld [vmem:[#allocation2 + $0x44c] sm:$0xf]  ;;  %v4954_v29 = vor.u32 %v6804_v13, %v4951_v14  ;;  %v5533_v13 = vld [vmem:[#allocation5 + $0xe0] sm:$0xf] }
  0xda   :  { %1824 = vmatpush.bf16.msra.mxu2 %v5290_v16  ;;  %1793 = vmatmul.bf16.vlgmr.msrb.gmra.mxu3 %v7510_v18  ;;  %v4986_v18 = vor.u32 %v6812_v52, %v4983_v53  ;;  %v5242_v0 = vor.u32 %v6876_v57, %v5239_v22  ;;  %v5082_v32 = vor.u32 %v6836_v15, %v5079_v21  ;;  %v4919_v53 = vld [vmem:[#allocation2 + $0x318] sm:$0xf0]  ;;  %v6860_v22 = vld [vmem:[#allocation2 + $0x50c] sm:$0xf]  ;;  %v6952_v14 = vld [vmem:[#allocation5 + $0xe4] sm:$0xf0] }
  0xdb   :  { %1837 = vmatpush.bf16.msra.mxu3 %v5418_v24  ;;  %v5207_v24 = vld [vmem:[#allocation2 + $0x558] sm:$0xf0]  ;;  %v5194_v52 = vor.u32 %v6864_v44, %v5191_v45  ;;  %v5322_v57 = vor.u32 %v6896_v46, %v5319_v47  ;;  %v5178_v6 = vor.u32 %v6860_v22, %v5175_v59  ;;  %v5461_v21 = vld [vmem:[#allocation5 + $0x50] sm:$0xf]  ;;  %v5437_v45 = vld [vmem:[#allocation5 + $0x20] sm:$0xf] }
  0xdc   :  { %1799 = vmatpush.bf16.msra.mxu0 %v5018_v31  ;;  %v7566_v16 = vpop.f32.mrf.mxu2  ;;  %v1549_v30 = vpop.f32.mrf.mxu0  ;;  %v6928_v46 = vld [vmem:[#allocation5 + $0x24] sm:$0xf0]  ;;  %v5493_v22 = vld [vmem:[#allocation5 + $0x90] sm:$0xf]  ;;  %v6942_v59 = vld [vmem:[#allocation5 + $0x94] sm:$0xf0] }
  0xdd   :  { %1812 = vmatpush.bf16.msra.mxu1 %v5146_v33  ;;  %v7568_v27 = vpop.f32.mrf.mxu3  ;;  %v1562_v31 = vpop.f32.mrf.mxu1  ;;  %v5210_v33 = vor.u32 %v6868_v23, %v5207_v24  ;;  %v6934_v23 = vld [vmem:[#allocation5 + $0x54] sm:$0xf0]  ;;  %v5534_v24 = vor.u32 %v6952_v14, %v5533_v13  ;;  %v6932_v30 = vld [vmem:[#allocation5 + $0x44] sm:$0xf0]  ;;  %v5471_v14 = vld [vmem:[#allocation5 + $0x68] sm:$0xf0] }
  0xde   :  { %1825 = vmatpush.bf16.msra.mxu2 %v5274_v35  ;;  %v6800_v35 = vld [vmem:[#allocation2 + $0x32c] sm:$0xf]  ;;  %v5462_v26 = vor.u32 %v6934_v23, %v5461_v21  ;;  %v5517_v31 = vld [vmem:[#allocation5 + $0xc0] sm:$0xf]  ;;  %v5605_v23 = vld [vmem:[#allocation5 + $0x170] sm:$0xf] }
  0xdf   :  { %1838 = vmatpush.bf16.msra.mxu3 %v5402_v42  ;;  %v5063_v42 = vld [vmem:[#allocation2 + $0x438] sm:$0xf0]  ;;  %v5535_v21 = vld [vmem:[#allocation5 + $0xe8] sm:$0xf0] }
  0xe0   :  { %1800 = vmatpush.bf16.msra.mxu0 %v5002_v49  ;;  %v4938_v49 = vor.u32 %v6800_v35, %v4935_v36  ;;  %v6930_v36 = vld [vmem:[#allocation5 + $0x34] sm:$0xf0] }
  0xe1   :  { %1813 = vmatpush.bf16.msra.mxu1 %v5130_v50  ;;  %v6796_v50 = vld [vmem:[#allocation2 + $0x30c] sm:$0xf] }
  0xe2   :  { %1826 = vmatpush.bf16.msra.mxu2 %v5258_v51  ;;  %v5066_v51 = vor.u32 %v6832_v38, %v5063_v42  ;;  %v4922_v2 = vor.u32 %v6796_v50, %v4919_v53  ;;  %v6946_v42 = vld [vmem:[#allocation5 + $0xb4] sm:$0xf0]  ;;  %v6944_v50 = vld [vmem:[#allocation5 + $0xa4] sm:$0xf0] }
  0xe3   :  { %1839 = vmatpush.bf16.msra.mxu3 %v5386_v55  ;;  %v5047_v55 = vld [vmem:[#allocation2 + $0x418] sm:$0xf0] }
  0xe4   :  { %1801 = vmatpush.bf16.msra.mxu0 %v4986_v18  ;;  %v1575_v56 = vpop.f32.mrf.mxu2  ;;  %v5303_v18 = vld [vmem:[#allocation2 + $0x618] sm:$0xf0]  ;;  %v5050_v5 = vor.u32 %v6828_v54, %v5047_v55  ;;  %v5429_v55 = vld [vmem:[#allocation5 + $0x10] sm:$0xf] }
  0xe5   :  { %1814 = vmatpush.bf16.msra.mxu1 %v5114_v19  ;;  %v5477_v19 = vld [vmem:[#allocation5 + $0x70] sm:$0xf]  ;;  %v1588_v1 = vpop.f32.mrf.mxu3  ;;  %v5306_v7 = vor.u32 %v6892_v60, %v5303_v18 }
  0xe6   :  { %1827 = vmatpush.bf16.msra.mxu2 %v5242_v0  ;;  %v6938_v0 = vld [vmem:[#allocation5 + $0x74] sm:$0xf0]  ;;  %v6924_v1 = vld [vmem:[#allocation5 + $0x4] sm:$0xf0] }
  0xe7   :  { %1840 = vmatpush.bf16.msra.mxu3 %v5370_v4  ;;  %v6954_v4 = vld [vmem:[#allocation5 + $0xf4] sm:$0xf0]  ;;  %v5478_v8 = vor.u32 %v6938_v0, %v5477_v19  ;;  %v5421_v0 = vld [vmem:[#allocation5] sm:$0xf] }
  0xe8   :  { %1802 = vmatpush.bf16.msra.mxu0 %v4970_v10  ;;  %v5469_v10 = vld [vmem:[#allocation5 + $0x60] sm:$0xf] }
  0xe9   :  { %1815 = vmatpush.bf16.msra.mxu1 %v5098_v11  ;;  %v6936_v11 = vld [vmem:[#allocation5 + $0x64] sm:$0xf0] }
  0xea   :  { %1828 = vmatpush.bf16.msra.mxu2 %v5226_v12  ;;  %v5542_v12 = vor.u32 %v6954_v4, %v5541_v3  ;;  %v5470_v15 = vor.u32 %v6936_v11, %v5469_v10  ;;  %v6937_v3 = vld [vmem:[#allocation5 + $0x74] sm:$0xf]  ;;  %v5422_v11 = vor.u32 %v6924_v1, %v5421_v0  ;;  %v5439_v1 = vld [vmem:[#allocation5 + $0x28] sm:$0xf0] }
  0xeb   :  { %1841 = vmatpush.bf16.msra.mxu3 %v5354_v17  ;;  %v1509_v17 = vadd.f32 %v7552_v43, %v1496_v9  ;;  %v5453_v43 = vld [vmem:[#allocation5 + $0x40] sm:$0xf]  ;;  %v5543_v9 = vld [vmem:[#allocation5 + $0xf8] sm:$0xf0] }
  0xec   :  { %1803 = vmatpush.bf16.msra.mxu0 %v4954_v29 }
  0xed   :  { %1816 = vmatpush.bf16.msra.mxu1 %v5082_v32  ;;  %v1522_v29 = vadd.f32 %v7554_v58, %v1509_v17  ;;  %v6948_v32 = vld [vmem:[#allocation5 + $0xc4] sm:$0xf0]  ;;  %v6951_v17 = vld [vmem:[#allocation5 + $0xe4] sm:$0xf] }
  0xee   :  { %1829 = vmatpush.bf16.msra.mxu2 %v5210_v33  ;;  %v5454_v33 = vor.u32 %v6932_v30, %v5453_v43  ;;  %v5518_v38 = vor.u32 %v6948_v32, %v5517_v31  ;;  %v5597_v43 = vld [vmem:[#allocation5 + $0x160] sm:$0xf]  ;;  %v6968_v30 = vld [vmem:[#allocation5 + $0x164] sm:$0xf0]  ;;  %v5463_v31 = vld [vmem:[#allocation5 + $0x58] sm:$0xf0]  ;;  %v5538_v32 = vor.u32 %v6951_v17, %v5535_v21 }
  0xef   :  { %1842 = vmatpush.bf16.msra.mxu3 %v5338_v39  ;;  %v5509_v39 = vld [vmem:[#allocation5 + $0xb0] sm:$0xf]  ;;  %v6958_v17 = vld [vmem:[#allocation5 + $0x114] sm:$0xf0]  ;;  %v6941_v21 = vld [vmem:[#allocation5 + $0x94] sm:$0xf] }
  0xf0   :  { %1804 = vmatpush.bf16.msra.mxu0 %v4938_v49  ;;  %v5510_v47 = vor.u32 %v6946_v42, %v5509_v39  ;;  %v6931_v39 = vld [vmem:[#allocation5 + $0x44] sm:$0xf]  ;;  %v5455_v42 = vld [vmem:[#allocation5 + $0x48] sm:$0xf0] }
  0xf1   :  { %1817 = vmatpush.bf16.msra.mxu1 %v5066_v51  ;;  %v334_v51 = vperm.slane %v7573_v28, 1 }
  0xf2   :  { %1830 = vmatpush.bf16.msra.mxu2 %v5194_v52  ;;  %v5438_v52 = vor.u32 %v6928_v46, %v5437_v45  ;;  %v5519_v46 = vld [vmem:[#allocation5 + $0xc8] sm:$0xf0] }
  0xf3   :  { %1843 = vmatpush.bf16.msra.mxu3 %v5322_v57  ;;  %v1587_v60 = vadd.f32 %v7568_v27, %v334_v51 }
  0xf4   :  { %1805 = vmatpush.bf16.msra.mxu0 %v4922_v2  ;;  %v1599_v35 = vpop.f32.mrf.mxu0  ;;  %v5494_v2 = vor.u32 %v6942_v59, %v5493_v22  ;;  %v6962_v22 = vld [vmem:[#allocation5 + $0x134] sm:$0xf0] }
  0xf5   :  { %1818 = vmatpush.bf16.msra.mxu1 %v5050_v5  ;;  %v5485_v5 = vld [vmem:[#allocation5 + $0x80] sm:$0xf]  ;;  %v1600_v10 = vadd.f32 %v1599_v35, %v1587_v60  ;;  %v5598_v35 = vor.u32 %v6968_v30, %v5597_v43  ;;  %v6945_v60 = vld [vmem:[#allocation5 + $0xb4] sm:$0xf]  ;;  %v6939_v30 = vld [vmem:[#allocation5 + $0x84] sm:$0xf] }
  0xf6   :  { %1831 = vmatpush.bf16.msra.mxu2 %v5178_v6  ;;  %v6940_v6 = vld [vmem:[#allocation5 + $0x84] sm:$0xf0] }
  0xf7   :  { %1844 = vmatpush.bf16.msra.mxu3 %v5306_v7  ;;  %1806 = vmatmul.bf16.vlgmr.msra.gmra.mxu0 %v7514_v20  ;;  %v5526_v20 = vor.u32 %v6950_v25, %v5525_v34  ;;  %v5486_v13 = vor.u32 %v6940_v6, %v5485_v5  ;;  %v6943_v6 = vld [vmem:[#allocation5 + $0xa4] sm:$0xf] }
  0xf8   :  { %2248 = vmatpush.bf16.msrb.mxu0 %v5478_v8  ;;  %1819 = vmatmul.bf16.vlgmr.msra.gmra.mxu1 %v7530_v40  ;;  %v1535_v40 = vadd.f32 %v7556_v63, %v1522_v29  ;;  %v5501_v63 = vld [vmem:[#allocation5 + $0xa0] sm:$0xf]  ;;  %v6953_v8 = vld [vmem:[#allocation5 + $0xf4] sm:$0xf] }
  0xf9   :  { %2261 = vmatpush.bf16.msrb.mxu1 %v5542_v12  ;;  %1832 = vmatmul.bf16.vlgmr.msra.gmra.mxu2 %v7532_v41  ;;  %v5445_v41 = vld [vmem:[#allocation5 + $0x30] sm:$0xf]  ;;  %v5502_v56 = vor.u32 %v6944_v50, %v5501_v63  ;;  %v6964_v63 = vld [vmem:[#allocation5 + $0x144] sm:$0xf0] }
  0xfa   :  { %1845 = vmatmul.bf16.vlgmr.msra.gmra.mxu3 %v7528_v37  ;;  %v1612_v37 = vpop.f32.mrf.mxu1  ;;  %v5446_v58 = vor.u32 %v6930_v36, %v5445_v41  ;;  %v1548_v44 = vadd.f32 %v7562_v61, %v1535_v40  ;;  %v6926_v61 = vld [vmem:[#allocation5 + $0x14] sm:$0xf0]  ;;  %v5527_v40 = vld [vmem:[#allocation5 + $0xd8] sm:$0xf0]  ;;  %v5589_v41 = vld [vmem:[#allocation5 + $0x150] sm:$0xf] }
  0xfb   :  { %v5430_v18 = vor.u32 %v6926_v61, %v5429_v55  ;;  %v1613_v34 = vadd.f32 %v1612_v37, %v1600_v10  ;;  %v6966_v36 = vld [vmem:[#allocation5 + $0x154] sm:$0xf0]  ;;  %v5447_v55 = vld [vmem:[#allocation5 + $0x38] sm:$0xf0] }
  0xfc   :  { %2249 = vmatpush.bf16.msrb.mxu0 %v5470_v15  ;;  %v7585_v48 = vpop.f32.mrf.mxu2  ;;  %v1601_v53 = vpop.f32.mrf.mxu0  ;;  %v1561_v54 = vadd.f32 %v7564_v62, %v1548_v44  ;;  %v5479_v62 = vld [vmem:[#allocation5 + $0x78] sm:$0xf0]  ;;  %v5546_v15 = vor.u32 %v6953_v8, %v5543_v9  ;;  %v6947_v44 = vld [vmem:[#allocation5 + $0xc4] sm:$0xf]  ;;  %v5590_v45 = vor.u32 %v6966_v36, %v5589_v41 }
  0xfd   :  { %2262 = vmatpush.bf16.msrb.mxu1 %v5534_v24  ;;  %v7587_v49 = vpop.f32.mrf.mxu3  ;;  %v5482_v12 = vor.u32 %v6937_v3, %v5479_v62  ;;  %v6970_v24 = vld [vmem:[#allocation5 + $0x174] sm:$0xf0]  ;;  %v5522_v61 = vor.u32 %v6947_v44, %v5519_v46  ;;  %v6960_v62 = vld [vmem:[#allocation5 + $0x124] sm:$0xf0] }
  0xfe   :  { %v1574_v19 = vadd.f32 %v7566_v16, %v1561_v54  ;;  %v6935_v16 = vld [vmem:[#allocation5 + $0x64] sm:$0xf]  ;;  %v5606_v25 = vor.u32 %v6970_v24, %v5605_v23  ;;  %v5495_v23 = vld [vmem:[#allocation5 + $0x98] sm:$0xf0]  ;;  %v6986_v46 = vld [vmem:[#allocation5 + $0x1f4] sm:$0xf0] }
  0xff   :  { %v5474_v29 = vor.u32 %v6935_v16, %v5471_v14  ;;  %v5498_v43 = vor.u32 %v6941_v21, %v5495_v23  ;;  %v5629_v21 = vld [vmem:[#allocation5 + $0x1a0] sm:$0xf]  ;;  %v6976_v23 = vld [vmem:[#allocation5 + $0x1a4] sm:$0xf0] }
 0x100   :  { %2250 = vmatpush.bf16.msrb.mxu0 %v5462_v26  ;;  %v1850_v27 = vmax.f32 %v1574_v19, 0.0  ;;  %2274 = vmatpush.bf16.msrb.mxu2 %v5606_v25  ;;  %v5423_v25 = vld [vmem:[#allocation5 + $0x8] sm:$0xf0] }
 0x101   :  { %2263 = vmatpush.bf16.msrb.mxu1 %v5526_v20  ;;  %v6933_v20 = vld [vmem:[#allocation5 + $0x54] sm:$0xf] }
 0x102   :  { %v1614_v57 = vpop.f32.mrf.mxu1  ;;  %v7593_v26 = vpack.c.bf16 %v1850_v27, %v1850_v27  ;;  %v5466_v37 = vor.u32 %v6933_v20, %v5463_v31  ;;  %v6925_v27 = vld [vmem:[#allocation5 + $0x14] sm:$0xf]  ;;  %v5549_v20 = vld [vmem:[#allocation5 + $0x100] sm:$0xf]  ;;  %v6956_v31 = vld [vmem:[#allocation5 + $0x104] sm:$0xf0] }
 0x103   :  { %v5573_v57 = vld [vmem:[#allocation5 + $0x130] sm:$0xf] }
 0x104   :  { %2251 = vmatpush.bf16.msrb.mxu0 %v5454_v33  ;;  %v1627_v4 = vpop.f32.mrf.mxu2  ;;  %v6949_v33 = vld [vmem:[#allocation5 + $0xd4] sm:$0xf]  ;;  %2275 = vmatpush.bf16.msrb.mxu2 %v5598_v35 }
 0x105   :  { %2264 = vmatpush.bf16.msrb.mxu1 %v5518_v38  ;;  %v1640_v7 = vpop.f32.mrf.mxu3  ;;  %v1626_v38 = vadd.f32 %v7585_v48, %v1613_v34  ;;  %v6929_v48 = vld [vmem:[#allocation5 + $0x34] sm:$0xf]  ;;  %v5565_v4 = vld [vmem:[#allocation5 + $0x120] sm:$0xf]  ;;  %v6923_v34 = vld [vmem:[#allocation5 + $0x4] sm:$0xf] }
 0x106   :  { %v5450_v19 = vor.u32 %v6929_v48, %v5447_v55  ;;  %v5503_v7 = vld [vmem:[#allocation5 + $0xa8] sm:$0xf0]  ;;  %v5566_v16 = vor.u32 %v6960_v62, %v5565_v4  ;;  %v6969_v35 = vld [vmem:[#allocation5 + $0x174] sm:$0xf]  ;;  %v5426_v41 = vor.u32 %v6923_v34, %v5423_v25  ;;  %v6963_v48 = vld [vmem:[#allocation5 + $0x144] sm:$0xf] }
 0x107   :  { %v1639_v50 = vadd.f32 %v7587_v49, %v1626_v38  ;;  %v6927_v49 = vld [vmem:[#allocation5 + $0x24] sm:$0xf]  ;;  %v5506_v14 = vor.u32 %v6943_v6, %v5503_v7  ;;  %v5550_v38 = vor.u32 %v6956_v31, %v5549_v20  ;;  %v5567_v62 = vld [vmem:[#allocation5 + $0x128] sm:$0xf0]  ;;  %v5621_v31 = vld [vmem:[#allocation5 + $0x190] sm:$0xf] }
 0x108   :  { %2252 = vmatpush.bf16.msrb.mxu0 %v5446_v58  ;;  %v5530_v58 = vor.u32 %v6949_v33, %v5527_v40  ;;  %2276 = vmatpush.bf16.msrb.mxu2 %v5590_v45  ;;  %v5442_v9 = vor.u32 %v6927_v49, %v5439_v1  ;;  %v5607_v40 = vld [vmem:[#allocation5 + $0x178] sm:$0xf0]  ;;  %v5669_v45 = vld [vmem:[#allocation5 + $0x1f0] sm:$0xf]  ;;  %v5645_v49 = vld [vmem:[#allocation5 + $0x1c0] sm:$0xf] }
 0x109   :  { %2265 = vmatpush.bf16.msrb.mxu1 %v5510_v47  ;;  %v5581_v47 = vld [vmem:[#allocation5 + $0x140] sm:$0xf]  ;;  %v6959_v4 = vld [vmem:[#allocation5 + $0x124] sm:$0xf]  ;;  %v5551_v25 = vld [vmem:[#allocation5 + $0x108] sm:$0xf0] }
 0x10a   :  { %v6955_v34 = vld [vmem:[#allocation5 + $0x104] sm:$0xf] }
 0x10c   :  { %2253 = vmatpush.bf16.msrb.mxu0 %v5438_v52  ;;  %v5458_v52 = vor.u32 %v6931_v39, %v5455_v42  ;;  %v5610_v39 = vor.u32 %v6969_v35, %v5607_v40  ;;  %v6967_v42 = vld [vmem:[#allocation5 + $0x164] sm:$0xf]  ;;  %v6972_v35 = vld [vmem:[#allocation5 + $0x184] sm:$0xf0] }
 0x10d   :  { %2266 = vmatpush.bf16.msrb.mxu1 %v5502_v56  ;;  %v5582_v56 = vor.u32 %v6964_v63, %v5581_v47  ;;  %v6965_v47 = vld [vmem:[#allocation5 + $0x154] sm:$0xf]  ;;  %v5670_v63 = vor.u32 %v6986_v46, %v5669_v45 }
 0x10f   :  { %2277 = vmatpush.bf16.msrb.mxu2 %v5582_v56  ;;  %2287 = vmatpush.bf16.msrb.mxu3 %v5670_v63  ;;  %v5583_v56 = vld [vmem:[#allocation5 + $0x148] sm:$0xf0] }
 0x110   :  { %2254 = vmatpush.bf16.msrb.mxu0 %v5430_v18  ;;  %v5511_v18 = vld [vmem:[#allocation5 + $0xb8] sm:$0xf0] }
 0x111   :  { %2267 = vmatpush.bf16.msrb.mxu1 %v5494_v2  ;;  %v5574_v2 = vor.u32 %v6962_v22, %v5573_v57  ;;  %v5514_v3 = vor.u32 %v6945_v60, %v5511_v18  ;;  %v5586_v57 = vor.u32 %v6963_v48, %v5583_v56  ;;  %v5653_v22 = vld [vmem:[#allocation5 + $0x1d0] sm:$0xf]  ;;  %v6961_v60 = vld [vmem:[#allocation5 + $0x134] sm:$0xf]  ;;  %v5647_v56 = vld [vmem:[#allocation5 + $0x1c8] sm:$0xf0] }
 0x113   :  { %2278 = vmatpush.bf16.msrb.mxu2 %v5574_v2 }
 0x114   :  { %2255 = vmatpush.bf16.msrb.mxu0 %v5422_v11  ;;  %v1651_v51 = vpop.f32.mrf.mxu0 }
 0x115   :  { %2268 = vmatpush.bf16.msrb.mxu1 %v5486_v13  ;;  %v1652_v53 = vadd.f32 %v1651_v51, %v1639_v50  ;;  %v1664_v54 = vpop.f32.mrf.mxu1  ;;  %v5591_v50 = vld [vmem:[#allocation5 + $0x158] sm:$0xf0] }
 0x116   :  { %v5594_v51 = vor.u32 %v6965_v47, %v5591_v50  ;;  %v6981_v50 = vld [vmem:[#allocation5 + $0x1d4] sm:$0xf] }
 0x117   :  { %2256 = vmatmul.bf16.vlgmr.msrb.gmra.mxu0 %v7593_v26  ;;  %v1665_v59 = vadd.f32 %v1664_v54, %v1652_v53  ;;  %2279 = vmatpush.bf16.msrb.mxu2 %v5566_v16  ;;  %v5661_v53 = vld [vmem:[#allocation5 + $0x1e0] sm:$0xf]  ;;  %v6984_v54 = vld [vmem:[#allocation5 + $0x1e4] sm:$0xf0]  ;;  %v5559_v16 = vld [vmem:[#allocation5 + $0x118] sm:$0xf0] }
 0x118   :  { %2300 = vmatpush.bf16.msra.mxu0 %v5482_v12  ;;  %v5431_v12 = vld [vmem:[#allocation5 + $0x18] sm:$0xf0] }
 0x119   :  { %2313 = vmatpush.bf16.msra.mxu1 %v5546_v15  ;;  %v1851_v0 = vmax.f32 %v1665_v59, 0.0  ;;  %v5557_v15 = vld [vmem:[#allocation5 + $0x110] sm:$0xf]  ;;  %v5434_v24 = vor.u32 %v6925_v27, %v5431_v12  ;;  %v6982_v59 = vld [vmem:[#allocation5 + $0x1d4] sm:$0xf0] }
 0x11a   :  { %v6978_v27 = vld [vmem:[#allocation5 + $0x1b4] sm:$0xf0] }
 0x11b   :  { %v1855_v5 = vpack.c.bf16 %v1851_v0, %v1851_v0  ;;  %v5575_v0 = vld [vmem:[#allocation5 + $0x138] sm:$0xf0] }
 0x11c   :  { %2301 = vmatpush.bf16.msra.mxu0 %v5474_v29  ;;  %v7598_v8 = vpop.f32.mrf.mxu2  ;;  %v1653_v11 = vpop.f32.mrf.mxu0  ;;  %v5558_v29 = vor.u32 %v6958_v17, %v5557_v15  ;;  %v5578_v2 = vor.u32 %v6961_v60, %v5575_v0 }
 0x11d   :  { %2314 = vmatpush.bf16.msra.mxu1 %v5538_v32  ;;  %v7600_v10 = vpop.f32.mrf.mxu3  ;;  %v1666_v13 = vpop.f32.mrf.mxu1  ;;  %v5487_v32 = vld [vmem:[#allocation5 + $0x88] sm:$0xf0]  ;;  %v5637_v11 = vld [vmem:[#allocation5 + $0x1b0] sm:$0xf] }
 0x11e   :  { %2269 = vmatmul.bf16.vlgmr.msrb.gmra.mxu1 %v1855_v5  ;;  %2280 = vmatpush.bf16.msrb.mxu2 %v5558_v29  ;;  %v6957_v13 = vld [vmem:[#allocation5 + $0x114] sm:$0xf]  ;;  %v5630_v29 = vor.u32 %v6976_v23, %v5629_v21 }
 0x11f   :  { %v5562_v17 = vor.u32 %v6957_v13, %v5559_v16 }
 0x120   :  { %2302 = vmatpush.bf16.msra.mxu0 %v5466_v37  ;;  %v5490_v37 = vor.u32 %v6939_v30, %v5487_v32  ;;  %v5554_v30 = vor.u32 %v6955_v34, %v5551_v25  ;;  %v6974_v32 = vld [vmem:[#allocation5 + $0x194] sm:$0xf0] }
 0x121   :  { %2315 = vmatpush.bf16.msra.mxu1 %v5530_v58  ;;  %v5599_v58 = vld [vmem:[#allocation5 + $0x168] sm:$0xf0] }
 0x122   :  { %2281 = vmatpush.bf16.msrb.mxu2 %v5550_v38  ;;  %v5602_v44 = vor.u32 %v6967_v42, %v5599_v58  ;;  %v5671_v38 = vld [vmem:[#allocation5 + $0x1f8] sm:$0xf0]  ;;  %v6983_v58 = vld [vmem:[#allocation5 + $0x1e4] sm:$0xf] }
 0x124   :  { %2303 = vmatpush.bf16.msra.mxu0 %v5458_v52  ;;  %v1679_v33 = vpop.f32.mrf.mxu2 }
 0x125   :  { %2316 = vmatpush.bf16.msra.mxu1 %v5522_v61  ;;  %v1692_v36 = vpop.f32.mrf.mxu3  ;;  %v5662_v61 = vor.u32 %v6984_v54, %v5661_v53  ;;  %v5613_v33 = vld [vmem:[#allocation5 + $0x180] sm:$0xf] }
 0x126   :  { %2326 = vmatpush.bf16.msra.mxu2 %v5610_v39  ;;  %v5614_v40 = vor.u32 %v6972_v35, %v5613_v33  ;;  %v6985_v36 = vld [vmem:[#allocation5 + $0x1f4] sm:$0xf] }
 0x127   :  { %2288 = vmatpush.bf16.msrb.mxu3 %v5662_v61  ;;  %v6979_v61 = vld [vmem:[#allocation5 + $0x1c4] sm:$0xf] }
 0x128   :  { %2304 = vmatpush.bf16.msra.mxu0 %v5450_v19  ;;  %v5654_v19 = vor.u32 %v6982_v59, %v5653_v22  ;;  %v6977_v22 = vld [vmem:[#allocation5 + $0x1b4] sm:$0xf]  ;;  %v5639_v59 = vld [vmem:[#allocation5 + $0x1b8] sm:$0xf0] }
 0x129   :  { %2317 = vmatpush.bf16.msra.mxu1 %v5514_v3  ;;  %v6980_v3 = vld [vmem:[#allocation5 + $0x1c4] sm:$0xf0]  ;;  %v5642_v60 = vor.u32 %v6977_v22, %v5639_v59  ;;  %v5775_v59 = vld [vmem:[#allocation7 + $0xd0] sm:$0xf0] }
 0x12a   :  { %2327 = vmatpush.bf16.msra.mxu2 %v5602_v44  ;;  %v5663_v44 = vld [vmem:[#allocation5 + $0x1e8] sm:$0xf0] }
 0x12b   :  { %2289 = vmatpush.bf16.msrb.mxu3 %v5654_v19  ;;  %v5666_v46 = vor.u32 %v6983_v58, %v5663_v44  ;;  %v5631_v19 = vld [vmem:[#allocation5 + $0x1a8] sm:$0xf0] }
 0x12c   :  { %2305 = vmatpush.bf16.msra.mxu0 %v5442_v9  ;;  %v5570_v9 = vor.u32 %v6959_v4, %v5567_v62  ;;  %v336_v4 = vperm.slane %v7573_v28, 3 }
 0x12d   :  { %2318 = vmatpush.bf16.msra.mxu1 %v5506_v14  ;;  %v5638_v14 = vor.u32 %v6978_v27, %v5637_v11 }
 0x12e   :  { %2328 = vmatpush.bf16.msra.mxu2 %v5594_v51  ;;  %v5655_v51 = vld [vmem:[#allocation5 + $0x1d8] sm:$0xf0] }
 0x12f   :  { %v5658_v53 = vor.u32 %v6981_v50, %v5655_v51  ;;  %v5791_v50 = vld [vmem:[#allocation7 + $0xf0] sm:$0xf0]  ;;  %v5797_v51 = vld [vmem:[#allocation7 + $0xe8] sm:$0xf] }
 0x130   :  { %2306 = vmatpush.bf16.msra.mxu0 %v5434_v24 }
 0x131   :  { %2319 = vmatpush.bf16.msra.mxu1 %v5498_v43 }
 0x132   :  { %2329 = vmatpush.bf16.msra.mxu2 %v5586_v57  ;;  %v5650_v57 = vor.u32 %v6979_v61, %v5647_v56  ;;  %v5773_v56 = vld [vmem:[#allocation7 + $0xc0] sm:$0xf] }
 0x134   :  { %2307 = vmatpush.bf16.msra.mxu0 %v5426_v41  ;;  %v1703_v52 = vpop.f32.mrf.mxu0 }
 0x135   :  { %2320 = vmatpush.bf16.msra.mxu1 %v5490_v37  ;;  %v1716_v55 = vpop.f32.mrf.mxu1  ;;  %v5674_v37 = vor.u32 %v6985_v36, %v5671_v38 }
 0x136   :  { %2330 = vmatpush.bf16.msra.mxu2 %v5578_v2  ;;  %v6973_v2 = vld [vmem:[#allocation5 + $0x194] sm:$0xf] }
 0x137   :  { %2308 = vmatmul.bf16.vlgmr.msra.gmra.mxu0 %v7593_v26  ;;  %v335_v26 = vperm.slane %v7573_v28, 2 }
 0x138   :  { %2321 = vmatmul.bf16.vlgmr.msra.gmra.mxu1 %v1855_v5  ;;  %v5646_v5 = vor.u32 %v6980_v3, %v5645_v49  ;;  %v5623_v3 = vld [vmem:[#allocation5 + $0x198] sm:$0xf0] }
 0x139   :  { %v1678_v6 = vadd.f32 %v7598_v8, %v335_v26  ;;  %v5626_v62 = vor.u32 %v6973_v2, %v5623_v3  ;;  %v5757_v2 = vld [vmem:[#allocation7 + $0xa0] sm:$0xf] }
 0x13a   :  { %2290 = vmatpush.bf16.msrb.mxu3 %v5646_v5  ;;  %2331 = vmatpush.bf16.msra.mxu2 %v5570_v9  ;;  %v6971_v5 = vld [vmem:[#allocation5 + $0x184] sm:$0xf] }
 0x13b   :  { %v1691_v15 = vadd.f32 %v7600_v10, %v1678_v6  ;;  %v5622_v10 = vor.u32 %v6974_v32, %v5621_v31  ;;  %v5615_v6 = vld [vmem:[#allocation5 + $0x188] sm:$0xf0] }
 0x13c   :  { %v1729_v18 = vpop.f32.mrf.mxu2  ;;  %v1705_v7 = vpop.f32.mrf.mxu0  ;;  %v5618_v9 = vor.u32 %v6971_v5, %v5615_v6  ;;  %v7007_v5 = vld [vmem:[#allocation7 + $0xa4] sm:$0xf]  ;;  %v5759_v6 = vld [vmem:[#allocation7 + $0xb0] sm:$0xf0] }
 0x13d   :  { %v1742_v1 = vpop.f32.mrf.mxu3  ;;  %v1718_v12 = vpop.f32.mrf.mxu1  ;;  %v1704_v43 = vadd.f32 %v1703_v52, %v1691_v15 }
 0x13e   :  { %2291 = vmatpush.bf16.msrb.mxu3 %v5638_v14  ;;  %2332 = vmatpush.bf16.msra.mxu2 %v5562_v17 }
 0x13f   :  { %v1717_v20 = vadd.f32 %v1716_v55, %v1704_v43 }
 0x141   :  { %v1730_v41 = vadd.f32 %v1729_v18, %v1717_v20  ;;  %v6975_v18 = vld [vmem:[#allocation5 + $0x1a4] sm:$0xf] }
 0x142   :  { %2292 = vmatpush.bf16.msrb.mxu3 %v5630_v29  ;;  %2333 = vmatpush.bf16.msra.mxu2 %v5554_v30  ;;  %v1922_v30 = vld [vmem:[%s7724_s5] sm:$0x3] }
 0x143   :  { %v1743_v39 = vadd.f32 %v1742_v1, %v1730_v41  ;;  %v5634_v1 = vor.u32 %v6975_v18, %v5631_v19  ;;  %v1924_v31 = vperm.slane %v1922_v30, 0  ;;  %v7014_v18 = vld [vmem:[#allocation7 + $0xd4] sm:$0xf0] }
 0x144   :  { %v1731_v24 = vpop.f32.mrf.mxu2 }
 0x145   :  { %v1744_v8 = vpop.f32.mrf.mxu3 }
 0x146   :  { %2293 = vmatpush.bf16.msrb.mxu3 %v5622_v10 }
 0x14a   :  { %2294 = vmatpush.bf16.msrb.mxu3 %v5614_v40  ;;  %v1925_v40 = vperm.slane %v1922_v30, 1 }
 0x14e   :  { %2339 = vmatpush.bf16.msra.mxu3 %v5674_v37 }
 0x152   :  { %2340 = vmatpush.bf16.msra.mxu3 %v5666_v46  ;;  %v7017_v46 = vld [vmem:[#allocation7 + $0xec] sm:$0xf0] }
 0x154   :  { %v1755_v42 = vpop.f32.mrf.mxu0 }
 0x155   :  { %v1756_v45 = vadd.f32 %v1755_v42, %v1743_v39  ;;  %v1768_v47 = vpop.f32.mrf.mxu1 }
 0x156   :  { %2341 = vmatpush.bf16.msra.mxu3 %v5658_v53  ;;  %v1769_v7 = vadd.f32 %v1768_v47, %v336_v4  ;;  %v7015_v47 = vld [vmem:[#allocation7 + $0xe4] sm:$0xf] }
 0x157   :  { %v1852_v63 = vmax.f32 %v1756_v45, 0.0  ;;  %v5789_v45 = vld [vmem:[#allocation7 + $0xe0] sm:$0xf]  ;;  %v5794_v53 = vor.u32 %v7015_v47, %v5791_v50  ;;  %v6997_v47 = vld [vmem:[#allocation7 + $0x4c] sm:$0xf0] }
 0x158   :  { %v6995_v50 = vld [vmem:[#allocation7 + $0x44] sm:$0xf] }
 0x159   :  { %v1856_v52 = vpack.c.bf16 %v1852_v63, %v1852_v63  ;;  %v5790_v63 = vor.u32 %v7017_v46, %v5789_v45  ;;  %2574 = vmatpush.bf16.msrb.mxu1 %v5794_v53  ;;  %v5709_v46 = vld [vmem:[#allocation7 + $0x40] sm:$0xf] }
 0x15a   :  { %2342 = vmatpush.bf16.msra.mxu3 %v5650_v57  ;;  %v7013_v57 = vld [vmem:[#allocation7 + $0xcc] sm:$0xf0] }
 0x15b   :  { %2282 = vmatmul.bf16.vlgmr.msrb.gmra.mxu2 %v1856_v52  ;;  %2561 = vmatpush.bf16.msrb.mxu0 %v5790_v63  ;;  %v5774_v22 = vor.u32 %v7013_v57, %v5773_v56  ;;  %v5710_v63 = vor.u32 %v6997_v47, %v5709_v46  ;;  %v5693_v57 = vld [vmem:[#allocation7 + $0x20] sm:$0xf]  ;;  %v6421_v46 = vld [vmem:[#allocation8 + $0x4d0] sm:$0xf]  ;;  %v7176_v47 = vld [vmem:[#allocation8 + $0x4e8] sm:$0xf0] }
 0x15c   :  { %v1781_v54 = vpop.f32.mrf.mxu2  ;;  %v1757_v55 = vpop.f32.mrf.mxu0 }
 0x15d   :  { %v1794_v48 = vpop.f32.mrf.mxu3  ;;  %v1770_v26 = vpop.f32.mrf.mxu1  ;;  %v1782_v11 = vadd.f32 %v1781_v54, %v1769_v7  ;;  %v5799_v55 = vld [vmem:[#allocation7 + $0xf8] sm:$0xf0] }
 0x15e   :  { %2343 = vmatpush.bf16.msra.mxu3 %v5642_v60  ;;  %v7011_v26 = vld [vmem:[#allocation7 + $0xc4] sm:$0xf]  ;;  %v5781_v60 = vld [vmem:[#allocation7 + $0xc8] sm:$0xf] }
 0x15f   :  { %v1795_v27 = vadd.f32 %v1794_v48, %v1782_v11  ;;  %v7016_v48 = vld [vmem:[#allocation7 + $0xec] sm:$0xf]  ;;  %v5778_v19 = vor.u32 %v7011_v26, %v5775_v59  ;;  %2562 = vmatpush.bf16.msrb.mxu0 %v5774_v22  ;;  %v5765_v11 = vld [vmem:[#allocation7 + $0xa8] sm:$0xf]  ;;  %v6993_v26 = vld [vmem:[#allocation7 + $0x2c] sm:$0xf0] }
 0x160   :  { %v5802_v61 = vor.u32 %v7016_v48, %v5799_v55  ;;  %v6996_v48 = vld [vmem:[#allocation7 + $0x4c] sm:$0xf]  ;;  %v5719_v55 = vld [vmem:[#allocation7 + $0x58] sm:$0xf0]  ;;  %v6991_v22 = vld [vmem:[#allocation7 + $0x24] sm:$0xf]  ;;  %v5694_v59 = vor.u32 %v6993_v26, %v5693_v57 }
 0x161   :  { %2575 = vmatpush.bf16.msrb.mxu1 %v5778_v19  ;;  %v5722_v56 = vor.u32 %v6996_v48, %v5719_v55  ;;  %v6994_v19 = vld [vmem:[#allocation7 + $0x34] sm:$0xf0]  ;;  %v7050_v48 = vld [vmem:[#allocation8 + $0xf8] sm:$0xf0]  ;;  %v6141_v26 = vld [vmem:[#allocation8 + $0x2a0] sm:$0xf] }
 0x162   :  { %2344 = vmatpush.bf16.msra.mxu3 %v5634_v1  ;;  %v5783_v1 = vld [vmem:[#allocation7 + $0xd8] sm:$0xf0]  ;;  %v6617_v57 = vld [vmem:[#allocation8 + $0x658] sm:$0xf] }
 0x164   :  { %v1783_v0 = vpop.f32.mrf.mxu2 }
 0x165   :  { %v1796_v49 = vpop.f32.mrf.mxu3  ;;  %v5782_v0 = vor.u32 %v7014_v18, %v5781_v60  ;;  %v5695_v60 = vld [vmem:[#allocation7 + $0x30] sm:$0xf0]  ;;  %v5701_v18 = vld [vmem:[#allocation7 + $0x28] sm:$0xf] }
 0x166   :  { %2345 = vmatpush.bf16.msra.mxu3 %v5626_v62  ;;  %v7012_v49 = vld [vmem:[#allocation7 + $0xcc] sm:$0xf]  ;;  %v7009_v62 = vld [vmem:[#allocation7 + $0xac] sm:$0xf0] }
 0x167   :  { %v5786_v4 = vor.u32 %v7012_v49, %v5783_v1  ;;  %v5758_v7 = vor.u32 %v7009_v62, %v5757_v2  ;;  %v5702_v49 = vor.u32 %v6994_v19, %v5701_v18  ;;  %v6992_v1 = vld [vmem:[#allocation7 + $0x2c] sm:$0xf]  ;;  %v5703_v2 = vld [vmem:[#allocation7 + $0x38] sm:$0xf0]  ;;  %v5677_v62 = vld [vmem:[#allocation7] sm:$0xf] }
 0x169   :  { %2563 = vmatpush.bf16.msrb.mxu0 %v5758_v7 }
 0x16a   :  { %2346 = vmatpush.bf16.msra.mxu3 %v5618_v9  ;;  %v5762_v9 = vor.u32 %v7007_v5, %v5759_v6  ;;  %v6989_v5 = vld [vmem:[#allocation7 + $0xc] sm:$0xf0]  ;;  %v6987_v6 = vld [vmem:[#allocation7 + $0x4] sm:$0xf] }
 0x16b   :  { %2334 = vmatmul.bf16.vlgmr.msra.gmra.mxu2 %v1856_v52  ;;  %v7018_v52 = vld [vmem:[#allocation7 + $0xf4] sm:$0xf0] }
 0x16c   :  { %v5798_v54 = vor.u32 %v7018_v52, %v5797_v51  ;;  %2576 = vmatpush.bf16.msrb.mxu1 %v5762_v9  ;;  %v5711_v51 = vld [vmem:[#allocation7 + $0x50] sm:$0xf0]  ;;  %v5717_v52 = vld [vmem:[#allocation7 + $0x48] sm:$0xf]  ;;  %v5678_v9 = vor.u32 %v6989_v5, %v5677_v62  ;;  %v7218_v62 = vld [vmem:[#allocation8 + $0x638] sm:$0xf0] }
 0x16d   :  { %v5714_v53 = vor.u32 %v6995_v50, %v5711_v51  ;;  %v6645_v50 = vld [vmem:[#allocation8 + $0x690] sm:$0xf]  ;;  %v7232_v51 = vld [vmem:[#allocation8 + $0x6a8] sm:$0xf0] }
 0x16e   :  { %2587 = vmatpush.bf16.msrb.mxu2 %v5798_v54  ;;  %v6998_v54 = vld [vmem:[#allocation7 + $0x54] sm:$0xf0] }
 0x172   :  { %2588 = vmatpush.bf16.msrb.mxu2 %v5782_v0  ;;  %v5698_v0 = vor.u32 %v6991_v22, %v5695_v60  ;;  %v7106_v22 = vld [vmem:[#allocation8 + $0x2b8] sm:$0xf0] }
 0x174   :  { %v1807_v12 = vpop.f32.mrf.mxu0 }
 0x175   :  { %v1820_v13 = vpop.f32.mrf.mxu1  ;;  %v1808_v16 = vadd.f32 %v1807_v12, %v1795_v27  ;;  %v7010_v27 = vld [vmem:[#allocation7 + $0xb4] sm:$0xf0]  ;;  %v7008_v12 = vld [vmem:[#allocation7 + $0xac] sm:$0xf] }
 0x177   :  { %v1821_v14 = vadd.f32 %v1820_v13, %v1808_v16  ;;  %v5766_v13 = vor.u32 %v7010_v27, %v5765_v11  ;;  %v5767_v16 = vld [vmem:[#allocation7 + $0xb8] sm:$0xf0]  ;;  %v5679_v11 = vld [vmem:[#allocation7 + $0x10] sm:$0xf0]  ;;  %v5685_v27 = vld [vmem:[#allocation7 + $0x8] sm:$0xf] }
 0x179   :  { %2589 = vmatpush.bf16.msrb.mxu2 %v5766_v13 }
 0x17c   :  { %v1833_v15 = vpop.f32.mrf.mxu2  ;;  %v1809_v23 = vpop.f32.mrf.mxu0 }
 0x17d   :  { %v1834_v17 = vadd.f32 %v1833_v15, %v1821_v14  ;;  %v1846_v21 = vpop.f32.mrf.mxu3  ;;  %v1822_v28 = vpop.f32.mrf.mxu1  ;;  %v5770_v14 = vor.u32 %v7008_v12, %v5767_v16  ;;  %v5741_v15 = vld [vmem:[#allocation7 + $0x80] sm:$0xf]  ;;  %v6990_v12 = vld [vmem:[#allocation7 + $0x14] sm:$0xf0]  ;;  %v5682_v16 = vor.u32 %v6987_v6, %v5679_v11  ;;  %v6142_v6 = vor.u32 %v7106_v22, %v6141_v26  ;;  %v6113_v11 = vld [vmem:[#allocation8 + $0x268] sm:$0xf] }
 0x17e   :  { %v5743_v28 = vld [vmem:[#allocation7 + $0x90] sm:$0xf0]  ;;  %v6227_v26 = vld [vmem:[#allocation8 + $0x364] sm:$0xf0] }
 0x17f   :  { %v1847_v24 = vadd.f32 %v1846_v21, %v1834_v17  ;;  %v7005_v17 = vld [vmem:[#allocation7 + $0x8c] sm:$0xf0]  ;;  %v7003_v21 = vld [vmem:[#allocation7 + $0x84] sm:$0xf] }
 0x180   :  { %v5742_v23 = vor.u32 %v7005_v17, %v5741_v15  ;;  %v6988_v15 = vld [vmem:[#allocation7 + $0xc] sm:$0xf]  ;;  %v5687_v17 = vld [vmem:[#allocation7 + $0x18] sm:$0xf0] }
 0x181   :  { %v1853_v34 = vmax.f32 %v1847_v24, 0.0  ;;  %v5749_v24 = vld [vmem:[#allocation7 + $0x88] sm:$0xf] }
 0x182   :  { %2564 = vmatpush.bf16.msrb.mxu0 %v5742_v23  ;;  %v5690_v23 = vor.u32 %v6988_v15, %v5687_v17  ;;  %v6561_v15 = vld [vmem:[#allocation8 + $0x5e8] sm:$0xf]  ;;  %v7211_v17 = vld [vmem:[#allocation8 + $0x600] sm:$0xf0] }
 0x183   :  { %v1857_v25 = vpack.c.bf16 %v1853_v34, %v1853_v34  ;;  %v7006_v34 = vld [vmem:[#allocation7 + $0x94] sm:$0xf0] }
 0x184   :  { %v1835_v8 = vpop.f32.mrf.mxu2 }
 0x185   :  { %v1848_v29 = vpop.f32.mrf.mxu3  ;;  %2295 = vmatmul.bf16.vlgmr.msrb.gmra.mxu3 %v1857_v25  ;;  %v5750_v8 = vor.u32 %v7006_v34, %v5749_v24  ;;  %v7127_v34 = vld [vmem:[#allocation8 + $0x360] sm:$0xf0] }
 0x186   :  { %2600 = vmatpush.bf16.msrb.mxu3 %v5802_v61  ;;  %v7004_v29 = vld [vmem:[#allocation7 + $0x8c] sm:$0xf]  ;;  %v5718_v61 = vor.u32 %v6998_v54, %v5717_v52  ;;  %v5917_v54 = vld [vmem:[#allocation8 + $0xe0] sm:$0xf] }
 0x187   :  { %2590 = vmatpush.bf16.msrb.mxu2 %v5750_v8  ;;  %v7064_v8 = vld [vmem:[#allocation8 + $0x168] sm:$0xf0] }
 0x18a   :  { %2601 = vmatpush.bf16.msrb.mxu3 %v5786_v4  ;;  %v5706_v4 = vor.u32 %v6992_v1, %v5703_v2  ;;  %v5918_v1 = vor.u32 %v7050_v48, %v5917_v54  ;;  %v7162_v2 = vld [vmem:[#allocation8 + $0x478] sm:$0xf0]  ;;  %v6029_v48 = vld [vmem:[#allocation8 + $0x1c0] sm:$0xf] }
 0x18e   :  { %2602 = vmatpush.bf16.msrb.mxu3 %v5770_v14  ;;  %v5686_v14 = vor.u32 %v6990_v12, %v5685_v27  ;;  %v7099_v27 = vld [vmem:[#allocation8 + $0x280] sm:$0xf0] }
 0x194   :  { %v2257_v43 = vpop.f32.mrf.mxu0 }
 0x195   :  { %2347 = vmatmul.bf16.vlgmr.msra.gmra.mxu3 %v1857_v25  ;;  %v2258_v32 = vadd.f32 %v2257_v43, %v1924_v31  ;;  %v5746_v25 = vor.u32 %v7003_v21, %v5743_v28  ;;  %v5751_v43 = vld [vmem:[#allocation7 + $0x98] sm:$0xf0]  ;;  %v5725_v31 = vld [vmem:[#allocation7 + $0x60] sm:$0xf]  ;;  %v6225_v28 = vld [vmem:[#allocation8 + $0x348] sm:$0xf] }
 0x197   :  { %2577 = vmatpush.bf16.msrb.mxu1 %v5746_v25  ;;  %v5973_v25 = vld [vmem:[#allocation8 + $0x150] sm:$0xf] }
 0x19b   :  { %v2270_v33 = vpop.f32.mrf.mxu1 }
 0x19c   :  { %v2259_v20 = vpop.f32.mrf.mxu0  ;;  %v7610_v10 = vadd.f32 %v2270_v33, %v2258_v32  ;;  %v7001_v32 = vld [vmem:[#allocation7 + $0x6c] sm:$0xf0]  ;;  %v6999_v33 = vld [vmem:[#allocation7 + $0x64] sm:$0xf] }
 0x19d   :  { %v5754_v20 = vor.u32 %v7004_v29, %v5751_v43  ;;  %v6226_v29 = vor.u32 %v7127_v34, %v6225_v28  ;;  %v6197_v43 = vld [vmem:[#allocation8 + $0x310] sm:$0xf]  ;;  %v7036_v28 = vld [vmem:[#allocation8 + $0x88] sm:$0xf0] }
 0x19e   :  { %v7092_v34 = vld [vmem:[#allocation8 + $0x248] sm:$0xf0] }
 0x19f   :  { %2603 = vmatpush.bf16.msrb.mxu3 %v5754_v20  ;;  %v6449_v20 = vld [vmem:[#allocation8 + $0x508] sm:$0xf] }
 0x1a3   :  { %v2272_v35 = vpop.f32.mrf.mxu1 }
 0x1a4   :  { %v5726_v35 = vor.u32 %v7001_v32, %v5725_v31  ;;  %v5974_v32 = vor.u32 %v7064_v8, %v5973_v25  ;;  %v6562_v8 = vor.u32 %v7211_v17, %v6561_v15  ;;  %v7173_v15 = vld [vmem:[#allocation8 + $0x4d4] sm:$0xf]  ;;  %v6423_v17 = vld [vmem:[#allocation8 + $0x4ec] sm:$0xf0] }
 0x1a6   :  { %2565 = vmatpush.bf16.msrb.mxu0 %v5726_v35  ;;  %v6673_v35 = vld [vmem:[#allocation8 + $0x6c8] sm:$0xf] }
 0x1aa   :  { %2566 = vmatpush.bf16.msrb.mxu0 %v5710_v63  ;;  %v6422_v63 = vor.u32 %v7176_v47, %v6421_v46  ;;  %v7141_v46 = vld [vmem:[#allocation8 + $0x3d0] sm:$0xf0]  ;;  %v6505_v47 = vld [vmem:[#allocation8 + $0x578] sm:$0xf] }
 0x1ae   :  { %2567 = vmatpush.bf16.msrb.mxu0 %v5694_v59  ;;  %v7225_v59 = vld [vmem:[#allocation8 + $0x670] sm:$0xf0] }
 0x1af   :  { %v6618_v19 = vor.u32 %v7225_v59, %v6617_v57  ;;  %v7124_v57 = vld [vmem:[#allocation8 + $0x34c] sm:$0xf] }
 0x1b2   :  { %2568 = vmatpush.bf16.msrb.mxu0 %v5678_v9  ;;  %v7043_v9 = vld [vmem:[#allocation8 + $0xc0] sm:$0xf0] }
 0x1b4   :  { %v2309_v41 = vpop.f32.mrf.mxu0 }
 0x1b5   :  { %v2310_v36 = vadd.f32 %v2309_v41, %v1925_v40  ;;  %v2322_v38 = vpop.f32.mrf.mxu1  ;;  %v5727_v40 = vld [vmem:[#allocation7 + $0x70] sm:$0xf0]  ;;  %v5733_v41 = vld [vmem:[#allocation7 + $0x68] sm:$0xf] }
 0x1b7   :  { %v7612_v37 = vadd.f32 %v2322_v38, %v2310_v36  ;;  %v7002_v36 = vld [vmem:[#allocation7 + $0x74] sm:$0xf0]  ;;  %v5730_v38 = vor.u32 %v6999_v33, %v5727_v40  ;;  %v7183_v33 = vld [vmem:[#allocation8 + $0x520] sm:$0xf0] }
 0x1b8   :  { %v7239_v40 = vld [vmem:[#allocation8 + $0x6e0] sm:$0xf0] }
 0x1b9   :  { %2578 = vmatpush.bf16.msrb.mxu1 %v5730_v38  ;;  %v6674_v38 = vor.u32 %v7239_v40, %v6673_v35  ;;  %v5833_v35 = vld [vmem:[#allocation8 + $0x38] sm:$0xf]  ;;  %v7029_v40 = vld [vmem:[#allocation8 + $0x50] sm:$0xf0] }
 0x1bc   :  { %v2311_v39 = vpop.f32.mrf.mxu0 }
 0x1bd   :  { %v2324_v42 = vpop.f32.mrf.mxu1  ;;  %v5734_v39 = vor.u32 %v7002_v36, %v5733_v41  ;;  %2579 = vmatpush.bf16.msrb.mxu1 %v5714_v53  ;;  %v6450_v36 = vor.u32 %v7183_v33, %v6449_v20  ;;  %v6646_v53 = vor.u32 %v7232_v51, %v6645_v50  ;;  %v7148_v20 = vld [vmem:[#allocation8 + $0x408] sm:$0xf0] }
 0x1be   :  { %v7000_v42 = vld [vmem:[#allocation7 + $0x6c] sm:$0xf] }
 0x1bf   :  { %2591 = vmatpush.bf16.msrb.mxu2 %v5734_v39  ;;  %v5945_v39 = vld [vmem:[#allocation8 + $0x118] sm:$0xf] }
 0x1c1   :  { %2580 = vmatpush.bf16.msrb.mxu1 %v5698_v0  ;;  %v6365_v0 = vld [vmem:[#allocation8 + $0x460] sm:$0xf] }
 0x1c3   :  { %2592 = vmatpush.bf16.msrb.mxu2 %v5718_v61  ;;  %v6393_v61 = vld [vmem:[#allocation8 + $0x498] sm:$0xf] }
 0x1c5   :  { %2581 = vmatpush.bf16.msrb.mxu1 %v5682_v16 }
 0x1c7   :  { %2593 = vmatpush.bf16.msrb.mxu2 %v5702_v49 }
 0x1c9   :  { %4058 = vmatpush.bf16.msra.mxu1 %v6226_v29  ;;  %v6309_v29 = vld [vmem:[#allocation8 + $0x3f0] sm:$0xf] }
 0x1cb   :  { %2594 = vmatpush.bf16.msrb.mxu2 %v5686_v14  ;;  %v7155_v14 = vld [vmem:[#allocation8 + $0x440] sm:$0xf0] }
 0x1cf   :  { %4071 = vmatpush.bf16.msra.mxu2 %v6450_v36  ;;  %v7085_v36 = vld [vmem:[#allocation8 + $0x210] sm:$0xf0] }
 0x1d3   :  { %4072 = vmatpush.bf16.msra.mxu2 %v6422_v63  ;;  %v7197_v63 = vld [vmem:[#allocation8 + $0x590] sm:$0xf0] }
 0x1d4   :  { %v6506_v59 = vor.u32 %v7197_v63, %v6505_v47  ;;  %v6591_v47 = vld [vmem:[#allocation8 + $0x63c] sm:$0xf0] }
 0x1de   :  { %v7614_v58 = vpop.f32.mrf.mxu2 }
 0x1df   :  { %v2284_v7 = vadd.f32 %v7614_v58, %v7610_v10  ;;  %v6001_v10 = vld [vmem:[#allocation8 + $0x188] sm:$0xf]  ;;  %v7071_v58 = vld [vmem:[#allocation8 + $0x1a0] sm:$0xf0] }
 0x1e0   :  { %v6002_v24 = vor.u32 %v7071_v58, %v6001_v10  ;;  %v6114_v10 = vor.u32 %v7099_v27, %v6113_v11  ;;  %v5861_v58 = vld [vmem:[#allocation8 + $0x70] sm:$0xf]  ;;  %v6230_v11 = vor.u32 %v7124_v57, %v6227_v26  ;;  %v7061_v27 = vld [vmem:[#allocation8 + $0x154] sm:$0xf] }
 0x1e1   :  { %v7033_v57 = vld [vmem:[#allocation8 + $0x74] sm:$0xf]  ;;  %v5863_v26 = vld [vmem:[#allocation8 + $0x8c] sm:$0xf0] }
 0x1e2   :  { %4045 = vmatpush.bf16.msra.mxu0 %v6002_v24  ;;  %v6085_v24 = vld [vmem:[#allocation8 + $0x230] sm:$0xf] }
 0x1e3   :  { %v6086_v33 = vor.u32 %v7092_v34, %v6085_v24  ;;  %v7054_v24 = vld [vmem:[#allocation8 + $0x11c] sm:$0xf]  ;;  %v5947_v34 = vld [vmem:[#allocation8 + $0x134] sm:$0xf0] }
 0x1e6   :  { %v2285_v44 = vpop.f32.mrf.mxu2  ;;  %4046 = vmatpush.bf16.msra.mxu0 %v5974_v32  ;;  %v7204_v32 = vld [vmem:[#allocation8 + $0x5c8] sm:$0xf0] }
 0x1e7   :  { %v5735_v44 = vld [vmem:[#allocation7 + $0x78] sm:$0xf0] }
 0x1e8   :  { %v5738_v45 = vor.u32 %v7000_v42, %v5735_v44  ;;  %v7057_v42 = vld [vmem:[#allocation8 + $0x130] sm:$0xf0]  ;;  %v6169_v44 = vld [vmem:[#allocation8 + $0x2d8] sm:$0xf] }
 0x1e9   :  { %v5946_v52 = vor.u32 %v7057_v42, %v5945_v39  ;;  %v6310_v39 = vor.u32 %v7148_v20, %v6309_v29  ;;  %v6426_v29 = vor.u32 %v7173_v15, %v6423_v17  ;;  %v6395_v20 = vld [vmem:[#allocation8 + $0x4b4] sm:$0xf0]  ;;  %v7075_v15 = vld [vmem:[#allocation8 + $0x1c4] sm:$0xf] }
 0x1ea   :  { %2604 = vmatpush.bf16.msrb.mxu3 %v5738_v45  ;;  %v7113_v45 = vld [vmem:[#allocation8 + $0x2f0] sm:$0xf0] }
 0x1eb   :  { %v6170_v55 = vor.u32 %v7113_v45, %v6169_v44  ;;  %4047 = vmatpush.bf16.msra.mxu0 %v5946_v52  ;;  %v6281_v44 = vld [vmem:[#allocation8 + $0x3b8] sm:$0xf]  ;;  %v5834_v45 = vor.u32 %v7029_v40, %v5833_v35  ;;  %v5805_v52 = vld [vmem:[#allocation8] sm:$0xf]  ;;  %v7047_v40 = vld [vmem:[#allocation8 + $0xe4] sm:$0xf] }
 0x1ec   :  { %v6282_v22 = vor.u32 %v7141_v46, %v6281_v44  ;;  %v7159_v44 = vld [vmem:[#allocation8 + $0x464] sm:$0xf] }
 0x1ed   :  { %v7215_v46 = vld [vmem:[#allocation8 + $0x624] sm:$0xf] }
 0x1ee   :  { %v7616_v3 = vpop.f32.mrf.mxu2  ;;  %2605 = vmatpush.bf16.msrb.mxu3 %v5722_v56  ;;  %v7169_v56 = vld [vmem:[#allocation8 + $0x4b0] sm:$0xf0] }
 0x1ef   :  { %v2336_v60 = vadd.f32 %v7616_v3, %v7612_v37  ;;  %v6394_v18 = vor.u32 %v7169_v56, %v6393_v61  ;;  %v6366_v37 = vor.u32 %v7162_v2, %v6365_v0  ;;  %4048 = vmatpush.bf16.msra.mxu0 %v5918_v1  ;;  %v7068_v61 = vld [vmem:[#allocation8 + $0x18c] sm:$0xf]  ;;  %v6003_v56 = vld [vmem:[#allocation8 + $0x1a4] sm:$0xf0]  ;;  %v6477_v0 = vld [vmem:[#allocation8 + $0x540] sm:$0xf] }
 0x1f0   :  { %v7180_v1 = vld [vmem:[#allocation8 + $0x50c] sm:$0xf]  ;;  %v6451_v2 = vld [vmem:[#allocation8 + $0x524] sm:$0xf0] }
 0x1f1   :  { %4073 = vmatpush.bf16.msra.mxu2 %v6394_v18  ;;  %v6253_v18 = vld [vmem:[#allocation8 + $0x380] sm:$0xf] }
 0x1f2   :  { %2606 = vmatpush.bf16.msrb.mxu3 %v5706_v4  ;;  %v6589_v4 = vld [vmem:[#allocation8 + $0x620] sm:$0xf] }
 0x1f3   :  { %v6590_v3 = vor.u32 %v7218_v62, %v6589_v4 }
 0x1f5   :  { %4074 = vmatpush.bf16.msra.mxu2 %v6366_v37  ;;  %v6199_v37 = vld [vmem:[#allocation8 + $0x32c] sm:$0xf0] }
 0x1f6   :  { %v2337_v30 = vpop.f32.mrf.mxu2  ;;  %2607 = vmatpush.bf16.msrb.mxu3 %v5690_v23 }
 0x1f7   :  { %v7120_v30 = vld [vmem:[#allocation8 + $0x328] sm:$0xf0] }
 0x1f8   :  { %v6198_v41 = vor.u32 %v7120_v30, %v6197_v43  ;;  %v5862_v30 = vor.u32 %v7036_v28, %v5861_v58 }
 0x1fa   :  { %4084 = vmatpush.bf16.msra.mxu3 %v6674_v38  ;;  %4059 = vmatpush.bf16.msra.mxu1 %v6198_v41  ;;  %v6057_v41 = vld [vmem:[#allocation8 + $0x1f8] sm:$0xf]  ;;  %v2355_v38 = vld [vmem:[%s7720_s1] sm:$0xff] }
 0x1fb   :  { %v6058_v51 = vor.u32 %v7085_v36, %v6057_v41  ;;  %v5919_v41 = vld [vmem:[#allocation8 + $0xfc] sm:$0xf0]  ;;  %v7103_v36 = vld [vmem:[#allocation8 + $0x2a4] sm:$0xf] }
 0x1fc   :  { %v5922_v63 = vor.u32 %v7047_v40, %v5919_v41 }
 0x1fe   :  { %4085 = vmatpush.bf16.msra.mxu3 %v6646_v53  ;;  %4060 = vmatpush.bf16.msra.mxu1 %v6170_v55  ;;  %v7022_v53 = vld [vmem:[#allocation8 + $0x18] sm:$0xf0] }
 0x1ff   :  { %v7078_v55 = vld [vmem:[#allocation8 + $0x1d8] sm:$0xf0]  ;;  %v5806_v62 = vor.u32 %v7022_v53, %v5805_v52  ;;  %v5891_v52 = vld [vmem:[#allocation8 + $0xc4] sm:$0xf0]  ;;  %v7096_v53 = vld [vmem:[#allocation8 + $0x26c] sm:$0xf] }
 0x202   :  { %4086 = vmatpush.bf16.msra.mxu3 %v6618_v19  ;;  %4061 = vmatpush.bf16.msra.mxu1 %v6142_v6  ;;  %v7134_v19 = vld [vmem:[#allocation8 + $0x398] sm:$0xf0]  ;;  %v7236_v6 = vld [vmem:[#allocation8 + $0x6cc] sm:$0xf] }
 0x206   :  { %4087 = vmatpush.bf16.msra.mxu3 %v6590_v3  ;;  %4062 = vmatpush.bf16.msra.mxu1 %v6114_v10  ;;  %v6254_v3 = vor.u32 %v7134_v19, %v6253_v18  ;;  %v6647_v10 = vld [vmem:[#allocation8 + $0x6ac] sm:$0xf0]  ;;  %v7152_v19 = vld [vmem:[#allocation8 + $0x42c] sm:$0xf] }
 0x208   :  { %v2296_v13 = vpop.f32.mrf.mxu3 }
 0x209   :  { %v7620_v21 = vadd.f32 %v2296_v13, %v2284_v7  ;;  %v5889_v7 = vld [vmem:[#allocation8 + $0xa8] sm:$0xf] }
 0x20a   :  { %v6337_v13 = vld [vmem:[#allocation8 + $0x428] sm:$0xf]  ;;  %v5890_v16 = vor.u32 %v7043_v9, %v5889_v7  ;;  %4088 = vmatpush.bf16.msra.mxu3 %v6562_v8  ;;  %4063 = vmatpush.bf16.msra.mxu1 %v6086_v33  ;;  %v6006_v9 = vor.u32 %v7068_v61, %v6003_v56  ;;  %v6171_v8 = vld [vmem:[#allocation8 + $0x2f4] sm:$0xf0]  ;;  %v5950_v33 = vor.u32 %v7054_v24, %v5947_v34  ;;  %v7194_v34 = vld [vmem:[#allocation8 + $0x57c] sm:$0xf] }
 0x20b   :  { %4494 = vst [vmem:[%s7730_s11] sm:$0xff] %v7620_v21  ;;  %v6338_v25 = vor.u32 %v7155_v14, %v6337_v13  ;;  %v6675_v7 = vld [vmem:[#allocation8 + $0x6e4] sm:$0xf0] }
 0x20c   :  { %4049 = vmatpush.bf16.msra.mxu0 %v5890_v16  ;;  %v6454_v16 = vor.u32 %v7180_v1, %v6451_v2  ;;  %v6678_v14 = vor.u32 %v7236_v6, %v6675_v7  ;;  %v6563_v2 = vld [vmem:[#allocation8 + $0x604] sm:$0xf0]  ;;  %v7082_v7 = vld [vmem:[#allocation8 + $0x1fc] sm:$0xf] }
 0x20d   :  { %4075 = vmatpush.bf16.msra.mxu2 %v6338_v25  ;;  %v7110_v25 = vld [vmem:[#allocation8 + $0x2dc] sm:$0xf] }
 0x20e   :  { %4064 = vmatpush.bf16.msra.mxu1 %v6058_v51  ;;  %v6174_v35 = vor.u32 %v7110_v25, %v6171_v8  ;;  %v7040_v51 = vld [vmem:[#allocation8 + $0xac] sm:$0xf]  ;;  %v6507_v25 = vld [vmem:[#allocation8 + $0x594] sm:$0xf0] }
 0x20f   :  { %v5894_v61 = vor.u32 %v7040_v51, %v5891_v52  ;;  %v6510_v8 = vor.u32 %v7194_v34, %v6507_v25 }
 0x210   :  { %v2298_v31 = vpop.f32.mrf.mxu3  ;;  %4050 = vmatpush.bf16.msra.mxu0 %v5862_v30  ;;  %v7166_v30 = vld [vmem:[#allocation8 + $0x49c] sm:$0xf] }
 0x211   :  { %v6533_v31 = vld [vmem:[#allocation8 + $0x5b0] sm:$0xf]  ;;  %4076 = vmatpush.bf16.msra.mxu2 %v6310_v39  ;;  %v6398_v39 = vor.u32 %v7166_v30, %v6395_v20  ;;  %v7187_v20 = vld [vmem:[#allocation8 + $0x544] sm:$0xf] }
 0x212   :  { %v6534_v42 = vor.u32 %v7204_v32, %v6533_v31  ;;  %v7222_v31 = vld [vmem:[#allocation8 + $0x65c] sm:$0xf]  ;;  %v6619_v32 = vld [vmem:[#allocation8 + $0x674] sm:$0xf0] }
 0x214   :  { %4089 = vmatpush.bf16.msra.mxu3 %v6534_v42  ;;  %4051 = vmatpush.bf16.msra.mxu0 %v5834_v45  ;;  %v6622_v42 = vor.u32 %v7222_v31, %v6619_v32  ;;  %v6367_v45 = vld [vmem:[#allocation8 + $0x47c] sm:$0xf0] }
 0x215   :  { %4077 = vmatpush.bf16.msra.mxu2 %v6282_v22  ;;  %v7089_v22 = vld [vmem:[#allocation8 + $0x234] sm:$0xf]  ;;  %v6479_v31 = vld [vmem:[#allocation8 + $0x55c] sm:$0xf0] }
 0x216   :  { %v6482_v32 = vor.u32 %v7187_v20, %v6479_v31  ;;  %v7170_v31 = vld [vmem:[#allocation8 + $0x4b8] sm:$0xf0] }
 0x218   :  { %v2348_v49 = vpop.f32.mrf.mxu3  ;;  %4090 = vmatpush.bf16.msra.mxu3 %v6506_v59  ;;  %4052 = vmatpush.bf16.msra.mxu0 %v5806_v62  ;;  %v6087_v59 = vld [vmem:[#allocation8 + $0x24c] sm:$0xf0]  ;;  %v7026_v62 = vld [vmem:[#allocation8 + $0x3c] sm:$0xf] }
 0x219   :  { %v2349_v5 = vadd.f32 %v2348_v49, %v2336_v60  ;;  %v7190_v49 = vld [vmem:[#allocation8 + $0x558] sm:$0xf0]  ;;  %4078 = vmatpush.bf16.msra.mxu2 %v6254_v3  ;;  %v6090_v18 = vor.u32 %v7089_v22, %v6087_v59  ;;  %v6535_v3 = vld [vmem:[#allocation8 + $0x5cc] sm:$0xf0] }
 0x21a   :  { %v6478_v13 = vor.u32 %v7190_v49, %v6477_v0  ;;  %v6339_v0 = vld [vmem:[#allocation8 + $0x444] sm:$0xf0]  ;;  %v7208_v49 = vld [vmem:[#allocation8 + $0x5ec] sm:$0xf] }
 0x21b   :  { %v2352_v12 = vmul.f32 0.5, %v2349_v5  ;;  %v6030_v5 = vor.u32 %v7078_v55, %v6029_v48  ;;  %v6370_v48 = vor.u32 %v7159_v44, %v6367_v45  ;;  %v6594_v55 = vor.u32 %v7215_v46, %v6591_v47  ;;  %v7072_v44 = vld [vmem:[#allocation8 + $0x1a8] sm:$0xf0]  ;;  %v6233_v45 = vld [vmem:[#allocation8 + $0x350] sm:$0xf] }
 0x21c   :  { %4091 = vmatpush.bf16.msra.mxu3 %v6478_v13  ;;  %v6342_v1 = vor.u32 %v7152_v19, %v6339_v0  ;;  %v7128_v46 = vld [vmem:[#allocation8 + $0x368] sm:$0xf0]  ;;  %v6681_v19 = vld [vmem:[#allocation8 + $0x6d0] sm:$0xf] }
 0x21d   :  { %v2353_v23 = vmul.f32 1.442695, %v2352_v12  ;;  %v7117_v12 = vld [vmem:[#allocation8 + $0x314] sm:$0xf]  ;;  %4065 = vmatpush.bf16.msra.mxu1 %v6030_v5  ;;  %v5835_v5 = vld [vmem:[#allocation8 + $0x54] sm:$0xf0] }
 0x21e   :  { %v6202_v28 = vor.u32 %v7117_v12, %v6199_v37  ;;  %v5838_v6 = vor.u32 %v7026_v62, %v5835_v5  ;;  %v7201_v12 = vld [vmem:[#allocation8 + $0x5b4] sm:$0xf]  ;;  %v7240_v62 = vld [vmem:[#allocation8 + $0x6e8] sm:$0xf0]  ;;  %v5953_v5 = vld [vmem:[#allocation8 + $0x120] sm:$0xf] }
 0x21f   :  { %7255 = vpow2.f32 %v2353_v23  ;;  %v7229_v23 = vld [vmem:[#allocation8 + $0x694] sm:$0xf]  ;;  %v6538_v13 = vor.u32 %v7201_v12, %v6535_v3  ;;  %v6682_v12 = vor.u32 %v7240_v62, %v6681_v19  ;;  %v6429_v3 = vld [vmem:[#allocation8 + $0x4d8] sm:$0xf]  ;;  %v7030_v19 = vld [vmem:[#allocation8 + $0x58] sm:$0xf0] }
 0x220   :  { %v2350_v43 = vpop.f32.mrf.mxu3  ;;  %v7149_v62 = vld [vmem:[#allocation8 + $0x410] sm:$0xf0] }
 0x221   :  { %v6650_v43 = vor.u32 %v7229_v23, %v6647_v10  ;;  %v6031_v23 = vld [vmem:[#allocation8 + $0x1dc] sm:$0xf0] }
 0x222   :  { %v6034_v10 = vor.u32 %v7075_v15, %v6031_v23  ;;  %v7233_v23 = vld [vmem:[#allocation8 + $0x6b0] sm:$0xf0] }
 0x225   :  { %v7256_v50 = vpop.eup %7255 }
 0x226   :  { %v2356_v54 = vmul.f32 %v7256_v50, %v2355_v38  ;;  %v6143_v38 = vld [vmem:[#allocation8 + $0x2bc] sm:$0xf0] }
 0x227   :  { %v6146_v50 = vor.u32 %v7103_v36, %v6143_v38  ;;  %v6009_v38 = vld [vmem:[#allocation8 + $0x190] sm:$0xf] }
 0x228   :  { %v2357_v60 = vadd.f32 %v2356_v54, %v7620_v21  ;;  %v5975_v21 = vld [vmem:[#allocation8 + $0x16c] sm:$0xf0]  ;;  %v6115_v54 = vld [vmem:[#allocation8 + $0x284] sm:$0xf0]  ;;  %v6010_v52 = vor.u32 %v7072_v44, %v6009_v38  ;;  %v7163_v44 = vld [vmem:[#allocation8 + $0x480] sm:$0xf0] }
 0x229   :  { %v5978_v58 = vor.u32 %v7061_v27, %v5975_v21  ;;  %v6118_v56 = vor.u32 %v7096_v53, %v6115_v54  ;;  %v7145_v27 = vld [vmem:[#allocation8 + $0x3f4] sm:$0xf]  ;;  %v6311_v21 = vld [vmem:[#allocation8 + $0x40c] sm:$0xf0]  ;;  %v6234_v53 = vor.u32 %v7128_v46, %v6233_v45  ;;  %v5981_v54 = vld [vmem:[#allocation8 + $0x158] sm:$0xf] }
 0x22a   :  { %v2358_v4 = vpack.c.bf16 %v2357_v60, %v2357_v60  ;;  %4495 = vst [vmem:[#allocation10] sm:$0xff] %v2357_v60  ;;  %v5866_v60 = vor.u32 %v7033_v57, %v5863_v26  ;;  %v6314_v37 = vor.u32 %v7145_v27, %v6311_v21  ;;  %v7121_v57 = vld [vmem:[#allocation8 + $0x330] sm:$0xf0]  ;;  %v6597_v45 = vld [vmem:[#allocation8 + $0x628] sm:$0xf] }
 0x22b   :  { %v7219_v46 = vld [vmem:[#allocation8 + $0x640] sm:$0xf0]  ;;  %4510 = dma.vmem_to_hbm [thread:$0]  %s4506_s2, 128, %s4508_s24, [#allocation4]  }
 0x22c   :  { %2569 = vmatmul.bf16.vlgmr.msrb.gmra.mxu0 %v2358_v4  ;;  %2582 = vmatmul.bf16.vlgmr.msrb.gmra.mxu1 %v2358_v4 }
 0x22d   :  { %2595 = vmatmul.bf16.vlgmr.msrb.gmra.mxu2 %v2358_v4  ;;  %2608 = vmatmul.bf16.vlgmr.msrb.gmra.mxu3 %v2358_v4  ;;  %v6566_v4 = vor.u32 %v7208_v49, %v6563_v2 }
 0x22e   :  { %4097 = vmatpush.bf16.msrb.mxu0 %v6006_v9  ;;  %4110 = vmatpush.bf16.msrb.mxu1 %v6230_v11  ;;  %v6059_v9 = vld [vmem:[#allocation8 + $0x214] sm:$0xf0] }
 0x22f   :  { %4123 = vmatpush.bf16.msrb.mxu2 %v6454_v16  ;;  %4136 = vmatpush.bf16.msrb.mxu3 %v6678_v14  ;;  %v6062_v11 = vor.u32 %v7082_v7, %v6059_v9  ;;  %v7019_v16 = vld [vmem:[#allocation8 + $0x4] sm:$0xf]  ;;  %v5807_v14 = vld [vmem:[#allocation8 + $0x1c] sm:$0xf0]  ;;  %v7114_v9 = vld [vmem:[#allocation8 + $0x2f8] sm:$0xf0] }
 0x230   :  { %v5810_v17 = vor.u32 %v7019_v16, %v5807_v14  ;;  %v6177_v7 = vld [vmem:[#allocation8 + $0x2e0] sm:$0xf] }
 0x231   :  { %v6178_v15 = vor.u32 %v7114_v9, %v6177_v7 }
 0x232   :  { %4098 = vmatpush.bf16.msrb.mxu0 %v5978_v58  ;;  %4111 = vmatpush.bf16.msrb.mxu1 %v6202_v28  ;;  %v7138_v58 = vld [vmem:[#allocation8 + $0x3bc] sm:$0xf]  ;;  %v6283_v28 = vld [vmem:[#allocation8 + $0x3d4] sm:$0xf0] }
 0x233   :  { %4124 = vmatpush.bf16.msrb.mxu2 %v6426_v29  ;;  %4137 = vmatpush.bf16.msrb.mxu3 %v6650_v43  ;;  %v6286_v24 = vor.u32 %v7138_v58, %v6283_v28  ;;  %v7131_v29 = vld [vmem:[#allocation8 + $0x384] sm:$0xf]  ;;  %v6255_v43 = vld [vmem:[#allocation8 + $0x39c] sm:$0xf0]  ;;  %v6149_v28 = vld [vmem:[#allocation8 + $0x2a8] sm:$0xf] }
 0x234   :  { %v6258_v30 = vor.u32 %v7131_v29, %v6255_v43  ;;  %v7051_v58 = vld [vmem:[#allocation8 + $0x100] sm:$0xf0]  ;;  %v6401_v43 = vld [vmem:[#allocation8 + $0x4a0] sm:$0xf] }
 0x235   :  { %v6402_v38 = vor.u32 %v7170_v31, %v6401_v43  ;;  %v7062_v43 = vld [vmem:[#allocation8 + $0x15c] sm:$0xf] }
 0x236   :  { %4099 = vmatpush.bf16.msrb.mxu0 %v5950_v33  ;;  %4112 = vmatpush.bf16.msrb.mxu1 %v6174_v35  ;;  %v2391_v33 = vld [vmem:[%s7726_s7] sm:$0xf] }
 0x237   :  { %4125 = vmatpush.bf16.msrb.mxu2 %v6398_v39  ;;  %4138 = vmatpush.bf16.msrb.mxu3 %v6622_v42  ;;  %v2393_v35 = vperm.slane %v2391_v33, 0  ;;  %v2394_v40 = vperm.slane %v2391_v33, 1  ;;  %v2396_v51 = vperm.slane %v2391_v33, 3 }
 0x23a   :  { %4100 = vmatpush.bf16.msrb.mxu0 %v5922_v63  ;;  %4113 = vmatpush.bf16.msrb.mxu1 %v6146_v50  ;;  %v2395_v50 = vperm.slane %v2391_v33, 2  ;;  %v7226_v33 = vld [vmem:[#allocation8 + $0x678] sm:$0xf0] }
 0x23b   :  { %4126 = vmatpush.bf16.msrb.mxu2 %v6370_v48  ;;  %4139 = vmatpush.bf16.msrb.mxu3 %v6594_v55  ;;  %v7065_v48 = vld [vmem:[#allocation8 + $0x170] sm:$0xf0] }
 0x23c   :  { %v5982_v59 = vor.u32 %v7065_v48, %v5981_v54  ;;  %v6598_v48 = vor.u32 %v7219_v46, %v6597_v45 }
 0x23e   :  { %4101 = vmatpush.bf16.msrb.mxu0 %v5894_v61  ;;  %4114 = vmatpush.bf16.msrb.mxu1 %v6118_v56  ;;  %v6205_v56 = vld [vmem:[#allocation8 + $0x318] sm:$0xf] }
 0x23f   :  { %4127 = vmatpush.bf16.msrb.mxu2 %v6342_v1  ;;  %4140 = vmatpush.bf16.msrb.mxu3 %v6566_v4  ;;  %v6206_v4 = vor.u32 %v7121_v57, %v6205_v56  ;;  %v6345_v56 = vld [vmem:[#allocation8 + $0x430] sm:$0xf]  ;;  %v7156_v57 = vld [vmem:[#allocation8 + $0x448] sm:$0xf0] }
 0x242   :  { %4102 = vmatpush.bf16.msrb.mxu0 %v5866_v60  ;;  %4115 = vmatpush.bf16.msrb.mxu1 %v6090_v18  ;;  %v6457_v60 = vld [vmem:[#allocation8 + $0x510] sm:$0xf]  ;;  %v7184_v18 = vld [vmem:[#allocation8 + $0x528] sm:$0xf0] }
 0x243   :  { %4128 = vmatpush.bf16.msrb.mxu2 %v6314_v37  ;;  %4141 = vmatpush.bf16.msrb.mxu3 %v6538_v13  ;;  %v6458_v21 = vor.u32 %v7184_v18, %v6457_v60  ;;  %v7177_v13 = vld [vmem:[#allocation8 + $0x4f0] sm:$0xf0]  ;;  %v5841_v18 = vld [vmem:[#allocation8 + $0x40] sm:$0xf] }
 0x244   :  { %v5842_v7 = vor.u32 %v7030_v19, %v5841_v18  ;;  %v7048_v18 = vld [vmem:[#allocation8 + $0xec] sm:$0xf]  ;;  %v5927_v19 = vld [vmem:[#allocation8 + $0x104] sm:$0xf0] }
 0x246   :  { %4103 = vmatpush.bf16.msrb.mxu0 %v5838_v6  ;;  %4116 = vmatpush.bf16.msrb.mxu1 %v6062_v11  ;;  %v7058_v6 = vld [vmem:[#allocation8 + $0x138] sm:$0xf0] }
 0x247   :  { %4129 = vmatpush.bf16.msrb.mxu2 %v6286_v24  ;;  %4142 = vmatpush.bf16.msrb.mxu3 %v6510_v8  ;;  %v5954_v37 = vor.u32 %v7058_v6, %v5953_v5  ;;  %v7107_v24 = vld [vmem:[#allocation8 + $0x2c0] sm:$0xf0]  ;;  %v6430_v8 = vor.u32 %v7177_v13, %v6429_v3  ;;  %v6541_v5 = vld [vmem:[#allocation8 + $0x5b8] sm:$0xf]  ;;  %v7205_v6 = vld [vmem:[#allocation8 + $0x5d0] sm:$0xf0] }
 0x248   :  { %v6150_v20 = vor.u32 %v7107_v24, %v6149_v28  ;;  %v6011_v3 = vld [vmem:[#allocation8 + $0x1ac] sm:$0xf0]  ;;  %v6513_v28 = vld [vmem:[#allocation8 + $0x580] sm:$0xf]  ;;  %v7198_v24 = vld [vmem:[#allocation8 + $0x598] sm:$0xf0] }
 0x24a   :  { %4104 = vmatpush.bf16.msrb.mxu0 %v5810_v17  ;;  %4117 = vmatpush.bf16.msrb.mxu1 %v6034_v10  ;;  %v6653_v17 = vld [vmem:[#allocation8 + $0x698] sm:$0xf]  ;;  %v5925_v10 = vld [vmem:[#allocation8 + $0xe8] sm:$0xf] }
 0x24b   :  { %4130 = vmatpush.bf16.msrb.mxu2 %v6258_v30  ;;  %4143 = vmatpush.bf16.msrb.mxu3 %v6482_v32  ;;  %v6654_v29 = vor.u32 %v7233_v23, %v6653_v17  ;;  %v5926_v30 = vor.u32 %v7051_v58, %v5925_v10  ;;  %v6625_v32 = vld [vmem:[#allocation8 + $0x660] sm:$0xf]  ;;  %v7125_v17 = vld [vmem:[#allocation8 + $0x354] sm:$0xf]  ;;  %v6235_v23 = vld [vmem:[#allocation8 + $0x36c] sm:$0xf0] }
 0x24c   :  { %v6289_v10 = vld [vmem:[#allocation8 + $0x3c0] sm:$0xf]  ;;  %v7142_v58 = vld [vmem:[#allocation8 + $0x3d8] sm:$0xf0] }
 0x24d   :  { %v6290_v31 = vor.u32 %v7142_v58, %v6289_v10 }
 0x2a9   :  { %v2570_v41 = vpop.f32.mrf.mxu0  ;;  %v2583_v36 = vpop.f32.mrf.mxu1 }
 0x2aa   :  { %v2571_v39 = vadd.f32 %v2570_v41, %v2393_v35  ;;  %v2584_v42 = vadd.f32 %v2583_v36, %v2394_v40  ;;  %v5897_v35 = vld [vmem:[#allocation8 + $0xb0] sm:$0xf]  ;;  %v7044_v40 = vld [vmem:[#allocation8 + $0xc8] sm:$0xf0] }
 0x2ab   :  { %v6121_v41 = vld [vmem:[#allocation8 + $0x270] sm:$0xf]  ;;  %v7100_v36 = vld [vmem:[#allocation8 + $0x288] sm:$0xf0] }
 0x2ac   :  { %v2613_v47 = vmax.f32 %v2571_v39, 0.0  ;;  %v2614_v63 = vmax.f32 %v2584_v42, 0.0  ;;  %v6626_v39 = vor.u32 %v7226_v33, %v6625_v32  ;;  %v6373_v42 = vld [vmem:[#allocation8 + $0x468] sm:$0xf]  ;;  %v6514_v32 = vor.u32 %v7198_v24, %v6513_v28  ;;  %v6207_v33 = vld [vmem:[#allocation8 + $0x334] sm:$0xf0] }
 0x2ad   :  { %v6374_v54 = vor.u32 %v7163_v44, %v6373_v42  ;;  %v7237_v42 = vld [vmem:[#allocation8 + $0x6d4] sm:$0xf]  ;;  %v6683_v44 = vld [vmem:[#allocation8 + $0x6ec] sm:$0xf0]  ;;  %v7034_v28 = vld [vmem:[#allocation8 + $0x7c] sm:$0xf] }
 0x2ae   :  { %v7635_v55 = vpack.c.bf16 %v2613_v47, %v2613_v47  ;;  %v7637_v61 = vpack.c.bf16 %v2614_v63, %v2614_v63  ;;  %v5898_v47 = vor.u32 %v7044_v40, %v5897_v35  ;;  %v6122_v63 = vor.u32 %v7100_v36, %v6121_v41  ;;  %v6261_v35 = vld [vmem:[#allocation8 + $0x388] sm:$0xf]  ;;  %v7135_v40 = vld [vmem:[#allocation8 + $0x3a0] sm:$0xf0]  ;;  %v5871_v24 = vld [vmem:[#allocation8 + $0x94] sm:$0xf0] }
 0x2af   :  { %v6485_v41 = vld [vmem:[#allocation8 + $0x548] sm:$0xf]  ;;  %v7191_v36 = vld [vmem:[#allocation8 + $0x560] sm:$0xf0] }
 0x2b0   :  { %v2596_v26 = vpop.f32.mrf.mxu2  ;;  %v2609_v22 = vpop.f32.mrf.mxu3  ;;  %4053 = vmatmul.bf16.vlgmr.msra.gmra.mxu0 %v7635_v55  ;;  %4066 = vmatmul.bf16.vlgmr.msra.gmra.mxu1 %v7637_v61 }
 0x2b1   :  { %v2597_v0 = vadd.f32 %v2596_v26, %v2395_v50  ;;  %v2610_v49 = vadd.f32 %v2609_v22, %v2396_v51  ;;  %4149 = vmatpush.bf16.msra.mxu0 %v6010_v52  ;;  %4162 = vmatpush.bf16.msra.mxu1 %v6234_v53  ;;  %v2572_v1 = vpop.f32.mrf.mxu0  ;;  %v2585_v2 = vpop.f32.mrf.mxu1  ;;  %v5869_v50 = vld [vmem:[#allocation8 + $0x78] sm:$0xf]  ;;  %v7037_v51 = vld [vmem:[#allocation8 + $0x90] sm:$0xf0]  ;;  %v6569_v26 = vld [vmem:[#allocation8 + $0x5f0] sm:$0xf] }
 0x2b2   :  { %v6093_v52 = vld [vmem:[#allocation8 + $0x238] sm:$0xf]  ;;  %v7093_v53 = vld [vmem:[#allocation8 + $0x250] sm:$0xf0]  ;;  %v7212_v22 = vld [vmem:[#allocation8 + $0x608] sm:$0xf0]  ;;  %v6346_v1 = vor.u32 %v7156_v57, %v6345_v56 }
 0x2b3   :  { %v2615_v11 = vmax.f32 %v2597_v0, 0.0  ;;  %v2616_v27 = vmax.f32 %v2610_v49, 0.0  ;;  %v6094_v60 = vor.u32 %v7093_v53, %v6093_v52  ;;  %v6065_v0 = vld [vmem:[#allocation8 + $0x200] sm:$0xf]  ;;  %v7086_v49 = vld [vmem:[#allocation8 + $0x218] sm:$0xf0]  ;;  %v6570_v2 = vor.u32 %v7212_v22, %v6569_v26 }
 0x2b4   :  { %v6066_v9 = vor.u32 %v7086_v49, %v6065_v0  ;;  %v7111_v52 = vld [vmem:[#allocation8 + $0x2e4] sm:$0xf]  ;;  %v6179_v53 = vld [vmem:[#allocation8 + $0x2fc] sm:$0xf0]  ;;  %v7174_v56 = vld [vmem:[#allocation8 + $0x4dc] sm:$0xf] }
 0x2b5   :  { %v7641_v16 = vpack.c.bf16 %v2615_v11, %v2615_v11  ;;  %v7643_v14 = vpack.c.bf16 %v2616_v27, %v2616_v27  ;;  %4150 = vmatpush.bf16.msra.mxu0 %v5982_v59  ;;  %4163 = vmatpush.bf16.msra.mxu1 %v6206_v4  ;;  %v5870_v59 = vor.u32 %v7037_v51, %v5869_v50  ;;  %v6317_v4 = vld [vmem:[#allocation8 + $0x3f8] sm:$0xf]  ;;  %v5813_v11 = vld [vmem:[#allocation8 + $0x8] sm:$0xf]  ;;  %v7023_v27 = vld [vmem:[#allocation8 + $0x20] sm:$0xf0] }
 0x2b6   :  { %v6318_v13 = vor.u32 %v7149_v62, %v6317_v4  ;;  %v6486_v50 = vor.u32 %v7191_v36, %v6485_v41  ;;  %v5955_v51 = vld [vmem:[#allocation8 + $0x13c] sm:$0xf0]  ;;  %v6431_v57 = vld [vmem:[#allocation8 + $0x4f4] sm:$0xf0]  ;;  %v7230_v26 = vld [vmem:[#allocation8 + $0x69c] sm:$0xf] }
 0x2b7   :  { %4079 = vmatmul.bf16.vlgmr.msra.gmra.mxu2 %v7641_v16  ;;  %4092 = vmatmul.bf16.vlgmr.msra.gmra.mxu3 %v7643_v14  ;;  %v6655_v22 = vld [vmem:[#allocation8 + $0x6b4] sm:$0xf0]  ;;  %v7104_v0 = vld [vmem:[#allocation8 + $0x2ac] sm:$0xf]  ;;  %v6151_v49 = vld [vmem:[#allocation8 + $0x2c4] sm:$0xf0] }
 0x2b8   :  { %4175 = vmatpush.bf16.msra.mxu2 %v6458_v21  ;;  %4188 = vmatpush.bf16.msra.mxu3 %v6682_v12  ;;  %v2598_v34 = vpop.f32.mrf.mxu2  ;;  %v2611_v25 = vpop.f32.mrf.mxu3  ;;  %v6037_v21 = vld [vmem:[#allocation8 + $0x1c8] sm:$0xf]  ;;  %v7079_v12 = vld [vmem:[#allocation8 + $0x1e0] sm:$0xf0]  ;;  %v6403_v62 = vld [vmem:[#allocation8 + $0x4bc] sm:$0xf0] }
 0x2b9   :  { %4151 = vmatpush.bf16.msra.mxu0 %v5954_v37  ;;  %4164 = vmatpush.bf16.msra.mxu1 %v6178_v15  ;;  %v7069_v37 = vld [vmem:[#allocation8 + $0x194] sm:$0xf]  ;;  %v6542_v15 = vor.u32 %v7205_v6, %v6541_v5  ;;  %v5814_v34 = vor.u32 %v7023_v27, %v5813_v11  ;;  %v6038_v25 = vor.u32 %v7079_v12, %v6037_v21  ;;  %v7167_v4 = vld [vmem:[#allocation8 + $0x4a4] sm:$0xf]  ;;  %v6627_v6 = vld [vmem:[#allocation8 + $0x67c] sm:$0xf0] }
 0x2ba   :  { %v7223_v5 = vld [vmem:[#allocation8 + $0x664] sm:$0xf]  ;;  %v7041_v11 = vld [vmem:[#allocation8 + $0xb4] sm:$0xf]  ;;  %v5899_v27 = vld [vmem:[#allocation8 + $0xcc] sm:$0xf0] }
 0x2bb   :  { %v7097_v21 = vld [vmem:[#allocation8 + $0x274] sm:$0xf]  ;;  %v6123_v12 = vld [vmem:[#allocation8 + $0x28c] sm:$0xf0]  ;;  %v5902_v10 = vor.u32 %v7041_v11, %v5899_v27  ;;  %v7083_v41 = vld [vmem:[#allocation8 + $0x204] sm:$0xf] }
 0x2bc   :  { %4176 = vmatpush.bf16.msra.mxu2 %v6430_v8  ;;  %4189 = vmatpush.bf16.msra.mxu3 %v6654_v29  ;;  %v6014_v8 = vor.u32 %v7069_v37, %v6011_v3  ;;  %v6238_v29 = vor.u32 %v7125_v17, %v6235_v23  ;;  %v6406_v37 = vor.u32 %v7167_v4, %v6403_v62  ;;  %v7216_v17 = vld [vmem:[#allocation8 + $0x62c] sm:$0xf]  ;;  %v6599_v23 = vld [vmem:[#allocation8 + $0x644] sm:$0xf0]  ;;  %v6067_v36 = vld [vmem:[#allocation8 + $0x21c] sm:$0xf0] }
 0x2bd   :  { %4152 = vmatpush.bf16.msra.mxu0 %v5926_v30  ;;  %4165 = vmatpush.bf16.msra.mxu1 %v6150_v20  ;;  %v5983_v30 = vld [vmem:[#allocation8 + $0x174] sm:$0xf0]  ;;  %v7118_v20 = vld [vmem:[#allocation8 + $0x31c] sm:$0xf]  ;;  %v6630_v3 = vor.u32 %v7223_v5, %v6627_v6  ;;  %v6126_v58 = vor.u32 %v7097_v21, %v6123_v12  ;;  %v5989_v4 = vld [vmem:[#allocation8 + $0x160] sm:$0xf] }
 0x2be   :  { %v5986_v45 = vor.u32 %v7062_v43, %v5983_v30  ;;  %v6210_v46 = vor.u32 %v7118_v20, %v6207_v33  ;;  %v7153_v43 = vld [vmem:[#allocation8 + $0x434] sm:$0xf]  ;;  %v6347_v30 = vld [vmem:[#allocation8 + $0x44c] sm:$0xf0]  ;;  %v7066_v62 = vld [vmem:[#allocation8 + $0x178] sm:$0xf0] }
 0x2bf   :  { %v7209_v20 = vld [vmem:[#allocation8 + $0x5f4] sm:$0xf]  ;;  %v6213_v5 = vld [vmem:[#allocation8 + $0x320] sm:$0xf]  ;;  %v7132_v11 = vld [vmem:[#allocation8 + $0x38c] sm:$0xf] }
 0x2c0   :  { %4177 = vmatpush.bf16.msra.mxu2 %v6402_v38  ;;  %4190 = vmatpush.bf16.msra.mxu3 %v6626_v39  ;;  %v7181_v38 = vld [vmem:[#allocation8 + $0x514] sm:$0xf]  ;;  %v6459_v39 = vld [vmem:[#allocation8 + $0x52c] sm:$0xf0]  ;;  %v6263_v27 = vld [vmem:[#allocation8 + $0x3a4] sm:$0xf0] }
 0x2c1   :  { %4105 = vmatmul.bf16.vlgmr.msrb.gmra.mxu0 %v7635_v55  ;;  %4118 = vmatmul.bf16.vlgmr.msrb.gmra.mxu1 %v7637_v61  ;;  %v7188_v21 = vld [vmem:[#allocation8 + $0x54c] sm:$0xf]  ;;  %v6487_v12 = vld [vmem:[#allocation8 + $0x564] sm:$0xf0] }
 0x2c2   :  { %4153 = vmatpush.bf16.msra.mxu0 %v5898_v47  ;;  %4166 = vmatpush.bf16.msra.mxu1 %v6122_v63  ;;  %v7055_v47 = vld [vmem:[#allocation8 + $0x124] sm:$0xf]  ;;  %v6262_v63 = vor.u32 %v7135_v40, %v6261_v35  ;;  %v5843_v40 = vld [vmem:[#allocation8 + $0x5c] sm:$0xf0] }
 0x2c3   :  { %v7027_v35 = vld [vmem:[#allocation8 + $0x44] sm:$0xf] }
 0x2c4   :  { %4178 = vmatpush.bf16.msra.mxu2 %v6374_v54  ;;  %4191 = vmatpush.bf16.msra.mxu3 %v6598_v48  ;;  %v6462_v54 = vor.u32 %v7181_v38, %v6459_v39  ;;  %v6686_v48 = vor.u32 %v7237_v42, %v6683_v44  ;;  %v6350_v38 = vor.u32 %v7153_v43, %v6347_v30  ;;  %v7146_v42 = vld [vmem:[#allocation8 + $0x3fc] sm:$0xf]  ;;  %v6319_v44 = vld [vmem:[#allocation8 + $0x414] sm:$0xf0]  ;;  %v6437_v43 = vld [vmem:[#allocation8 + $0x4e0] sm:$0xf] }
 0x2c5   :  { %v7178_v30 = vld [vmem:[#allocation8 + $0x4f8] sm:$0xf0] }
 0x2c6   :  { %4154 = vmatpush.bf16.msra.mxu0 %v5870_v59  ;;  %4167 = vmatpush.bf16.msra.mxu1 %v6094_v60  ;;  %v5958_v59 = vor.u32 %v7055_v47, %v5955_v51  ;;  %v6182_v60 = vor.u32 %v7111_v52, %v6179_v53  ;;  %v5846_v47 = vor.u32 %v7027_v35, %v5843_v40  ;;  %v5815_v51 = vld [vmem:[#allocation8 + $0x24] sm:$0xf0]  ;;  %v7076_v52 = vld [vmem:[#allocation8 + $0x1cc] sm:$0xf]  ;;  %v5933_v35 = vld [vmem:[#allocation8 + $0xf0] sm:$0xf] }
 0x2c7   :  { %4131 = vmatmul.bf16.vlgmr.msrb.gmra.mxu2 %v7641_v16  ;;  %4144 = vmatmul.bf16.vlgmr.msrb.gmra.mxu3 %v7643_v14  ;;  %v6039_v53 = vld [vmem:[#allocation8 + $0x1e4] sm:$0xf0]  ;;  %v7052_v40 = vld [vmem:[#allocation8 + $0x108] sm:$0xf0] }
 0x2c8   :  { %4179 = vmatpush.bf16.msra.mxu2 %v6346_v1  ;;  %4192 = vmatpush.bf16.msra.mxu3 %v6570_v2  ;;  %v6434_v1 = vor.u32 %v7174_v56, %v6431_v57  ;;  %v6658_v2 = vor.u32 %v7230_v26, %v6655_v22  ;;  %v6322_v56 = vor.u32 %v7146_v42, %v6319_v44  ;;  %v6241_v26 = vld [vmem:[#allocation8 + $0x358] sm:$0xf]  ;;  %v7129_v22 = vld [vmem:[#allocation8 + $0x370] sm:$0xf0]  ;;  %v6409_v42 = vld [vmem:[#allocation8 + $0x4a8] sm:$0xf] }
 0x2c9   :  { %v7171_v44 = vld [vmem:[#allocation8 + $0x4c0] sm:$0xf0] }
 0x2ca   :  { %4155 = vmatpush.bf16.msra.mxu0 %v5842_v7  ;;  %4168 = vmatpush.bf16.msra.mxu1 %v6066_v9  ;;  %v5930_v7 = vor.u32 %v7048_v18, %v5927_v19  ;;  %v6154_v9 = vor.u32 %v7104_v0, %v6151_v49  ;;  %v7195_v18 = vld [vmem:[#allocation8 + $0x584] sm:$0xf]  ;;  %v6515_v19 = vld [vmem:[#allocation8 + $0x59c] sm:$0xf0]  ;;  %v6042_v49 = vor.u32 %v7076_v52, %v6039_v53 }
 0x2cb   :  { %v6410_v52 = vor.u32 %v7171_v44, %v6409_v42  ;;  %v7063_v42 = vld [vmem:[#allocation8 + $0x164] sm:$0xf]  ;;  %v5991_v44 = vld [vmem:[#allocation8 + $0x17c] sm:$0xf0] }
 0x2cc   :  { %4180 = vmatpush.bf16.msra.mxu2 %v6318_v13  ;;  %4193 = vmatpush.bf16.msra.mxu3 %v6542_v15  ;;  %v7160_v13 = vld [vmem:[#allocation8 + $0x46c] sm:$0xf]  ;;  %v6375_v15 = vld [vmem:[#allocation8 + $0x484] sm:$0xf0] }
 0x2ce   :  { %4156 = vmatpush.bf16.msra.mxu0 %v5814_v34  ;;  %4169 = vmatpush.bf16.msra.mxu1 %v6038_v25  ;;  %v7090_v34 = vld [vmem:[#allocation8 + $0x23c] sm:$0xf]  ;;  %v6095_v25 = vld [vmem:[#allocation8 + $0x254] sm:$0xf0] }
 0x2cf   :  { %v6098_v33 = vor.u32 %v7090_v34, %v6095_v25 }
 0x2d0   :  { %4181 = vmatpush.bf16.msra.mxu2 %v6290_v31  ;;  %4194 = vmatpush.bf16.msra.mxu3 %v6514_v32  ;;  %v6571_v31 = vld [vmem:[#allocation8 + $0x60c] sm:$0xf0]  ;;  %v5874_v32 = vor.u32 %v7034_v28, %v5871_v24  ;;  %v5961_v28 = vld [vmem:[#allocation8 + $0x128] sm:$0xf]  ;;  %v7059_v24 = vld [vmem:[#allocation8 + $0x140] sm:$0xf0] }
 0x2d1   :  { %4157 = vmatmul.bf16.vlgmr.msra.gmra.mxu0 %v7635_v55  ;;  %4170 = vmatmul.bf16.vlgmr.msra.gmra.mxu1 %v7637_v61  ;;  %v6574_v39 = vor.u32 %v7209_v20, %v6571_v31  ;;  %v6661_v20 = vld [vmem:[#allocation8 + $0x6a0] sm:$0xf]  ;;  %v7234_v31 = vld [vmem:[#allocation8 + $0x6b8] sm:$0xf0] }
 0x2d2   :  { %4201 = vmatpush.bf16.msrb.mxu0 %v6014_v8  ;;  %4214 = vmatpush.bf16.msrb.mxu1 %v6238_v29  ;;  %v6378_v8 = vor.u32 %v7160_v13, %v6375_v15  ;;  %v6602_v29 = vor.u32 %v7216_v17, %v6599_v23  ;;  %v6689_v13 = vld [vmem:[#allocation8 + $0x6d8] sm:$0xf]  ;;  %v7241_v15 = vld [vmem:[#allocation8 + $0x6f0] sm:$0xf0]  ;;  %v5990_v17 = vor.u32 %v7066_v62, %v5989_v4 }
 0x2d3   :  { %v6690_v25 = vor.u32 %v7241_v15, %v6689_v13  ;;  %v6353_v4 = vld [vmem:[#allocation8 + $0x438] sm:$0xf]  ;;  %v7157_v62 = vld [vmem:[#allocation8 + $0x450] sm:$0xf0]  ;;  %v6325_v13 = vld [vmem:[#allocation8 + $0x400] sm:$0xf] }
 0x2d4   :  { %4182 = vmatpush.bf16.msra.mxu2 %v6262_v63  ;;  %4195 = vmatpush.bf16.msra.mxu3 %v6486_v50  ;;  %v6070_v63 = vor.u32 %v7083_v41, %v6067_v36  ;;  %v7020_v50 = vld [vmem:[#allocation8 + $0xc] sm:$0xf]  ;;  %v6438_v41 = vor.u32 %v7178_v30, %v6437_v43  ;;  %v6662_v36 = vor.u32 %v7234_v31, %v6661_v20  ;;  %v7150_v15 = vld [vmem:[#allocation8 + $0x418] sm:$0xf0]  ;;  %v6019_v30 = vld [vmem:[#allocation8 + $0x1b4] sm:$0xf0] }
 0x2d5   :  { %v5818_v0 = vor.u32 %v7020_v50, %v5815_v51  ;;  %v5905_v50 = vld [vmem:[#allocation8 + $0xb8] sm:$0xf]  ;;  %v7045_v51 = vld [vmem:[#allocation8 + $0xd0] sm:$0xf0]  ;;  %v7070_v43 = vld [vmem:[#allocation8 + $0x19c] sm:$0xf] }
 0x2d6   :  { %4202 = vmatpush.bf16.msrb.mxu0 %v5986_v45  ;;  %4215 = vmatpush.bf16.msrb.mxu1 %v6210_v46  ;;  %v7202_v45 = vld [vmem:[#allocation8 + $0x5bc] sm:$0xf]  ;;  %v6543_v46 = vld [vmem:[#allocation8 + $0x5d4] sm:$0xf0] }
 0x2d7   :  { %4183 = vmatmul.bf16.vlgmr.msra.gmra.mxu2 %v7641_v16  ;;  %4196 = vmatmul.bf16.vlgmr.msra.gmra.mxu3 %v7643_v14  ;;  %v6546_v57 = vor.u32 %v7202_v45, %v6543_v46  ;;  %v6633_v45 = vld [vmem:[#allocation8 + $0x668] sm:$0xf]  ;;  %v7227_v46 = vld [vmem:[#allocation8 + $0x680] sm:$0xf0]  ;;  %v7126_v20 = vld [vmem:[#allocation8 + $0x35c] sm:$0xf] }
 0x2d8   :  { %4227 = vmatpush.bf16.msrb.mxu2 %v6462_v54  ;;  %4240 = vmatpush.bf16.msrb.mxu3 %v6686_v48  ;;  %v6017_v54 = vld [vmem:[#allocation8 + $0x198] sm:$0xf]  ;;  %v7073_v48 = vld [vmem:[#allocation8 + $0x1b0] sm:$0xf0]  ;;  %v6634_v53 = vor.u32 %v7227_v46, %v6633_v45  ;;  %v7119_v45 = vld [vmem:[#allocation8 + $0x324] sm:$0xf] }
 0x2d9   :  { %v6243_v31 = vld [vmem:[#allocation8 + $0x374] sm:$0xf0] }
 0x2da   :  { %4203 = vmatpush.bf16.msrb.mxu0 %v5958_v59  ;;  %4216 = vmatpush.bf16.msrb.mxu1 %v6182_v60  ;;  %v7139_v59 = vld [vmem:[#allocation8 + $0x3c4] sm:$0xf]  ;;  %v6291_v60 = vld [vmem:[#allocation8 + $0x3dc] sm:$0xf0] }
 0x2db   :  { %v6294_v6 = vor.u32 %v7139_v59, %v6291_v60  ;;  %v5906_v59 = vor.u32 %v7045_v51, %v5905_v50  ;;  %v6269_v50 = vld [vmem:[#allocation8 + $0x390] sm:$0xf]  ;;  %v7136_v51 = vld [vmem:[#allocation8 + $0x3a8] sm:$0xf0] }
 0x2dc   :  { %4228 = vmatpush.bf16.msrb.mxu2 %v6434_v1  ;;  %4241 = vmatpush.bf16.msrb.mxu3 %v6658_v2  ;;  %v6018_v1 = vor.u32 %v7073_v48, %v6017_v54  ;;  %v6242_v2 = vor.u32 %v7129_v22, %v6241_v26  ;;  %v6129_v54 = vld [vmem:[#allocation8 + $0x278] sm:$0xf]  ;;  %v7101_v48 = vld [vmem:[#allocation8 + $0x290] sm:$0xf0]  ;;  %v6605_v26 = vld [vmem:[#allocation8 + $0x630] sm:$0xf] }
 0x2dd   :  { %v7220_v22 = vld [vmem:[#allocation8 + $0x648] sm:$0xf0]  ;;  %v6130_v60 = vor.u32 %v7101_v48, %v6129_v54  ;;  %v7182_v54 = vld [vmem:[#allocation8 + $0x51c] sm:$0xf]  ;;  %v6467_v48 = vld [vmem:[#allocation8 + $0x534] sm:$0xf0] }
 0x2de   :  { %4204 = vmatpush.bf16.msrb.mxu0 %v5930_v7  ;;  %4217 = vmatpush.bf16.msrb.mxu1 %v6154_v9  ;;  %v6518_v7 = vor.u32 %v7195_v18, %v6515_v19  ;;  %v7122_v9 = vld [vmem:[#allocation8 + $0x338] sm:$0xf0]  ;;  %v5877_v18 = vld [vmem:[#allocation8 + $0x80] sm:$0xf] }
 0x2df   :  { %v6214_v23 = vor.u32 %v7122_v9, %v6213_v5  ;;  %v7038_v19 = vld [vmem:[#allocation8 + $0x98] sm:$0xf0]  ;;  %v6577_v5 = vld [vmem:[#allocation8 + $0x5f8] sm:$0xf] }
 0x2e0   :  { %4229 = vmatpush.bf16.msrb.mxu2 %v6406_v37  ;;  %4242 = vmatpush.bf16.msrb.mxu3 %v6630_v3  ;;  %v6465_v37 = vld [vmem:[#allocation8 + $0x518] sm:$0xf]  ;;  %v7185_v3 = vld [vmem:[#allocation8 + $0x530] sm:$0xf0] }
 0x2e1   :  { %v6466_v34 = vor.u32 %v7185_v3, %v6465_v37  ;;  %v6073_v37 = vld [vmem:[#allocation8 + $0x208] sm:$0xf]  ;;  %v7087_v3 = vld [vmem:[#allocation8 + $0x220] sm:$0xf0] }
 0x2e2   :  { %4205 = vmatpush.bf16.msrb.mxu0 %v5902_v10  ;;  %4218 = vmatpush.bf16.msrb.mxu1 %v6126_v58  ;;  %v6266_v10 = vor.u32 %v7132_v11, %v6263_v27  ;;  %v6490_v58 = vor.u32 %v7188_v21, %v6487_v12  ;;  %v5849_v11 = vld [vmem:[#allocation8 + $0x48] sm:$0xf]  ;;  %v7031_v27 = vld [vmem:[#allocation8 + $0x60] sm:$0xf0]  ;;  %v6354_v21 = vor.u32 %v7157_v62, %v6353_v4  ;;  %v6439_v62 = vld [vmem:[#allocation8 + $0x4fc] sm:$0xf0] }
 0x2e3   :  { %v7175_v4 = vld [vmem:[#allocation8 + $0x4e4] sm:$0xf] }
 0x2e4   :  { %4230 = vmatpush.bf16.msrb.mxu2 %v6378_v8  ;;  %4243 = vmatpush.bf16.msrb.mxu3 %v6602_v29  ;;  %v6185_v8 = vld [vmem:[#allocation8 + $0x2e8] sm:$0xf]  ;;  %v7115_v29 = vld [vmem:[#allocation8 + $0x300] sm:$0xf0] }
 0x2e6   :  { %4206 = vmatpush.bf16.msrb.mxu0 %v5874_v32  ;;  %4219 = vmatpush.bf16.msrb.mxu1 %v6098_v33  ;;  %v5962_v32 = vor.u32 %v7059_v24, %v5961_v28  ;;  %v6186_v33 = vor.u32 %v7115_v29, %v6185_v8  ;;  %v5821_v28 = vld [vmem:[#allocation8 + $0x10] sm:$0xf]  ;;  %v7024_v24 = vld [vmem:[#allocation8 + $0x28] sm:$0xf0] }
 0x2e7   :  { %v7080_v29 = vld [vmem:[#allocation8 + $0x1e8] sm:$0xf0] }
 0x2e8   :  { %4231 = vmatpush.bf16.msrb.mxu2 %v6350_v38  ;;  %4244 = vmatpush.bf16.msrb.mxu3 %v6574_v39  ;;  %v6157_v38 = vld [vmem:[#allocation8 + $0x2b0] sm:$0xf]  ;;  %v7108_v39 = vld [vmem:[#allocation8 + $0x2c8] sm:$0xf0] }
 0x2ea   :  { %4207 = vmatpush.bf16.msrb.mxu0 %v5846_v47  ;;  %4220 = vmatpush.bf16.msrb.mxu1 %v6070_v63  ;;  %v5934_v47 = vor.u32 %v7052_v40, %v5933_v35  ;;  %v6158_v63 = vor.u32 %v7108_v39, %v6157_v38  ;;  %v6521_v35 = vld [vmem:[#allocation8 + $0x588] sm:$0xf]  ;;  %v7199_v40 = vld [vmem:[#allocation8 + $0x5a0] sm:$0xf0]  ;;  %v6022_v38 = vor.u32 %v7070_v43, %v6019_v30  ;;  %v7161_v43 = vld [vmem:[#allocation8 + $0x474] sm:$0xf] }
 0x2eb   :  { %v6246_v39 = vor.u32 %v7126_v20, %v6243_v31  ;;  %v6383_v30 = vld [vmem:[#allocation8 + $0x48c] sm:$0xf0]  ;;  %v7217_v20 = vld [vmem:[#allocation8 + $0x634] sm:$0xf] }
 0x2ec   :  { %4232 = vmatpush.bf16.msrb.mxu2 %v6322_v56  ;;  %4245 = vmatpush.bf16.msrb.mxu3 %v6546_v57  ;;  %v6381_v56 = vld [vmem:[#allocation8 + $0x470] sm:$0xf]  ;;  %v7164_v57 = vld [vmem:[#allocation8 + $0x488] sm:$0xf0] }
 0x2ed   :  { %v6607_v31 = vld [vmem:[#allocation8 + $0x64c] sm:$0xf0] }
 0x2ee   :  { %4208 = vmatpush.bf16.msrb.mxu0 %v5818_v0  ;;  %4221 = vmatpush.bf16.msrb.mxu1 %v6042_v49  ;;  %v6382_v0 = vor.u32 %v7164_v57, %v6381_v56  ;;  %v6606_v49 = vor.u32 %v7220_v22, %v6605_v26  ;;  %v7238_v56 = vld [vmem:[#allocation8 + $0x6dc] sm:$0xf]  ;;  %v6691_v57 = vld [vmem:[#allocation8 + $0x6f4] sm:$0xf0]  ;;  %v5994_v26 = vor.u32 %v7063_v42, %v5991_v44 }
 0x2ef   :  { %v7154_v42 = vld [vmem:[#allocation8 + $0x43c] sm:$0xf]  ;;  %v6355_v44 = vld [vmem:[#allocation8 + $0x454] sm:$0xf0] }
 0x2f0   :  { %4233 = vmatpush.bf16.msrb.mxu2 %v6294_v6  ;;  %4246 = vmatpush.bf16.msrb.mxu3 %v6518_v7  ;;  %v7213_v6 = vld [vmem:[#allocation8 + $0x610] sm:$0xf0]  ;;  %v5878_v7 = vor.u32 %v7038_v19, %v5877_v18  ;;  %v7056_v18 = vld [vmem:[#allocation8 + $0x12c] sm:$0xf]  ;;  %v5963_v19 = vld [vmem:[#allocation8 + $0x144] sm:$0xf0] }
 0x2f1   :  { %4209 = vmatmul.bf16.vlgmr.msrb.gmra.mxu0 %v7635_v55  ;;  %4222 = vmatmul.bf16.vlgmr.msrb.gmra.mxu1 %v7637_v61  ;;  %v6578_v12 = vor.u32 %v7213_v6, %v6577_v5  ;;  %v7231_v5 = vld [vmem:[#allocation8 + $0x6a4] sm:$0xf]  ;;  %v6663_v6 = vld [vmem:[#allocation8 + $0x6bc] sm:$0xf0] }
 0x2f2   :  { %4253 = vmatpush.bf16.msra.mxu0 %v6018_v1  ;;  %4266 = vmatpush.bf16.msra.mxu1 %v6242_v2  ;;  %v6101_v1 = vld [vmem:[#allocation8 + $0x240] sm:$0xf]  ;;  %v7094_v2 = vld [vmem:[#allocation8 + $0x258] sm:$0xf0] }
 0x2f3   :  { %v6102_v9 = vor.u32 %v7094_v2, %v6101_v1  ;;  %v7112_v1 = vld [vmem:[#allocation8 + $0x2ec] sm:$0xf]  ;;  %v6187_v2 = vld [vmem:[#allocation8 + $0x304] sm:$0xf0] }
 0x2f4   :  { %4234 = vmatpush.bf16.msrb.mxu2 %v6266_v10  ;;  %4247 = vmatpush.bf16.msrb.mxu3 %v6490_v58  ;;  %v5850_v10 = vor.u32 %v7031_v27, %v5849_v11  ;;  %v6074_v58 = vor.u32 %v7087_v3, %v6073_v37  ;;  %v7049_v11 = vld [vmem:[#allocation8 + $0xf4] sm:$0xf]  ;;  %v5935_v27 = vld [vmem:[#allocation8 + $0x10c] sm:$0xf0] }
 0x2f5   :  { %v7105_v37 = vld [vmem:[#allocation8 + $0x2b4] sm:$0xf]  ;;  %v6159_v3 = vld [vmem:[#allocation8 + $0x2cc] sm:$0xf0] }
 0x2f6   :  { %4254 = vmatpush.bf16.msra.mxu0 %v5990_v17  ;;  %4267 = vmatpush.bf16.msra.mxu1 %v6214_v23  ;;  %v6549_v17 = vld [vmem:[#allocation8 + $0x5c0] sm:$0xf]  ;;  %v7206_v23 = vld [vmem:[#allocation8 + $0x5d8] sm:$0xf0] }
 0x2f7   :  { %4235 = vmatmul.bf16.vlgmr.msrb.gmra.mxu2 %v7641_v16  ;;  %4248 = vmatmul.bf16.vlgmr.msrb.gmra.mxu3 %v7643_v14  ;;  %v6550_v8 = vor.u32 %v7206_v23, %v6549_v17  ;;  %v7224_v17 = vld [vmem:[#allocation8 + $0x66c] sm:$0xf]  ;;  %v6635_v23 = vld [vmem:[#allocation8 + $0x684] sm:$0xf0] }
 0x2f8   :  { %4279 = vmatpush.bf16.msra.mxu2 %v6466_v34  ;;  %4292 = vmatpush.bf16.msra.mxu3 %v6690_v25  ;;  %v6045_v34 = vld [vmem:[#allocation8 + $0x1d0] sm:$0xf]  ;;  %v6326_v25 = vor.u32 %v7150_v15, %v6325_v13  ;;  %v7168_v13 = vld [vmem:[#allocation8 + $0x4ac] sm:$0xf]  ;;  %v6411_v15 = vld [vmem:[#allocation8 + $0x4c4] sm:$0xf0] }
 0x2fa   :  { %4255 = vmatpush.bf16.msra.mxu0 %v5962_v32  ;;  %4268 = vmatpush.bf16.msra.mxu1 %v6186_v33  ;;  %v6297_v32 = vld [vmem:[#allocation8 + $0x3c8] sm:$0xf]  ;;  %v7143_v33 = vld [vmem:[#allocation8 + $0x3e0] sm:$0xf0] }
 0x2fb   :  { %v6298_v46 = vor.u32 %v7143_v33, %v6297_v32 }
 0x2fc   :  { %4280 = vmatpush.bf16.msra.mxu2 %v6438_v41  ;;  %4293 = vmatpush.bf16.msra.mxu3 %v6662_v36  ;;  %v5822_v41 = vor.u32 %v7024_v24, %v5821_v28  ;;  %v6046_v36 = vor.u32 %v7080_v29, %v6045_v34  ;;  %v7042_v28 = vld [vmem:[#allocation8 + $0xbc] sm:$0xf]  ;;  %v5907_v24 = vld [vmem:[#allocation8 + $0xd4] sm:$0xf0]  ;;  %v6414_v34 = vor.u32 %v7168_v13, %v6411_v15  ;;  %v5997_v13 = vld [vmem:[#allocation8 + $0x168] sm:$0xf] }
 0x2fd   :  { %v6131_v29 = vld [vmem:[#allocation8 + $0x294] sm:$0xf0]  ;;  %v5910_v32 = vor.u32 %v7042_v28, %v5907_v24  ;;  %v7067_v15 = vld [vmem:[#allocation8 + $0x180] sm:$0xf0]  ;;  %v7133_v28 = vld [vmem:[#allocation8 + $0x394] sm:$0xf] }
 0x2fe   :  { %4256 = vmatpush.bf16.msra.mxu0 %v5934_v47  ;;  %4269 = vmatpush.bf16.msra.mxu1 %v6158_v63  ;;  %v6522_v47 = vor.u32 %v7199_v40, %v6521_v35  ;;  %v6215_v63 = vld [vmem:[#allocation8 + $0x33c] sm:$0xf0]  ;;  %v7035_v35 = vld [vmem:[#allocation8 + $0x84] sm:$0xf]  ;;  %v6271_v24 = vld [vmem:[#allocation8 + $0x3ac] sm:$0xf0] }
 0x2ff   :  { %v6218_v22 = vor.u32 %v7119_v45, %v6215_v63  ;;  %v5879_v40 = vld [vmem:[#allocation8 + $0x9c] sm:$0xf0]  ;;  %v7210_v45 = vld [vmem:[#allocation8 + $0x5fc] sm:$0xf] }
 0x300   :  { %4281 = vmatpush.bf16.msra.mxu2 %v6410_v52  ;;  %4294 = vmatpush.bf16.msra.mxu3 %v6634_v53  ;;  %v6493_v52 = vld [vmem:[#allocation8 + $0x550] sm:$0xf]  ;;  %v7192_v53 = vld [vmem:[#allocation8 + $0x568] sm:$0xf0] }
 0x302   :  { %4257 = vmatpush.bf16.msra.mxu0 %v5906_v59  ;;  %4270 = vmatpush.bf16.msra.mxu1 %v6130_v60  ;;  %v6270_v59 = vor.u32 %v7136_v51, %v6269_v50  ;;  %v6494_v60 = vor.u32 %v7192_v53, %v6493_v52  ;;  %v7028_v50 = vld [vmem:[#allocation8 + $0x4c] sm:$0xf]  ;;  %v5851_v51 = vld [vmem:[#allocation8 + $0x64] sm:$0xf0]  ;;  %v6358_v52 = vor.u32 %v7154_v42, %v6355_v44  ;;  %v7179_v44 = vld [vmem:[#allocation8 + $0x500] sm:$0xf0] }
 0x303   :  { %v6445_v42 = vld [vmem:[#allocation8 + $0x4e8] sm:$0xf] }
 0x304   :  { %4282 = vmatpush.bf16.msra.mxu2 %v6382_v0  ;;  %4295 = vmatpush.bf16.msra.mxu3 %v6606_v49  ;;  %v6470_v0 = vor.u32 %v7182_v54, %v6467_v48  ;;  %v6694_v49 = vor.u32 %v7238_v56, %v6691_v57  ;;  %v7084_v54 = vld [vmem:[#allocation8 + $0x20c] sm:$0xf]  ;;  %v6075_v48 = vld [vmem:[#allocation8 + $0x224] sm:$0xf0]  ;;  %v7147_v56 = vld [vmem:[#allocation8 + $0x404] sm:$0xf] }
 0x305   :  { %v6327_v57 = vld [vmem:[#allocation8 + $0x41c] sm:$0xf0] }
 0x306   :  { %4258 = vmatpush.bf16.msra.mxu0 %v5878_v7  ;;  %4271 = vmatpush.bf16.msra.mxu1 %v6102_v9  ;;  %v5966_v7 = vor.u32 %v7056_v18, %v5963_v19  ;;  %v6190_v9 = vor.u32 %v7112_v1, %v6187_v2  ;;  %v7021_v18 = vld [vmem:[#allocation8 + $0x14] sm:$0xf]  ;;  %v5823_v19 = vld [vmem:[#allocation8 + $0x2c] sm:$0xf0] }
 0x307   :  { %v6047_v2 = vld [vmem:[#allocation8 + $0x1ec] sm:$0xf0] }
 0x308   :  { %4283 = vmatpush.bf16.msra.mxu2 %v6354_v21  ;;  %4296 = vmatpush.bf16.msra.mxu3 %v6578_v12  ;;  %v6442_v21 = vor.u32 %v7175_v4, %v6439_v62  ;;  %v6666_v12 = vor.u32 %v7231_v5, %v6663_v6  ;;  %v6025_v4 = vld [vmem:[#allocation8 + $0x1a0] sm:$0xf]  ;;  %v7074_v62 = vld [vmem:[#allocation8 + $0x1b8] sm:$0xf0] }
 0x309   :  { %v6249_v5 = vld [vmem:[#allocation8 + $0x360] sm:$0xf]  ;;  %v7130_v6 = vld [vmem:[#allocation8 + $0x378] sm:$0xf0] }
 0x30a   :  { %4259 = vmatpush.bf16.msra.mxu0 %v5850_v10  ;;  %4272 = vmatpush.bf16.msra.mxu1 %v6074_v58  ;;  %v5938_v10 = vor.u32 %v7049_v11, %v5935_v27  ;;  %v6162_v58 = vor.u32 %v7105_v37, %v6159_v3  ;;  %v7196_v11 = vld [vmem:[#allocation8 + $0x58c] sm:$0xf]  ;;  %v6523_v27 = vld [vmem:[#allocation8 + $0x5a4] sm:$0xf0]  ;;  %v6026_v37 = vor.u32 %v7074_v62, %v6025_v4  ;;  %v6137_v4 = vld [vmem:[#allocation8 + $0x280] sm:$0xf] }
 0x30b   :  { %v6250_v3 = vor.u32 %v7130_v6, %v6249_v5  ;;  %v7102_v62 = vld [vmem:[#allocation8 + $0x298] sm:$0xf0]  ;;  %v6389_v5 = vld [vmem:[#allocation8 + $0x478] sm:$0xf]  ;;  %v7165_v6 = vld [vmem:[#allocation8 + $0x490] sm:$0xf0] }
 0x30c   :  { %4284 = vmatpush.bf16.msra.mxu2 %v6326_v25  ;;  %4297 = vmatpush.bf16.msra.mxu3 %v6550_v8  ;;  %v6638_v25 = vor.u32 %v7224_v17, %v6635_v23  ;;  %v7098_v8 = vld [vmem:[#allocation8 + $0x27c] sm:$0xf]  ;;  %v6221_v17 = vld [vmem:[#allocation8 + $0x328] sm:$0xf] }
 0x30d   :  { %v6134_v33 = vor.u32 %v7098_v8, %v6131_v29  ;;  %v6473_v8 = vld [vmem:[#allocation8 + $0x520] sm:$0xf]  ;;  %v7186_v29 = vld [vmem:[#allocation8 + $0x538] sm:$0xf0] }
 0x30e   :  { %4260 = vmatpush.bf16.msra.mxu0 %v5822_v41  ;;  %4273 = vmatpush.bf16.msra.mxu1 %v6046_v36  ;;  %v6386_v41 = vor.u32 %v7161_v43, %v6383_v30  ;;  %v6610_v36 = vor.u32 %v7217_v20, %v6607_v31  ;;  %v6697_v43 = vld [vmem:[#allocation8 + $0x6e0] sm:$0xf]  ;;  %v7242_v30 = vld [vmem:[#allocation8 + $0x6f8] sm:$0xf0]  ;;  %v5998_v20 = vor.u32 %v7067_v15, %v5997_v13 }
 0x30f   :  { %v6390_v13 = vor.u32 %v7165_v6, %v6389_v5  ;;  %v6501_v5 = vld [vmem:[#allocation8 + $0x558] sm:$0xf]  ;;  %v7193_v6 = vld [vmem:[#allocation8 + $0x570] sm:$0xf0] }
 0x310   :  { %4285 = vmatpush.bf16.msra.mxu2 %v6298_v46  ;;  %4298 = vmatpush.bf16.msra.mxu3 %v6522_v47  ;;  %v6579_v46 = vld [vmem:[#allocation8 + $0x614] sm:$0xf0]  ;;  %v5882_v47 = vor.u32 %v7035_v35, %v5879_v40  ;;  %v5969_v35 = vld [vmem:[#allocation8 + $0x130] sm:$0xf]  ;;  %v7060_v40 = vld [vmem:[#allocation8 + $0x148] sm:$0xf0] }
 0x311   :  { %4261 = vmatmul.bf16.vlgmr.msra.gmra.mxu0 %v7635_v55  ;;  %4274 = vmatmul.bf16.vlgmr.msra.gmra.mxu1 %v7637_v61  ;;  %v6582_v53 = vor.u32 %v7210_v45, %v6579_v46  ;;  %v6669_v45 = vld [vmem:[#allocation8 + $0x6a8] sm:$0xf]  ;;  %v7235_v46 = vld [vmem:[#allocation8 + $0x6c0] sm:$0xf0] }
 0x312   :  { %4305 = vmatpush.bf16.msrb.mxu0 %v6022_v38  ;;  %4318 = vmatpush.bf16.msrb.mxu1 %v6246_v39  ;;  %v7091_v38 = vld [vmem:[#allocation8 + $0x244] sm:$0xf]  ;;  %v6103_v39 = vld [vmem:[#allocation8 + $0x25c] sm:$0xf0] }
 0x313   :  { %v6106_v63 = vor.u32 %v7091_v38, %v6103_v39  ;;  %v6193_v38 = vld [vmem:[#allocation8 + $0x2f0] sm:$0xf]  ;;  %v7116_v39 = vld [vmem:[#allocation8 + $0x308] sm:$0xf0] }
 0x314   :  { %4286 = vmatpush.bf16.msra.mxu2 %v6270_v59  ;;  %4299 = vmatpush.bf16.msra.mxu3 %v6494_v60  ;;  %v5854_v59 = vor.u32 %v7028_v50, %v5851_v51  ;;  %v6078_v60 = vor.u32 %v7084_v54, %v6075_v48  ;;  %v6446_v54 = vor.u32 %v7179_v44, %v6445_v42 }
 0x315   :  { %v6670_v48 = vor.u32 %v7235_v46, %v6669_v45  ;;  %v5829_v45 = vld [vmem:[#allocation8 + $0x18] sm:$0xf]  ;;  %v7025_v46 = vld [vmem:[#allocation8 + $0x30] sm:$0xf0] }
 0x316   :  { %4306 = vmatpush.bf16.msrb.mxu0 %v5994_v26  ;;  %4319 = vmatpush.bf16.msrb.mxu1 %v6218_v22  ;;  %v7203_v26 = vld [vmem:[#allocation8 + $0x5c4] sm:$0xf]  ;;  %v6551_v22 = vld [vmem:[#allocation8 + $0x5dc] sm:$0xf0] }
 0x317   :  { %4287 = vmatmul.bf16.vlgmr.msra.gmra.mxu2 %v7641_v16  ;;  %4300 = vmatmul.bf16.vlgmr.msra.gmra.mxu3 %v7643_v14  ;;  %v6554_v1 = vor.u32 %v7203_v26, %v6551_v22  ;;  %v6417_v26 = vld [vmem:[#allocation8 + $0x4b0] sm:$0xf]  ;;  %v7172_v22 = vld [vmem:[#allocation8 + $0x4c8] sm:$0xf0] }
 0x318   :  { %4331 = vmatpush.bf16.msrb.mxu2 %v6470_v0  ;;  %4344 = vmatpush.bf16.msrb.mxu3 %v6694_v49  ;;  %v7077_v0 = vld [vmem:[#allocation8 + $0x1d4] sm:$0xf]  ;;  %v6330_v49 = vor.u32 %v7147_v56, %v6327_v57  ;;  %v6165_v56 = vld [vmem:[#allocation8 + $0x2b8] sm:$0xf] }
 0x319   :  { %v7109_v57 = vld [vmem:[#allocation8 + $0x2d0] sm:$0xf0] }
 0x31a   :  { %4307 = vmatpush.bf16.msrb.mxu0 %v5966_v7  ;;  %4320 = vmatpush.bf16.msrb.mxu1 %v6190_v9  ;;  %v7140_v7 = vld [vmem:[#allocation8 + $0x3cc] sm:$0xf]  ;;  %v6299_v9 = vld [vmem:[#allocation8 + $0x3e4] sm:$0xf0] }
 0x31b   :  { %v6302_v23 = vor.u32 %v7140_v7, %v6299_v9  ;;  %v6613_v7 = vld [vmem:[#allocation8 + $0x638] sm:$0xf]  ;;  %v7221_v9 = vld [vmem:[#allocation8 + $0x650] sm:$0xf0] }
 0x31c   :  { %4332 = vmatpush.bf16.msrb.mxu2 %v6442_v21  ;;  %4345 = vmatpush.bf16.msrb.mxu3 %v6666_v12  ;;  %v5826_v21 = vor.u32 %v7021_v18, %v5823_v19  ;;  %v6050_v12 = vor.u32 %v7077_v0, %v6047_v2  ;;  %v6166_v19 = vor.u32 %v7109_v57, %v6165_v56  ;;  %v5913_v0 = vld [vmem:[#allocation8 + $0xc0] sm:$0xf]  ;;  %v6305_v56 = vld [vmem:[#allocation8 + $0x3d0] sm:$0xf]  ;;  %v7144_v57 = vld [vmem:[#allocation8 + $0x3e8] sm:$0xf0] }
 0x31d   :  { %v6614_v15 = vor.u32 %v7221_v9, %v6613_v7 }
 0x31e   :  { %4308 = vmatpush.bf16.msrb.mxu0 %v5938_v10  ;;  %4321 = vmatpush.bf16.msrb.mxu1 %v6162_v58  ;;  %v6526_v10 = vor.u32 %v7196_v11, %v6523_v27  ;;  %v7123_v58 = vld [vmem:[#allocation8 + $0x340] sm:$0xf0]  ;;  %v6138_v27 = vor.u32 %v7102_v62, %v6137_v4  ;;  %v7137_v62 = vld [vmem:[#allocation8 + $0x3b0] sm:$0xf0] }
 0x31f   :  { %v6222_v31 = vor.u32 %v7123_v58, %v6221_v17  ;;  %v6109_v17 = vld [vmem:[#allocation8 + $0x248] sm:$0xf]  ;;  %v7158_v58 = vld [vmem:[#allocation8 + $0x458] sm:$0xf0] }
 0x320   :  { %4333 = vmatpush.bf16.msrb.mxu2 %v6414_v34  ;;  %4346 = vmatpush.bf16.msrb.mxu3 %v6638_v25  ;;  %v7189_v34 = vld [vmem:[#allocation8 + $0x554] sm:$0xf]  ;;  %v6495_v25 = vld [vmem:[#allocation8 + $0x56c] sm:$0xf0] }
 0x322   :  { %4309 = vmatpush.bf16.msrb.mxu0 %v5910_v32  ;;  %4322 = vmatpush.bf16.msrb.mxu1 %v6134_v33  ;;  %v6274_v32 = vor.u32 %v7133_v28, %v6271_v24  ;;  %v6498_v33 = vor.u32 %v7189_v34, %v6495_v25  ;;  %v6585_v28 = vld [vmem:[#allocation8 + $0x600] sm:$0xf]  ;;  %v7214_v24 = vld [vmem:[#allocation8 + $0x618] sm:$0xf0] }
 0x323   :  { %v7674_v34 = vld [vmem:[%s7728_s9] sm:$0xff] }
 0x324   :  { %4334 = vmatpush.bf16.msrb.mxu2 %v6386_v41  ;;  %4347 = vmatpush.bf16.msrb.mxu3 %v6610_v36  ;;  %v6474_v41 = vor.u32 %v7186_v29, %v6473_v8  ;;  %v6698_v36 = vor.u32 %v7242_v30, %v6697_v43  ;;  %v5857_v29 = vld [vmem:[#allocation8 + $0x50] sm:$0xf]  ;;  %v7032_v43 = vld [vmem:[#allocation8 + $0x68] sm:$0xf0] }
 0x325   :  { %v5858_v42 = vor.u32 %v7032_v43, %v5857_v29 }
 0x326   :  { %4310 = vmatpush.bf16.msrb.mxu0 %v5882_v47  ;;  %4323 = vmatpush.bf16.msrb.mxu1 %v6106_v63  ;;  %v5970_v47 = vor.u32 %v7060_v40, %v5969_v35  ;;  %v6194_v63 = vor.u32 %v7116_v39, %v6193_v38  ;;  %v7088_v35 = vld [vmem:[#allocation8 + $0x228] sm:$0xf0]  ;;  %v6333_v40 = vld [vmem:[#allocation8 + $0x408] sm:$0xf]  ;;  %v7207_v38 = vld [vmem:[#allocation8 + $0x5e0] sm:$0xf0] }
 0x327   :  { %v2879_v39 = vperm.slane %v7674_v34, 0 }
 0x328   :  { %4335 = vmatpush.bf16.msrb.mxu2 %v6358_v52  ;;  %4348 = vmatpush.bf16.msrb.mxu3 %v6582_v53  ;;  %v5941_v52 = vld [vmem:[#allocation8 + $0xf8] sm:$0xf]  ;;  %v7053_v53 = vld [vmem:[#allocation8 + $0x110] sm:$0xf0] }
 0x329   :  { %v5942_v18 = vor.u32 %v7053_v53, %v5941_v52 }
 0x32a   :  { %4311 = vmatpush.bf16.msrb.mxu0 %v5854_v59  ;;  %4324 = vmatpush.bf16.msrb.mxu1 %v6078_v60  ;;  %v6641_v59 = vld [vmem:[#allocation8 + $0x670] sm:$0xf]  ;;  %v7228_v60 = vld [vmem:[#allocation8 + $0x688] sm:$0xf0] }
 0x32b   :  { %v6642_v2 = vor.u32 %v7228_v60, %v6641_v59  ;;  %v2880_v59 = vperm.slane %v7674_v34, 1  ;;  %v5830_v60 = vor.u32 %v7025_v46, %v5829_v45 }
 0x32c   :  { %4336 = vmatpush.bf16.msrb.mxu2 %v6330_v49  ;;  %4349 = vmatpush.bf16.msrb.mxu3 %v6554_v1  ;;  %v7046_v49 = vld [vmem:[#allocation8 + $0xd8] sm:$0xf0]  ;;  %v6418_v1 = vor.u32 %v7172_v22, %v6417_v26  ;;  %v6529_v26 = vld [vmem:[#allocation8 + $0x590] sm:$0xf]  ;;  %v7200_v22 = vld [vmem:[#allocation8 + $0x5a8] sm:$0xf0] }
 0x32d   :  { %v7665_v50 = vpop.f32.mrf.mxu0  ;;  %v7667_v51 = vpop.f32.mrf.mxu1  ;;  %v5914_v11 = vor.u32 %v7046_v49, %v5913_v0  ;;  %v6306_v49 = vor.u32 %v7144_v57, %v6305_v56 }
 0x32e   :  { %4312 = vmatpush.bf16.msrb.mxu0 %v5826_v21  ;;  %4325 = vmatpush.bf16.msrb.mxu1 %v6050_v12  ;;  %v4055_v4 = vadd.f32 %v7665_v50, %v2879_v39 }
 0x330   :  { %4337 = vmatpush.bf16.msrb.mxu2 %v6302_v23  ;;  %4350 = vmatpush.bf16.msrb.mxu3 %v6526_v10  ;;  %v7095_v23 = vld [vmem:[#allocation8 + $0x260] sm:$0xf0]  ;;  %v6361_v10 = vld [vmem:[#allocation8 + $0x440] sm:$0xf] }
 0x331   :  { %4313 = vmatmul.bf16.vlgmr.msrb.gmra.mxu0 %v7635_v55  ;;  %4326 = vmatmul.bf16.vlgmr.msrb.gmra.mxu1 %v7637_v61  ;;  %v6110_v8 = vor.u32 %v7095_v23, %v6109_v17 }
 0x332   :  { %4357 = vmatpush.bf16.msra.mxu0 %v6026_v37  ;;  %4370 = vmatpush.bf16.msra.mxu1 %v6250_v3  ;;  %v5885_v37 = vld [vmem:[#allocation8 + $0x88] sm:$0xf]  ;;  %v7039_v3 = vld [vmem:[#allocation8 + $0xa0] sm:$0xf0] }
 0x333   :  { %v5886_v25 = vor.u32 %v7039_v3, %v5885_v37 }
 0x334   :  { %4338 = vmatpush.bf16.msrb.mxu2 %v6274_v32  ;;  %4351 = vmatpush.bf16.msrb.mxu3 %v6498_v33  ;;  %v6586_v32 = vor.u32 %v7214_v24, %v6585_v28  ;;  %v6081_v33 = vld [vmem:[#allocation8 + $0x210] sm:$0xf] }
 0x335   :  { %v4056_v21 = vpop.f32.mrf.mxu0  ;;  %v4069_v12 = vpop.f32.mrf.mxu1  ;;  %v6082_v44 = vor.u32 %v7088_v35, %v6081_v33 }
 0x336   :  { %4358 = vmatpush.bf16.msra.mxu0 %v5998_v20  ;;  %4371 = vmatpush.bf16.msra.mxu1 %v6222_v31  ;;  %v6362_v31 = vor.u32 %v7158_v58, %v6361_v10  ;;  %v6502_v21 = vor.u32 %v7193_v6, %v6501_v5  ;;  %v4068_v12 = vadd.f32 %v7667_v51, %v4055_v4 }
 0x337   :  { %4339 = vmatmul.bf16.vlgmr.msrb.gmra.mxu2 %v7641_v16  ;;  %4352 = vmatmul.bf16.vlgmr.msrb.gmra.mxu3 %v7643_v14 }
 0x338   :  { %4383 = vmatpush.bf16.msra.mxu2 %v6474_v41  ;;  %4396 = vmatpush.bf16.msra.mxu3 %v6698_v36  ;;  %v7151_v41 = vld [vmem:[#allocation8 + $0x420] sm:$0xf0]  ;;  %v6557_v36 = vld [vmem:[#allocation8 + $0x5c8] sm:$0xf] }
 0x339   :  { %v6334_v52 = vor.u32 %v7151_v41, %v6333_v40  ;;  %v6558_v53 = vor.u32 %v7207_v38, %v6557_v36 }
 0x33a   :  { %4359 = vmatpush.bf16.msra.mxu0 %v5970_v47  ;;  %4372 = vmatpush.bf16.msra.mxu1 %v6194_v63  ;;  %v4080_v30 = vpop.f32.mrf.mxu2  ;;  %v7676_v20 = vpop.f32.mrf.mxu3 }
 0x33b   :  { %v4081_v37 = vadd.f32 %v4080_v30, %v4068_v12 }
 0x33c   :  { %4384 = vmatpush.bf16.msra.mxu2 %v6446_v54  ;;  %4397 = vmatpush.bf16.msra.mxu3 %v6670_v48  ;;  %v6053_v54 = vld [vmem:[#allocation8 + $0x1d8] sm:$0xf]  ;;  %v7081_v48 = vld [vmem:[#allocation8 + $0x1f0] sm:$0xf0] }
 0x33d   :  { %v4094_v17 = vadd.f32 %v7676_v20, %v4081_v37 }
 0x33e   :  { %4360 = vmatpush.bf16.msra.mxu0 %v5942_v18  ;;  %4373 = vmatpush.bf16.msra.mxu1 %v6166_v19  ;;  %v4106_v47 = vpop.f32.mrf.mxu0  ;;  %v4119_v63 = vpop.f32.mrf.mxu1  ;;  %v6054_v18 = vor.u32 %v7081_v48, %v6053_v54  ;;  %v2882_v54 = vperm.slane %v7674_v34, 3 }
 0x33f   :  { %v4107_v7 = vadd.f32 %v4106_v47, %v2880_v59  ;;  %v2881_v47 = vperm.slane %v7674_v34, 2 }
 0x340   :  { %4385 = vmatpush.bf16.msra.mxu2 %v6418_v1  ;;  %4398 = vmatpush.bf16.msra.mxu3 %v6642_v2  ;;  %v6530_v1 = vor.u32 %v7200_v22, %v6529_v26  ;;  %v6277_v2 = vld [vmem:[#allocation8 + $0x398] sm:$0xf] }
 0x341   :  { %v4120_v50 = vadd.f32 %v4119_v63, %v4107_v7  ;;  %v7425_v63 = vmov 1065369472  }
 0x342   :  { %4361 = vmatpush.bf16.msra.mxu0 %v5914_v11  ;;  %4374 = vmatpush.bf16.msra.mxu1 %v6138_v27  ;;  %v4082_v19 = vpop.f32.mrf.mxu2  ;;  %v4095_v0 = vpop.f32.mrf.mxu3  ;;  %v6278_v27 = vor.u32 %v7137_v62, %v6277_v2 }
 0x344   :  { %4386 = vmatpush.bf16.msra.mxu2 %v6390_v13  ;;  %4399 = vmatpush.bf16.msra.mxu3 %v6614_v15 }
 0x346   :  { %4362 = vmatpush.bf16.msra.mxu0 %v5886_v25  ;;  %4375 = vmatpush.bf16.msra.mxu1 %v6110_v8  ;;  %v4108_v9 = vpop.f32.mrf.mxu0  ;;  %v4121_v11 = vpop.f32.mrf.mxu1 }
 0x348   :  { %4387 = vmatpush.bf16.msra.mxu2 %v6362_v31  ;;  %4400 = vmatpush.bf16.msra.mxu3 %v6586_v32 }
 0x34a   :  { %4363 = vmatpush.bf16.msra.mxu0 %v5858_v42  ;;  %4376 = vmatpush.bf16.msra.mxu1 %v6082_v44  ;;  %v4132_v3 = vpop.f32.mrf.mxu2  ;;  %v4145_v13 = vpop.f32.mrf.mxu3 }
 0x34b   :  { %v4133_v15 = vadd.f32 %v4132_v3, %v4120_v50 }
 0x34c   :  { %4388 = vmatpush.bf16.msra.mxu2 %v6334_v52  ;;  %4401 = vmatpush.bf16.msra.mxu3 %v6558_v53  ;;  %v7688_v52 = vunpack.c.h.bf16 %v7425_v63  ;;  %v7690_v53 = vunpack.c.l.bf16 %v7425_v63 }
 0x34d   :  { %v4146_v23 = vadd.f32 %v4145_v13, %v4133_v15 }
 0x34e   :  { %4364 = vmatpush.bf16.msra.mxu0 %v5830_v60  ;;  %4377 = vmatpush.bf16.msra.mxu1 %v6054_v18  ;;  %v4158_v10 = vpop.f32.mrf.mxu0  ;;  %v4171_v51 = vpop.f32.mrf.mxu1 }
 0x34f   :  { %v4409_v58 = vpack.c.bf16 %v4146_v23, %v4094_v17  ;;  %v4159_v57 = vadd.f32 %v4158_v10, %v2881_v47 }
 0x350   :  { %4389 = vmatpush.bf16.msra.mxu2 %v6306_v49  ;;  %4402 = vmatpush.bf16.msra.mxu3 %v6530_v1 }
 0x351   :  { %4365 = vmatmul.bf16.vlgmr.msra.gmra.mxu0 %v7635_v55  ;;  %4378 = vmatmul.bf16.vlgmr.msra.gmra.mxu1 %v7637_v61  ;;  %v4413_v55 = vxor.u32 2147516416, %v4409_v58  ;;  %v4172_v0 = vadd.f32 %v4171_v51, %v4159_v57 }
 0x352   :  { %v4134_v28 = vpop.f32.mrf.mxu2  ;;  %v4147_v61 = vpop.f32.mrf.mxu3 }
 0x353   :  { %v4417_v24 = vunpack.c.l.bf16 %v4413_v55  ;;  %v4418_v25 = vunpack.c.h.bf16 %v4413_v55 }
 0x354   :  { %4390 = vmatpush.bf16.msra.mxu2 %v6278_v27  ;;  %4403 = vmatpush.bf16.msra.mxu3 %v6502_v21 }
 0x355   :  { %v4424_v8 = vmul.f32 1.442695, %v4417_v24  ;;  %v4426_v29 = vmul.f32 1.442695, %v4418_v25 }
 0x356   :  { %v4160_v43 = vpop.f32.mrf.mxu0  ;;  %v4173_v30 = vpop.f32.mrf.mxu1 }
 0x357   :  { %4391 = vmatmul.bf16.vlgmr.msra.gmra.mxu2 %v7641_v16  ;;  %4404 = vmatmul.bf16.vlgmr.msra.gmra.mxu3 %v7643_v14  ;;  %7257 = vpow2.f32 %v4424_v8 }
 0x358   :  { %7259 = vpow2.f32 %v4426_v29 }
 0x35a   :  { %v4184_v20 = vpop.f32.mrf.mxu2  ;;  %v4197_v31 = vpop.f32.mrf.mxu3 }
 0x35b   :  { %v4185_v49 = vadd.f32 %v4184_v20, %v4172_v0 }
 0x35d   :  { %v7258_v32 = vpop.eup %7257  ;;  %v4198_v5 = vadd.f32 %v4197_v31, %v4185_v49 }
 0x35e   :  { %v7260_v16 = vpop.eup %7259 }
 0x35f   :  { %v4438_v33 = vpack.c.bf16 %v7260_v16, %v7258_v32 }
 0x361   :  { %v4442_v14 = vunpack.c.l.bf16 %v4438_v33  ;;  %v4443_v35 = vunpack.c.h.bf16 %v4438_v33 }
 0x362   :  { %v4186_v36 = vpop.f32.mrf.mxu2  ;;  %v4199_v38 = vpop.f32.mrf.mxu3 }
 0x363   :  { %v4449_v40 = vadd.f32 1.0, %v4442_v14  ;;  %v4450_v41 = vadd.f32 1.0, %v4443_v35  ;;  %v2884_v36 = vperm.slane %v7674_v34, 5 }
 0x365   :  { %v4456_v39 = vpack.c.bf16 %v4450_v41, %v4449_v40  ;;  %v2883_v41 = vperm.slane %v7674_v34, 4 }
 0x367   :  { %v4462_v42 = vunpack.c.h.bf16 %v4456_v39  ;;  %v4463_v44 = vunpack.c.l.bf16 %v4456_v39 }
 0x369   :  { %7261 = vrcp.f32 %v4462_v42 }
 0x36a   :  { %7263 = vrcp.f32 %v4463_v44 }
 0x36e   :  { %v4210_v45 = vpop.f32.mrf.mxu0  ;;  %v4223_v46 = vpop.f32.mrf.mxu1 }
 0x36f   :  { %v7262_v48 = vpop.eup %7261  ;;  %v4211_v59 = vadd.f32 %v4210_v45, %v2882_v54 }
 0x370   :  { %v7264_v56 = vpop.eup %7263  ;;  %v4465_v26 = vmul.f32 %v7262_v48, %v7688_v52 }
 0x371   :  { %v4467_v22 = vmul.f32 %v7264_v56, %v7690_v53  ;;  %v4224_v1 = vadd.f32 %v4223_v46, %v4211_v59 }
 0x373   :  { %v4468_v19 = vpack.c.bf16 %v4465_v26, %v4467_v22 }
 0x375   :  { %4490 = vst [vmem:[%s7729_s10] sm:$0xff] %v4468_v19 }
 0x376   :  { %v4212_v60 = vpop.f32.mrf.mxu0  ;;  %v4225_v18 = vpop.f32.mrf.mxu1 }
 0x37a   :  { %v4236_v2 = vpop.f32.mrf.mxu2  ;;  %v4249_v4 = vpop.f32.mrf.mxu3 }
 0x37b   :  { %v4237_v62 = vadd.f32 %v4236_v2, %v4224_v1 }
 0x37d   :  { %v4250_v6 = vadd.f32 %v4249_v4, %v4237_v62 }
 0x37f   :  { %v4410_v7 = vpack.c.bf16 %v4250_v6, %v4198_v5  ;;  %v2885_v5 = vperm.slane %v7674_v34, 6 }
 0x381   :  { %v4414_v9 = vxor.u32 2147516416, %v4410_v7 }
 0x382   :  { %v4238_v11 = vpop.f32.mrf.mxu2  ;;  %v4251_v27 = vpop.f32.mrf.mxu3 }
 0x383   :  { %v4419_v21 = vunpack.c.l.bf16 %v4414_v9  ;;  %v4420_v12 = vunpack.c.h.bf16 %v4414_v9 }
 0x385   :  { %v4428_v37 = vmul.f32 1.442695, %v4419_v21  ;;  %v4430_v50 = vmul.f32 1.442695, %v4420_v12 }
 0x387   :  { %7265 = vpow2.f32 %v4428_v37 }
 0x388   :  { %7267 = vpow2.f32 %v4430_v50 }
 0x38d   :  { %v7266_v15 = vpop.eup %7265 }
 0x38e   :  { %v4262_v3 = vpop.f32.mrf.mxu0  ;;  %v4275_v13 = vpop.f32.mrf.mxu1 }
 0x38f   :  { %v7268_v17 = vpop.eup %7267  ;;  %v4263_v38 = vadd.f32 %v4262_v3, %v2883_v41 }
 0x390   :  { %v4439_v23 = vpack.c.bf16 %v7268_v17, %v7266_v15 }
 0x391   :  { %v4276_v45 = vadd.f32 %v4275_v13, %v4263_v38 }
 0x392   :  { %v4444_v10 = vunpack.c.l.bf16 %v4439_v23  ;;  %v4445_v51 = vunpack.c.h.bf16 %v4439_v23 }
 0x394   :  { %v4451_v58 = vadd.f32 1.0, %v4444_v10  ;;  %v4452_v55 = vadd.f32 1.0, %v4445_v51 }
 0x396   :  { %v4264_v28 = vpop.f32.mrf.mxu0  ;;  %v4277_v61 = vpop.f32.mrf.mxu1  ;;  %v4457_v24 = vpack.c.bf16 %v4452_v55, %v4451_v58 }
 0x398   :  { %v4469_v25 = vunpack.c.h.bf16 %v4457_v24  ;;  %v4470_v8 = vunpack.c.l.bf16 %v4457_v24 }
 0x39a   :  { %v4288_v29 = vpop.f32.mrf.mxu2  ;;  %v4301_v43 = vpop.f32.mrf.mxu3  ;;  %7269 = vrcp.f32 %v4469_v25 }
 0x39b   :  { %7271 = vrcp.f32 %v4470_v8  ;;  %v4289_v46 = vadd.f32 %v4288_v29, %v4276_v45 }
 0x39d   :  { %v4302_v56 = vadd.f32 %v4301_v43, %v4289_v46 }
 0x3a0   :  { %v7270_v30 = vpop.eup %7269 }
 0x3a1   :  { %v7272_v20 = vpop.eup %7271  ;;  %v4472_v16 = vmul.f32 %v7270_v30, %v7688_v52 }
 0x3a2   :  { %v4290_v31 = vpop.f32.mrf.mxu2  ;;  %v4303_v32 = vpop.f32.mrf.mxu3  ;;  %v4474_v33 = vmul.f32 %v7272_v20, %v7690_v53 }
 0x3a4   :  { %v4475_v14 = vpack.c.bf16 %v4472_v16, %v4474_v33 }
 0x3a6   :  { %4491 = vst [vmem:[%s7729_s10 + $0x8] sm:$0xff] %v4475_v14 }
 0x3ae   :  { %v4314_v35 = vpop.f32.mrf.mxu0  ;;  %v4327_v40 = vpop.f32.mrf.mxu1 }
 0x3af   :  { %v4315_v39 = vadd.f32 %v4314_v35, %v2884_v36 }
 0x3b1   :  { %v4328_v47 = vadd.f32 %v4327_v40, %v4315_v39 }
 0x3b6   :  { %v4316_v42 = vpop.f32.mrf.mxu0  ;;  %v4329_v44 = vpop.f32.mrf.mxu1 }
 0x3ba   :  { %v4340_v63 = vpop.f32.mrf.mxu2  ;;  %v4353_v54 = vpop.f32.mrf.mxu3 }
 0x3bb   :  { %v4341_v48 = vadd.f32 %v4340_v63, %v4328_v47 }
 0x3bd   :  { %v4354_v57 = vadd.f32 %v4353_v54, %v4341_v48 }
 0x3bf   :  { %v4411_v26 = vpack.c.bf16 %v4354_v57, %v4302_v56 }
 0x3c1   :  { %v4415_v22 = vxor.u32 2147516416, %v4411_v26 }
 0x3c2   :  { %v4342_v59 = vpop.f32.mrf.mxu2  ;;  %v4355_v60 = vpop.f32.mrf.mxu3 }
 0x3c3   :  { %v4421_v18 = vunpack.c.l.bf16 %v4415_v22  ;;  %v4422_v19 = vunpack.c.h.bf16 %v4415_v22 }
 0x3c5   :  { %v4432_v0 = vmul.f32 1.442695, %v4421_v18  ;;  %v4434_v49 = vmul.f32 1.442695, %v4422_v19 }
 0x3c7   :  { %7273 = vpow2.f32 %v4432_v0 }
 0x3c8   :  { %7275 = vpow2.f32 %v4434_v49 }
 0x3cd   :  { %v7274_v4 = vpop.eup %7273 }
 0x3ce   :  { %v4366_v1 = vpop.f32.mrf.mxu0  ;;  %v4379_v2 = vpop.f32.mrf.mxu1 }
 0x3cf   :  { %v7276_v62 = vpop.eup %7275  ;;  %v4367_v11 = vadd.f32 %v4366_v1, %v2885_v5 }
 0x3d0   :  { %v4440_v6 = vpack.c.bf16 %v7276_v62, %v7274_v4 }
 0x3d1   :  { %v4380_v3 = vadd.f32 %v4379_v2, %v4367_v11 }
 0x3d2   :  { %v4446_v7 = vunpack.c.l.bf16 %v4440_v6  ;;  %v4447_v9 = vunpack.c.h.bf16 %v4440_v6 }
 0x3d4   :  { %v4453_v27 = vadd.f32 1.0, %v4446_v7  ;;  %v4454_v21 = vadd.f32 1.0, %v4447_v9 }
 0x3d6   :  { %v4368_v12 = vpop.f32.mrf.mxu0  ;;  %v4381_v37 = vpop.f32.mrf.mxu1  ;;  %v4458_v50 = vpack.c.bf16 %v4454_v21, %v4453_v27 }
 0x3d8   :  { %v4476_v13 = vunpack.c.h.bf16 %v4458_v50  ;;  %v4477_v15 = vunpack.c.l.bf16 %v4458_v50 }
 0x3da   :  { %v4392_v17 = vpop.f32.mrf.mxu2  ;;  %v4405_v23 = vpop.f32.mrf.mxu3  ;;  %7277 = vrcp.f32 %v4476_v13 }
 0x3db   :  { %v4393_v10 = vadd.f32 %v4392_v17, %v4380_v3  ;;  %7279 = vrcp.f32 %v4477_v15 }
 0x3dd   :  { %v4406_v51 = vadd.f32 %v4405_v23, %v4393_v10 }
 0x3df   :  { %v4412_v58 = vpack.c.bf16 %v4406_v51, %v4406_v51 }
 0x3e0   :  { %v7278_v55 = vpop.eup %7277 }
 0x3e1   :  { %v4416_v34 = vxor.u32 2147516416, %v4412_v58  ;;  %v7280_v24 = vpop.eup %7279  ;;  %v4479_v8 = vmul.f32 %v7278_v55, %v7688_v52 }
 0x3e2   :  { %v4394_v28 = vpop.f32.mrf.mxu2  ;;  %v4407_v61 = vpop.f32.mrf.mxu3  ;;  %v4481_v29 = vmul.f32 %v7280_v24, %v7690_v53 }
 0x3e3   :  { %v4423_v25 = vunpack.c.l.bf16 %v4416_v34 }
 0x3e4   :  { %v4482_v30 = vpack.c.bf16 %v4479_v8, %v4481_v29 }
 0x3e5   :  { %v4436_v43 = vmul.f32 1.442695, %v4423_v25 }
 0x3e6   :  { %4492 = vst [vmem:[%s7729_s10 + $0x10] sm:$0xff] %v4482_v30 }
 0x3e7   :  { %7281 = vpow2.f32 %v4436_v43 }
 0x3ed   :  { %v7282_v20 = vpop.eup %7281 }
 0x3ee   :  { %v4441_v31 = vpack.c.bf16 %v7282_v20, %v7282_v20 }
 0x3f0   :  { %v4448_v32 = vunpack.c.l.bf16 %v4441_v31 }
 0x3f2   :  { %v4455_v16 = vadd.f32 1.0, %v4448_v32 }
 0x3f4   :  { %v4459_v33 = vpack.c.bf16 %v4455_v16, %v4455_v16 }
 0x3f6   :  { %v4483_v14 = vunpack.c.h.bf16 %v4459_v33  ;;  %v4484_v35 = vunpack.c.l.bf16 %v4459_v33 }
 0x3f8   :  { %7283 = vrcp.f32 %v4483_v14 }
 0x3f9   :  { %7285 = vrcp.f32 %v4484_v35 }
 0x3fe   :  { %v7284_v40 = vpop.eup %7283 }
 0x3ff   :  { %v7286_v41 = vpop.eup %7285  ;;  %v4486_v36 = vmul.f32 %v7284_v40, %v7688_v52 }
 0x400   :  { %v4488_v38 = vmul.f32 %v7286_v41, %v7690_v53 }
 0x402   :  { %v4489_v39 = vpack.c.bf16 %v4486_v36, %v4488_v38 }
 0x404   :  { %4493 = vst [vmem:[%s7729_s10 + $0x18] sm:$0xf] %v4489_v39 }
 0x405   :  { %7413 = dma.done.wait [#allocation4], 128  }
 0x406   :  { %7414 = vsyncadd [#allocation4], 4294967168 }
 0x407   :  { %4519 = vsyncpa [#allocation3], 1 }
 0x408   :  { %4520 = vsyncpa [#allocation6], 1 }
 0x409   :  { %4521 = vsyncpa [#allocation9], 1 }
 0x40a   :  { %4522 = vsyncpa [#allocation4], 1 }

</bundles_post_ra>
